<compile_context>
chip_gen: v7x
topology: tpu7x:2x2x1
jax: 0.10.0
libtpu: 0.0.40
codegen_flags: <defaults>
</compile_context>

<pallas_src>
import jax
import jax.numpy as jnp
from jax import lax
from jax.experimental import pallas as pl
from jax.experimental.pallas import tpu as pltpu

K = 7          # conv kernel size
PAD = 3        # conv padding
LANE_CHUNK = 1024   # lane tile: keeps max/sum accumulators resident in vregs


def _round_up(v, m):
    return ((v + m - 1) // m) * m


def _pick_c_block(C, HW, itemsize):
    """Channel tile: largest ~<=4MiB sublane-packed tile; exact divisor if possible.

    Returns (C_blk, ragged).  ragged=True means C % C_blk != 0 and the last
    channel block must be masked in-kernel.
    """
    sub = 8 * max(1, 4 // max(1, itemsize))        # 8 (f32) / 16 (bf16) / 32 (i8)
    target = 4 << 20                               # ~4 MiB per pipelined input tile
    cap = max(1, min(target // max(1, HW * itemsize), 1024))
    if C <= cap:
        return C, False
    best = None
    for d in range(sub, cap + 1, sub):             # largest divisor <= cap, mult of sub
        if C % d == 0:
            best = d
    if best is not None:
        return best, False
    # No suitable exact divisor: ragged last block, rows >= C masked in-kernel.
    return max(sub, (cap // sub) * sub), True


def spatial_attention(x, conv_weight):
    """x: (N, C, H, W). conv_weight: (1, 2, 7, 7), no bias. Returns (N, 1, H, W)."""
    N, C, H, W = x.shape
    HW = H * W
    itemsize = jnp.dtype(x.dtype).itemsize
    C_blk, ragged = _pick_c_block(C, HW, itemsize)
    n_k = pl.cdiv(C, C_blk)
    SL = 8 * max(1, 4 // max(1, itemsize))         # slab rows = sublane packing
    nfull = C_blk // SL
    rem = C_blk - nfull * SL                       # ragged fallback guarantees rem == 0
    MARGIN = _round_up(PAD * W + PAD, 128)         # covers combined row+col shifts
    WIDTH = HW + 2 * MARGIN
    lane_chunks = [(c0, min(LANE_CHUNK, HW - c0)) for c0 in range(0, HW, LANE_CHUNK)]
    inv_C = 1.0 / C

    x2 = x.reshape(N, C, HW)                                  # free reshape
    w_flat = conv_weight.reshape(-1).astype(jnp.float32)      # (2*K*K,) -> SMEM

    def kernel(x_ref, w_ref, o_ref, max_acc, sum_acc, flat_ref):
        k = pl.program_id(1)

        @pl.when(k == 0)
        def _init():
            max_acc[...] = jnp.full(max_acc.shape, -jnp.inf, max_acc.dtype)
            sum_acc[...] = jnp.zeros(sum_acc.shape, sum_acc.dtype)
            # Zero only the conv-padding margins; the interior is overwritten
            # in the epilogue, so no full-scratch zeroing per batch.
            zmargin = jnp.zeros((2, MARGIN), jnp.float32)
            flat_ref[0:2, 0:MARGIN] = zmargin
            flat_ref[0:2, MARGIN + HW:WIDTH] = zmargin

        # ---- fused running max / running sum over this channel chunk ----
        if ragged:
            c_base = k * C_blk                     # first global channel of this block

        for (c0, L) in lane_chunks:
            csl = pl.ds(c0, L)
            m = max_acc[:, csl]                    # (8, L) resident accumulators
            s = sum_acc[:, csl]
            if ragged:
                row_iota = lax.broadcasted_iota(jnp.int32, (SL, L), 0)
            for r in range(nfull):                 # static unroll, packing-aligned slabs
                slab = x_ref[pl.ds(r * SL, SL), csl].astype(jnp.float32)
                if ragged:                         # mask rows beyond the true C
                    valid = (c_base + r * SL + row_iota) < C
                    slab_m = jnp.where(valid, slab, -jnp.inf)
                    slab_s = jnp.where(valid, slab, 0.0)
                else:
                    slab_m, slab_s = slab, slab
                for p in range(SL // 8):
                    m = jnp.maximum(m, slab_m[p * 8:(p + 1) * 8, :])
                    s = s + slab_s[p * 8:(p + 1) * 8, :]
            if nfull:
                max_acc[:, csl] = m
                sum_acc[:, csl] = s
            if rem:                                # leftover rows fold into row 0 only
                rowv = x_ref[pl.ds(nfull * SL, 1), csl].astype(jnp.float32)
                rm, rs = rowv, rowv
                for t in range(1, rem):
                    rowv = x_ref[pl.ds(nfull * SL + t, 1), csl].astype(jnp.float32)
                    rm = jnp.maximum(rm, rowv)
                    rs = rs + rowv
                max_acc[0:1, csl] = jnp.maximum(m[0:1, :], rm)
                sum_acc[0:1, csl] = s[0:1, :] + rs

        # ---- epilogue: 7x7 conv over [max, avg] + sigmoid(a)*a (last chunk) ----
        @pl.when(k == pl.num_programs(1) - 1)
        def _finish():
            # 8->1 sublane reduce (XLU) per lane chunk, written straight into the
            # zero-margined scratch (row 0 = max map, row 1 = avg map).
            for (c0, L) in lane_chunks:
                csl = pl.ds(c0, L)
                flat_ref[0:1, pl.ds(MARGIN + c0, L)] = jnp.max(
                    max_acc[:, csl], axis=0, keepdims=True)
                flat_ref[1:2, pl.ds(MARGIN + c0, L)] = jnp.sum(
                    sum_acc[:, csl], axis=0, keepdims=True) * inv_C

            # Fused 49-tap conv: each tap reads the maps at the combined
            # (row, col) offset; zero margins supply row padding, an in-kernel
            # iota mask supplies column-boundary zeroing.  Lane-chunked so only
            # a small accumulator stays live.
            for (c0, L) in lane_chunks:
                wpos = (lax.broadcasted_iota(jnp.int32, (1, L), 1) + c0) % W
                acc = jnp.zeros((1, L), jnp.float32)
                for j in range(K):
                    dj = j - PAD
                    if dj != 0:
                        cmask = ((wpos + dj >= 0) & (wpos + dj < W)).astype(jnp.float32)
                    for i in range(K):
                        di = i - PAD
                        off = MARGIN + c0 + di * W + dj          # static offset
                        vm = flat_ref[0:1, pl.ds(off, L)]
                        va = flat_ref[1:2, pl.ds(off, L)]
                        tap = w_ref[i * K + j] * vm + w_ref[K * K + i * K + j] * va
                        if dj != 0:
                            tap = tap * cmask
                        acc = acc + tap
                out = jax.nn.sigmoid(acc) * acc                  # sigmoid(conv)*conv
                o_ref[0:1, pl.ds(c0, L)] = out.astype(o_ref.dtype)

    # ---- specs / pipelining / compiler hints ----
    x_idx = lambda n, k: (n, k, 0)
    x_block = (None, C_blk, HW)
    x_spec = pl.BlockSpec(x_block, x_idx)
    n_buf = 2
    if n_k >= 3 and hasattr(pl, "Buffered"):
        # Deeper input buffering mainly helps v7x (~3.2 TB/s HBM); only worth a
        # third buffer when there are several channel steps to hide behind.
        try:
            x_spec = pl.BlockSpec(x_block, x_idx, pipeline_mode=pl.Buffered(3))
            n_buf = 3
        except (TypeError, AttributeError):
            x_spec = pl.BlockSpec(x_block, x_idx)
            n_buf = 2

    tile_bytes = C_blk * HW * itemsize
    scratch_bytes = 2 * 8 * HW * 4 + 2 * WIDTH * 4
    out_bytes = 2 * 1 * HW * itemsize
    need = n_buf * tile_bytes + out_bytes + scratch_bytes + (2 << 20)
    vmem_limit = int(min(max(need, 32 << 20), 128 << 20))

    cost = pl.CostEstimate(
        flops=int(N * HW * (2 * C + 4 * K * K + 8)),
        transcendentals=int(N * HW),
        bytes_accessed=int(N * C * HW * itemsize + N * HW * itemsize + 2 * K * K * 4))

    out_flat = pl.pallas_call(
        kernel,
        out_shape=jax.ShapeDtypeStruct((N, 1, HW), x.dtype),
        grid=(N, n_k),
        in_specs=[
            x_spec,
            pl.BlockSpec(memory_space=pltpu.SMEM),            # conv weights (98 scalars)
        ],
        out_specs=pl.BlockSpec((None, 1, HW), lambda n, k: (n, 0, 0)),
        scratch_shapes=[
            pltpu.VMEM((8, HW), jnp.float32),                 # running max
            pltpu.VMEM((8, HW), jnp.float32),                 # running sum
            pltpu.VMEM((2, WIDTH), jnp.float32),              # zero-margined maps
        ],
        compiler_params=pltpu.CompilerParams(
            dimension_semantics=("parallel", "arbitrary"),
            vmem_limit_bytes=vmem_limit),
        cost_estimate=cost,
    )(x2, w_flat)

    return out_flat.reshape(N, 1, H, W)


def spatial_attention_ref(x, conv_weight):
    """Pure-JAX reference mirroring the PyTorch module."""
    max_out = jnp.max(x, axis=1, keepdims=True)
    avg_out = jnp.mean(x, axis=1, keepdims=True)
    stacked = jnp.concatenate([max_out, avg_out], axis=1)     # (N, 2, H, W)
    a = lax.conv_general_dilated(
        stacked, conv_weight,
        window_strides=(1, 1), padding=((PAD, PAD), (PAD, PAD)),
        dimension_numbers=("NCHW", "OIHW", "NCHW"))
    return jax.nn.sigmoid(a) * a


if __name__ == "__main__":
    key = jax.random.PRNGKey(0)
    kx, kw = jax.random.split(key)

    N, C, H, W = 2, 4, 16, 16
    x = jax.random.normal(kx, (N, C, H, W), dtype=jnp.float32)
    # Deterministic synthetic conv weight, shape (out=1, in=2, 7, 7), no bias.
    conv_weight = (jax.random.uniform(kw, (1, 2, K, K), dtype=jnp.float32) - 0.5) * 0.2

    out = spatial_attention(x, conv_weight)
    out = jax.block_until_ready(out)

    ref = spatial_attention_ref(x, conv_weight)
    assert out.shape == (N, 1, H, W)
    err = float(jnp.max(jnp.abs(out - ref)))
    assert jnp.allclose(out, ref, atol=1e-5, rtol=1e-5), err

    print("KERNEL_OK")
</pallas_src>

<mosaic_0001>
module attributes {stable_mosaic.version = 11 : i64} {
  func.func @kernel(%arg0: i32, %arg1: i32, %arg2: memref<1x4x256xf32, #tpu.memory_space<vmem>>, %arg3: memref<98xf32, #tpu.memory_space<smem>>, %arg4: memref<1x1x256xf32, #tpu.memory_space<vmem>>, %arg5: memref<8x256xf32, #tpu.memory_space<vmem>>, %arg6: memref<8x256xf32, #tpu.memory_space<vmem>>, %arg7: memref<2x512xf32, #tpu.memory_space<vmem>>) attributes {dimension_semantics = [#tpu.dimension_semantics<parallel>, #tpu.dimension_semantics<arbitrary>], iteration_bounds = array<i64: 2, 1>, scalar_prefetch = 0 : i64, scratch_operands = 3 : i64, tpu.core_type = #tpu.core_type<tc>, window_params = [{transform_indices = @transform_0, window_bounds = array<i64: 1, 4, 256>}, {transform_indices = @transform_1, window_bounds = array<i64: 98>}, {transform_indices = @transform_2, window_bounds = array<i64: 1, 1, 256>}]} {
    %c0_i32 = arith.constant 0 : i32
    %0 = arith.cmpi eq, %arg1, %c0_i32 : i32
    %1 = arith.extui %0 : i1 to i32
    %c0_i32_0 = arith.constant 0 : i32
    %2 = arith.cmpi ne, %1, %c0_i32_0 : i32
    scf.if %2 {
      %cst = arith.constant 0xFF800000 : f32
      %28 = vector.broadcast %cst : f32 to vector<8x256xf32>
      %c0_19 = arith.constant 0 : index
      %c0_20 = arith.constant 0 : index
      %29 = vector.load %arg5[%c0_19, %c0_20] : memref<8x256xf32, #tpu.memory_space<vmem>>, vector<8x256xf32>
      tpu.vector_store %arg5[%c0_19, %c0_20], %28 {strides = array<i32>} : memref<8x256xf32, #tpu.memory_space<vmem>>, vector<8x256xf32>,
      %cst_21 = arith.constant 0.000000e+00 : f32
      %30 = vector.broadcast %cst_21 : f32 to vector<8x256xf32>
      %c0_22 = arith.constant 0 : index
      %c0_23 = arith.constant 0 : index
      %31 = vector.load %arg6[%c0_22, %c0_23] : memref<8x256xf32, #tpu.memory_space<vmem>>, vector<8x256xf32>
      tpu.vector_store %arg6[%c0_22, %c0_23], %30 {strides = array<i32>} : memref<8x256xf32, #tpu.memory_space<vmem>>, vector<8x256xf32>,
      %cst_24 = arith.constant 0.000000e+00 : f32
      %32 = vector.broadcast %cst_24 : f32 to vector<2x128xf32>
      %c0_25 = arith.constant 0 : index
      %c0_26 = arith.constant 0 : index
      %33 = vector.load %arg7[%c0_25, %c0_26] : memref<2x512xf32, #tpu.memory_space<vmem>>, vector<2x128xf32>
      tpu.vector_store %arg7[%c0_25, %c0_26], %32 {strides = array<i32>} : memref<2x512xf32, #tpu.memory_space<vmem>>, vector<2x128xf32>,
      %c0_27 = arith.constant 0 : index
      %c384 = arith.constant 384 : index
      %34 = vector.load %arg7[%c0_27, %c384] : memref<2x512xf32, #tpu.memory_space<vmem>>, vector<2x128xf32>
      tpu.vector_store %arg7[%c0_27, %c384], %32 {strides = array<i32>} : memref<2x512xf32, #tpu.memory_space<vmem>>, vector<2x128xf32>,
    } else {
    }
    %c0 = arith.constant 0 : index
    %c0_1 = arith.constant 0 : index
    %3 = vector.load %arg5[%c0, %c0_1] : memref<8x256xf32, #tpu.memory_space<vmem>>, vector<8x256xf32>
    %c0_2 = arith.constant 0 : index
    %c0_3 = arith.constant 0 : index
    %4 = vector.load %arg6[%c0_2, %c0_3] : memref<8x256xf32, #tpu.memory_space<vmem>>, vector<8x256xf32>
    %c0_4 = arith.constant 0 : index
    %c0_5 = arith.constant 0 : index
    %c0_6 = arith.constant 0 : index
    %5 = vector.load %arg2[%c0_4, %c0_5, %c0_6] : memref<1x4x256xf32, #tpu.memory_space<vmem>>, vector<1x1x256xf32>
    %6 = vector.shape_cast %5 : vector<1x1x256xf32> to vector<1x256xf32>
    %c0_7 = arith.constant 0 : index
    %c1 = arith.constant 1 : index
    %c0_8 = arith.constant 0 : index
    %7 = vector.load %arg2[%c0_7, %c1, %c0_8] : memref<1x4x256xf32, #tpu.memory_space<vmem>>, vector<1x1x256xf32>
    %8 = vector.shape_cast %7 : vector<1x1x256xf32> to vector<1x256xf32>
    %9 = arith.maximumf %6, %8 : vector<1x256xf32>
    %10 = arith.addf %6, %8 : vector<1x256xf32>
    %c0_9 = arith.constant 0 : index
    %c2 = arith.constant 2 : index
    %c0_10 = arith.constant 0 : index
    %11 = vector.load %arg2[%c0_9, %c2, %c0_10] : memref<1x4x256xf32, #tpu.memory_space<vmem>>, vector<1x1x256xf32>
    %12 = vector.shape_cast %11 : vector<1x1x256xf32> to vector<1x256xf32>
    %13 = arith.maximumf %9, %12 : vector<1x256xf32>
    %14 = arith.addf %10, %12 : vector<1x256xf32>
    %c0_11 = arith.constant 0 : index
    %c3 = arith.constant 3 : index
    %c0_12 = arith.constant 0 : index
    %15 = vector.load %arg2[%c0_11, %c3, %c0_12] : memref<1x4x256xf32, #tpu.memory_space<vmem>>, vector<1x1x256xf32>
    %16 = vector.shape_cast %15 : vector<1x1x256xf32> to vector<1x256xf32>
    %17 = arith.maximumf %13, %16 : vector<1x256xf32>
    %18 = arith.addf %14, %16 : vector<1x256xf32>
    %19 = vector.extract_strided_slice %3 {offsets = [0, 0], sizes = [1, 256], strides = [1, 1]} : vector<8x256xf32> to vector<1x256xf32>
    %20 = arith.maximumf %19, %17 : vector<1x256xf32>
    %c0_13 = arith.constant 0 : index
    %c0_14 = arith.constant 0 : index
    %21 = vector.load %arg5[%c0_13, %c0_14] : memref<8x256xf32, #tpu.memory_space<vmem>>, vector<1x256xf32>
    tpu.vector_store %arg5[%c0_13, %c0_14], %20 {strides = array<i32>} : memref<8x256xf32, #tpu.memory_space<vmem>>, vector<1x256xf32>,
    %22 = vector.extract_strided_slice %4 {offsets = [0, 0], sizes = [1, 256], strides = [1, 1]} : vector<8x256xf32> to vector<1x256xf32>
    %23 = arith.addf %22, %18 : vector<1x256xf32>
    %c0_15 = arith.constant 0 : index
    %c0_16 = arith.constant 0 : index
    %24 = vector.load %arg6[%c0_15, %c0_16] : memref<8x256xf32, #tpu.memory_space<vmem>>, vector<1x256xf32>
    tpu.vector_store %arg6[%c0_15, %c0_16], %23 {strides = array<i32>} : memref<8x256xf32, #tpu.memory_space<vmem>>, vector<1x256xf32>,
    %c0_i32_17 = arith.constant 0 : i32
    %25 = arith.cmpi eq, %arg1, %c0_i32_17 : i32
    %26 = arith.extui %25 : i1 to i32
    %c0_i32_18 = arith.constant 0 : i32
    %27 = arith.cmpi ne, %26, %c0_i32_18 : i32
    scf.if %27 {
      %c0_19 = arith.constant 0 : index
      %c0_20 = arith.constant 0 : index
      %28 = vector.load %arg5[%c0_19, %c0_20] : memref<8x256xf32, #tpu.memory_space<vmem>>, vector<8x256xf32>
      %cst = arith.constant dense<0xFF800000> : vector<256xf32>
      %29 = vector.multi_reduction <maximumf>, %28, %cst [0] : vector<8x256xf32> to vector<256xf32>
      %30 = vector.shape_cast %29 : vector<256xf32> to vector<1x256xf32>
      %c0_21 = arith.constant 0 : index
      %c128 = arith.constant 128 : index
      %31 = vector.load %arg7[%c0_21, %c128] : memref<2x512xf32, #tpu.memory_space<vmem>>, vector<1x256xf32>
      tpu.vector_store %arg7[%c0_21, %c128], %30 {strides = array<i32>} : memref<2x512xf32, #tpu.memory_space<vmem>>, vector<1x256xf32>,
      %c0_22 = arith.constant 0 : index
      %c0_23 = arith.constant 0 : index
      %32 = vector.load %arg6[%c0_22, %c0_23] : memref<8x256xf32, #tpu.memory_space<vmem>>, vector<8x256xf32>
      %cst_24 = arith.constant dense<0.000000e+00> : vector<256xf32>
      %33 = vector.multi_reduction <add>, %32, %cst_24 [0] : vector<8x256xf32> to vector<256xf32>
      %34 = vector.shape_cast %33 : vector<256xf32> to vector<1x256xf32>
      %cst_25 = arith.constant 2.500000e-01 : f32
      %35 = vector.broadcast %cst_25 : f32 to vector<1x256xf32>
      %36 = arith.mulf %34, %35 : vector<1x256xf32>
      %c1_26 = arith.constant 1 : index
      %c128_27 = arith.constant 128 : index
      %37 = vector.load %arg7[%c1_26, %c128_27] : memref<2x512xf32, #tpu.memory_space<vmem>>, vector<1x256xf32>
      tpu.vector_store %arg7[%c1_26, %c128_27], %36 {strides = array<i32>} : memref<2x512xf32, #tpu.memory_space<vmem>>, vector<1x256xf32>,
      %38 = tpu.iota {dimensions = array<i32: 1>} : vector<1x256xi32>
      %c0_i32_28 = arith.constant 0 : i32
      %39 = vector.broadcast %c0_i32_28 : i32 to vector<1x256xi32>
      %40 = arith.addi %38, %39 : vector<1x256xi32>
      %c16_i32 = arith.constant 16 : i32
      %c0_i32_29 = arith.constant 0 : i32
      %41 = arith.cmpi eq, %c16_i32, %c0_i32_29 : i32
      %c1_i32 = arith.constant 1 : i32
      %42 = arith.select %41, %c1_i32, %c16_i32 : i32
      %43 = vector.broadcast %42 : i32 to vector<1x256xi32>
      %44 = arith.remsi %40, %43 : vector<1x256xi32>
      %c0_i32_30 = arith.constant 0 : i32
      %45 = vector.broadcast %c0_i32_30 : i32 to vector<1x256xi32>
      %46 = arith.cmpi ne, %44, %45 : vector<1x256xi32>
      %c0_i32_31 = arith.constant 0 : i32
      %47 = vector.broadcast %c0_i32_31 : i32 to vector<1x256xi32>
      %48 = arith.cmpi slt, %44, %47 : vector<1x256xi32>
      %c0_i32_32 = arith.constant 0 : i32
      %49 = arith.cmpi slt, %42, %c0_i32_32 : i32
      %50 = vector.broadcast %49 : i1 to vector<1x256xi1>
      %51 = vector.broadcast %50 : vector<1x256xi1> to vector<1x256xi1>
      %52 = arith.xori %48, %51 : vector<1x256xi1>
      %53 = arith.andi %52, %46 : vector<1x256xi1>
      %54 = vector.broadcast %42 : i32 to vector<1x256xi32>
      %55 = arith.addi %44, %54 : vector<1x256xi32>
      %56 = arith.select %53, %55, %44 : vector<1x256xi1>, vector<1x256xi32>
      %cst_33 = arith.constant 0.000000e+00 : f32
      %57 = vector.broadcast %cst_33 : f32 to vector<1x256xf32>
      %c-3_i32 = arith.constant -3 : i32
      %58 = vector.broadcast %c-3_i32 : i32 to vector<1x256xi32>
      %59 = arith.addi %56, %58 : vector<1x256xi32>
      %c0_i32_34 = arith.constant 0 : i32
      %60 = vector.broadcast %c0_i32_34 : i32 to vector<1x256xi32>
      %61 = arith.cmpi sge, %59, %60 : vector<1x256xi32>
      %c-3_i32_35 = arith.constant -3 : i32
      %62 = vector.broadcast %c-3_i32_35 : i32 to vector<1x256xi32>
      %63 = arith.addi %56, %62 : vector<1x256xi32>
      %c16_i32_36 = arith.constant 16 : i32
      %64 = vector.broadcast %c16_i32_36 : i32 to vector<1x256xi32>
      %65 = arith.cmpi slt, %63, %64 : vector<1x256xi32>
      %66 = arith.andi %61, %65 : vector<1x256xi1>
      %67 = arith.extui %66 : vector<1x256xi1> to vector<1x256xi32>
      %68 = arith.sitofp %67 : vector<1x256xi32> to vector<1x256xf32>
      %c0_37 = arith.constant 0 : index
      %c77 = arith.constant 77 : index
      %69 = vector.load %arg7[%c0_37, %c77] : memref<2x512xf32, #tpu.memory_space<vmem>>, vector<1x256xf32>
      %c1_38 = arith.constant 1 : index
      %c77_39 = arith.constant 77 : index
      %70 = vector.load %arg7[%c1_38, %c77_39] : memref<2x512xf32, #tpu.memory_space<vmem>>, vector<1x256xf32>
      %c0_40 = arith.constant 0 : index
      %71 = memref.load %arg3[%c0_40] : memref<98xf32, #tpu.memory_space<smem>>
      %72 = vector.broadcast %71 : f32 to vector<1x256xf32>
      %73 = arith.mulf %72, %69 : vector<1x256xf32>
      %c49 = arith.constant 49 : index
      %74 = memref.load %arg3[%c49] : memref<98xf32, #tpu.memory_space<smem>>
      %75 = vector.broadcast %74 : f32 to vector<1x256xf32>
      %76 = arith.mulf %75, %70 : vector<1x256xf32>
      %77 = arith.addf %73, %76 : vector<1x256xf32>
      %78 = arith.mulf %77, %68 : vector<1x256xf32>
      %79 = arith.addf %57, %78 : vector<1x256xf32>
      %c0_41 = arith.constant 0 : index
      %c93 = arith.constant 93 : index
      %80 = vector.load %arg7[%c0_41, %c93] : memref<2x512xf32, #tpu.memory_space<vmem>>, vector<1x256xf32>
      %c1_42 = arith.constant 1 : index
      %c93_43 = arith.constant 93 : index
      %81 = vector.load %arg7[%c1_42, %c93_43] : memref<2x512xf32, #tpu.memory_space<vmem>>, vector<1x256xf32>
      %c7 = arith.constant 7 : index
      %82 = memref.load %arg3[%c7] : memref<98xf32, #tpu.memory_space<smem>>
      %83 = vector.broadcast %82 : f32 to vector<1x256xf32>
      %84 = arith.mulf %83, %80 : vector<1x256xf32>
      %c56 = arith.constant 56 : index
      %85 = memref.load %arg3[%c56] : memref<98xf32, #tpu.memory_space<smem>>
      %86 = vector.broadcast %85 : f32 to vector<1x256xf32>
      %87 = arith.mulf %86, %81 : vector<1x256xf32>
      %88 = arith.addf %84, %87 : vector<1x256xf32>
      %89 = arith.mulf %88, %68 : vector<1x256xf32>
      %90 = arith.addf %79, %89 : vector<1x256xf32>
      %c0_44 = arith.constant 0 : index
      %c109 = arith.constant 109 : index
      %91 = vector.load %arg7[%c0_44, %c109] : memref<2x512xf32, #tpu.memory_space<vmem>>, vector<1x256xf32>
      %c1_45 = arith.constant 1 : index
      %c109_46 = arith.constant 109 : index
      %92 = vector.load %arg7[%c1_45, %c109_46] : memref<2x512xf32, #tpu.memory_space<vmem>>, vector<1x256xf32>
      %c14 = arith.constant 14 : index
      %93 = memref.load %arg3[%c14] : memref<98xf32, #tpu.memory_space<smem>>
      %94 = vector.broadcast %93 : f32 to vector<1x256xf32>
      %95 = arith.mulf %94, %91 : vector<1x256xf32>
      %c63 = arith.constant 63 : index
      %96 = memref.load %arg3[%c63] : memref<98xf32, #tpu.memory_space<smem>>
      %97 = vector.broadcast %96 : f32 to vector<1x256xf32>
      %98 = arith.mulf %97, %92 : vector<1x256xf32>
      %99 = arith.addf %95, %98 : vector<1x256xf32>
      %100 = arith.mulf %99, %68 : vector<1x256xf32>
      %101 = arith.addf %90, %100 : vector<1x256xf32>
      %c0_47 = arith.constant 0 : index
      %c125 = arith.constant 125 : index
      %102 = vector.load %arg7[%c0_47, %c125] : memref<2x512xf32, #tpu.memory_space<vmem>>, vector<1x256xf32>
      %c1_48 = arith.constant 1 : index
      %c125_49 = arith.constant 125 : index
      %103 = vector.load %arg7[%c1_48, %c125_49] : memref<2x512xf32, #tpu.memory_space<vmem>>, vector<1x256xf32>
      %c21 = arith.constant 21 : index
      %104 = memref.load %arg3[%c21] : memref<98xf32, #tpu.memory_space<smem>>
      %105 = vector.broadcast %104 : f32 to vector<1x256xf32>
      %106 = arith.mulf %105, %102 : vector<1x256xf32>
      %c70 = arith.constant 70 : index
      %107 = memref.load %arg3[%c70] : memref<98xf32, #tpu.memory_space<smem>>
      %108 = vector.broadcast %107 : f32 to vector<1x256xf32>
      %109 = arith.mulf %108, %103 : vector<1x256xf32>
      %110 = arith.addf %106, %109 : vector<1x256xf32>
      %111 = arith.mulf %110, %68 : vector<1x256xf32>
      %112 = arith.addf %101, %111 : vector<1x256xf32>
      %c0_50 = arith.constant 0 : index
      %c141 = arith.constant 141 : index
      %113 = vector.load %arg7[%c0_50, %c141] : memref<2x512xf32, #tpu.memory_space<vmem>>, vector<1x256xf32>
      %c1_51 = arith.constant 1 : index
      %c141_52 = arith.constant 141 : index
      %114 = vector.load %arg7[%c1_51, %c141_52] : memref<2x512xf32, #tpu.memory_space<vmem>>, vector<1x256xf32>
      %c28 = arith.constant 28 : index
      %115 = memref.load %arg3[%c28] : memref<98xf32, #tpu.memory_space<smem>>
      %116 = vector.broadcast %115 : f32 to vector<1x256xf32>
      %117 = arith.mulf %116, %113 : vector<1x256xf32>
      %c77_53 = arith.constant 77 : index
      %118 = memref.load %arg3[%c77_53] : memref<98xf32, #tpu.memory_space<smem>>
      %119 = vector.broadcast %118 : f32 to vector<1x256xf32>
      %120 = arith.mulf %119, %114 : vector<1x256xf32>
      %121 = arith.addf %117, %120 : vector<1x256xf32>
      %122 = arith.mulf %121, %68 : vector<1x256xf32>
      %123 = arith.addf %112, %122 : vector<1x256xf32>
      %c0_54 = arith.constant 0 : index
      %c157 = arith.constant 157 : index
      %124 = vector.load %arg7[%c0_54, %c157] : memref<2x512xf32, #tpu.memory_space<vmem>>, vector<1x256xf32>
      %c1_55 = arith.constant 1 : index
      %c157_56 = arith.constant 157 : index
      %125 = vector.load %arg7[%c1_55, %c157_56] : memref<2x512xf32, #tpu.memory_space<vmem>>, vector<1x256xf32>
      %c35 = arith.constant 35 : index
      %126 = memref.load %arg3[%c35] : memref<98xf32, #tpu.memory_space<smem>>
      %127 = vector.broadcast %126 : f32 to vector<1x256xf32>
      %128 = arith.mulf %127, %124 : vector<1x256xf32>
      %c84 = arith.constant 84 : index
      %129 = memref.load %arg3[%c84] : memref<98xf32, #tpu.memory_space<smem>>
      %130 = vector.broadcast %129 : f32 to vector<1x256xf32>
      %131 = arith.mulf %130, %125 : vector<1x256xf32>
      %132 = arith.addf %128, %131 : vector<1x256xf32>
      %133 = arith.mulf %132, %68 : vector<1x256xf32>
      %134 = arith.addf %123, %133 : vector<1x256xf32>
      %c0_57 = arith.constant 0 : index
      %c173 = arith.constant 173 : index
      %135 = vector.load %arg7[%c0_57, %c173] : memref<2x512xf32, #tpu.memory_space<vmem>>, vector<1x256xf32>
      %c1_58 = arith.constant 1 : index
      %c173_59 = arith.constant 173 : index
      %136 = vector.load %arg7[%c1_58, %c173_59] : memref<2x512xf32, #tpu.memory_space<vmem>>, vector<1x256xf32>
      %c42 = arith.constant 42 : index
      %137 = memref.load %arg3[%c42] : memref<98xf32, #tpu.memory_space<smem>>
      %138 = vector.broadcast %137 : f32 to vector<1x256xf32>
      %139 = arith.mulf %138, %135 : vector<1x256xf32>
      %c91 = arith.constant 91 : index
      %140 = memref.load %arg3[%c91] : memref<98xf32, #tpu.memory_space<smem>>
      %141 = vector.broadcast %140 : f32 to vector<1x256xf32>
      %142 = arith.mulf %141, %136 : vector<1x256xf32>
      %143 = arith.addf %139, %142 : vector<1x256xf32>
      %144 = arith.mulf %143, %68 : vector<1x256xf32>
      %145 = arith.addf %134, %144 : vector<1x256xf32>
      %c-2_i32 = arith.constant -2 : i32
      %146 = vector.broadcast %c-2_i32 : i32 to vector<1x256xi32>
      %147 = arith.addi %56, %146 : vector<1x256xi32>
      %c0_i32_60 = arith.constant 0 : i32
      %148 = vector.broadcast %c0_i32_60 : i32 to vector<1x256xi32>
      %149 = arith.cmpi sge, %147, %148 : vector<1x256xi32>
      %c-2_i32_61 = arith.constant -2 : i32
      %150 = vector.broadcast %c-2_i32_61 : i32 to vector<1x256xi32>
      %151 = arith.addi %56, %150 : vector<1x256xi32>
      %c16_i32_62 = arith.constant 16 : i32
      %152 = vector.broadcast %c16_i32_62 : i32 to vector<1x256xi32>
      %153 = arith.cmpi slt, %151, %152 : vector<1x256xi32>
      %154 = arith.andi %149, %153 : vector<1x256xi1>
      %155 = arith.extui %154 : vector<1x256xi1> to vector<1x256xi32>
      %156 = arith.sitofp %155 : vector<1x256xi32> to vector<1x256xf32>
      %c0_63 = arith.constant 0 : index
      %c78 = arith.constant 78 : index
      %157 = vector.load %arg7[%c0_63, %c78] : memref<2x512xf32, #tpu.memory_space<vmem>>, vector<1x256xf32>
      %c1_64 = arith.constant 1 : index
      %c78_65 = arith.constant 78 : index
      %158 = vector.load %arg7[%c1_64, %c78_65] : memref<2x512xf32, #tpu.memory_space<vmem>>, vector<1x256xf32>
      %c1_66 = arith.constant 1 : index
      %159 = memref.load %arg3[%c1_66] : memref<98xf32, #tpu.memory_space<smem>>
      %160 = vector.broadcast %159 : f32 to vector<1x256xf32>
      %161 = arith.mulf %160, %157 : vector<1x256xf32>
      %c50 = arith.constant 50 : index
      %162 = memref.load %arg3[%c50] : memref<98xf32, #tpu.memory_space<smem>>
      %163 = vector.broadcast %162 : f32 to vector<1x256xf32>
      %164 = arith.mulf %163, %158 : vector<1x256xf32>
      %165 = arith.addf %161, %164 : vector<1x256xf32>
      %166 = arith.mulf %165, %156 : vector<1x256xf32>
      %167 = arith.addf %145, %166 : vector<1x256xf32>
      %c0_67 = arith.constant 0 : index
      %c94 = arith.constant 94 : index
      %168 = vector.load %arg7[%c0_67, %c94] : memref<2x512xf32, #tpu.memory_space<vmem>>, vector<1x256xf32>
      %c1_68 = arith.constant 1 : index
      %c94_69 = arith.constant 94 : index
      %169 = vector.load %arg7[%c1_68, %c94_69] : memref<2x512xf32, #tpu.memory_space<vmem>>, vector<1x256xf32>
      %c8 = arith.constant 8 : index
      %170 = memref.load %arg3[%c8] : memref<98xf32, #tpu.memory_space<smem>>
      %171 = vector.broadcast %170 : f32 to vector<1x256xf32>
      %172 = arith.mulf %171, %168 : vector<1x256xf32>
      %c57 = arith.constant 57 : index
      %173 = memref.load %arg3[%c57] : memref<98xf32, #tpu.memory_space<smem>>
      %174 = vector.broadcast %173 : f32 to vector<1x256xf32>
      %175 = arith.mulf %174, %169 : vector<1x256xf32>
      %176 = arith.addf %172, %175 : vector<1x256xf32>
      %177 = arith.mulf %176, %156 : vector<1x256xf32>
      %178 = arith.addf %167, %177 : vector<1x256xf32>
      %c0_70 = arith.constant 0 : index
      %c110 = arith.constant 110 : index
      %179 = vector.load %arg7[%c0_70, %c110] : memref<2x512xf32, #tpu.memory_space<vmem>>, vector<1x256xf32>
      %c1_71 = arith.constant 1 : index
      %c110_72 = arith.constant 110 : index
      %180 = vector.load %arg7[%c1_71, %c110_72] : memref<2x512xf32, #tpu.memory_space<vmem>>, vector<1x256xf32>
      %c15 = arith.constant 15 : index
      %181 = memref.load %arg3[%c15] : memref<98xf32, #tpu.memory_space<smem>>
      %182 = vector.broadcast %181 : f32 to vector<1x256xf32>
      %183 = arith.mulf %182, %179 : vector<1x256xf32>
      %c64 = arith.constant 64 : index
      %184 = memref.load %arg3[%c64] : memref<98xf32, #tpu.memory_space<smem>>
      %185 = vector.broadcast %184 : f32 to vector<1x256xf32>
      %186 = arith.mulf %185, %180 : vector<1x256xf32>
      %187 = arith.addf %183, %186 : vector<1x256xf32>
      %188 = arith.mulf %187, %156 : vector<1x256xf32>
      %189 = arith.addf %178, %188 : vector<1x256xf32>
      %c0_73 = arith.constant 0 : index
      %c126 = arith.constant 126 : index
      %190 = vector.load %arg7[%c0_73, %c126] : memref<2x512xf32, #tpu.memory_space<vmem>>, vector<1x256xf32>
      %c1_74 = arith.constant 1 : index
      %c126_75 = arith.constant 126 : index
      %191 = vector.load %arg7[%c1_74, %c126_75] : memref<2x512xf32, #tpu.memory_space<vmem>>, vector<1x256xf32>
      %c22 = arith.constant 22 : index
      %192 = memref.load %arg3[%c22] : memref<98xf32, #tpu.memory_space<smem>>
      %193 = vector.broadcast %192 : f32 to vector<1x256xf32>
      %194 = arith.mulf %193, %190 : vector<1x256xf32>
      %c71 = arith.constant 71 : index
      %195 = memref.load %arg3[%c71] : memref<98xf32, #tpu.memory_space<smem>>
      %196 = vector.broadcast %195 : f32 to vector<1x256xf32>
      %197 = arith.mulf %196, %191 : vector<1x256xf32>
      %198 = arith.addf %194, %197 : vector<1x256xf32>
      %199 = arith.mulf %198, %156 : vector<1x256xf32>
      %200 = arith.addf %189, %199 : vector<1x256xf32>
      %c0_76 = arith.constant 0 : index
      %c142 = arith.constant 142 : index
      %201 = vector.load %arg7[%c0_76, %c142] : memref<2x512xf32, #tpu.memory_space<vmem>>, vector<1x256xf32>
      %c1_77 = arith.constant 1 : index
      %c142_78 = arith.constant 142 : index
      %202 = vector.load %arg7[%c1_77, %c142_78] : memref<2x512xf32, #tpu.memory_space<vmem>>, vector<1x256xf32>
      %c29 = arith.constant 29 : index
      %203 = memref.load %arg3[%c29] : memref<98xf32, #tpu.memory_space<smem>>
      %204 = vector.broadcast %203 : f32 to vector<1x256xf32>
      %205 = arith.mulf %204, %201 : vector<1x256xf32>
      %c78_79 = arith.constant 78 : index
      %206 = memref.load %arg3[%c78_79] : memref<98xf32, #tpu.memory_space<smem>>
      %207 = vector.broadcast %206 : f32 to vector<1x256xf32>
      %208 = arith.mulf %207, %202 : vector<1x256xf32>
      %209 = arith.addf %205, %208 : vector<1x256xf32>
      %210 = arith.mulf %209, %156 : vector<1x256xf32>
      %211 = arith.addf %200, %210 : vector<1x256xf32>
      %c0_80 = arith.constant 0 : index
      %c158 = arith.constant 158 : index
      %212 = vector.load %arg7[%c0_80, %c158] : memref<2x512xf32, #tpu.memory_space<vmem>>, vector<1x256xf32>
      %c1_81 = arith.constant 1 : index
      %c158_82 = arith.constant 158 : index
      %213 = vector.load %arg7[%c1_81, %c158_82] : memref<2x512xf32, #tpu.memory_space<vmem>>, vector<1x256xf32>
      %c36 = arith.constant 36 : index
      %214 = memref.load %arg3[%c36] : memref<98xf32, #tpu.memory_space<smem>>
      %215 = vector.broadcast %214 : f32 to vector<1x256xf32>
      %216 = arith.mulf %215, %212 : vector<1x256xf32>
      %c85 = arith.constant 85 : index
      %217 = memref.load %arg3[%c85] : memref<98xf32, #tpu.memory_space<smem>>
      %218 = vector.broadcast %217 : f32 to vector<1x256xf32>
      %219 = arith.mulf %218, %213 : vector<1x256xf32>
      %220 = arith.addf %216, %219 : vector<1x256xf32>
      %221 = arith.mulf %220, %156 : vector<1x256xf32>
      %222 = arith.addf %211, %221 : vector<1x256xf32>
      %c0_83 = arith.constant 0 : index
      %c174 = arith.constant 174 : index
      %223 = vector.load %arg7[%c0_83, %c174] : memref<2x512xf32, #tpu.memory_space<vmem>>, vector<1x256xf32>
      %c1_84 = arith.constant 1 : index
      %c174_85 = arith.constant 174 : index
      %224 = vector.load %arg7[%c1_84, %c174_85] : memref<2x512xf32, #tpu.memory_space<vmem>>, vector<1x256xf32>
      %c43 = arith.constant 43 : index
      %225 = memref.load %arg3[%c43] : memref<98xf32, #tpu.memory_space<smem>>
      %226 = vector.broadcast %225 : f32 to vector<1x256xf32>
      %227 = arith.mulf %226, %223 : vector<1x256xf32>
      %c92 = arith.constant 92 : index
      %228 = memref.load %arg3[%c92] : memref<98xf32, #tpu.memory_space<smem>>
      %229 = vector.broadcast %228 : f32 to vector<1x256xf32>
      %230 = arith.mulf %229, %224 : vector<1x256xf32>
      %231 = arith.addf %227, %230 : vector<1x256xf32>
      %232 = arith.mulf %231, %156 : vector<1x256xf32>
      %233 = arith.addf %222, %232 : vector<1x256xf32>
      %c-1_i32 = arith.constant -1 : i32
      %234 = vector.broadcast %c-1_i32 : i32 to vector<1x256xi32>
      %235 = arith.addi %56, %234 : vector<1x256xi32>
      %c0_i32_86 = arith.constant 0 : i32
      %236 = vector.broadcast %c0_i32_86 : i32 to vector<1x256xi32>
      %237 = arith.cmpi sge, %235, %236 : vector<1x256xi32>
      %c-1_i32_87 = arith.constant -1 : i32
      %238 = vector.broadcast %c-1_i32_87 : i32 to vector<1x256xi32>
      %239 = arith.addi %56, %238 : vector<1x256xi32>
      %c16_i32_88 = arith.constant 16 : i32
      %240 = vector.broadcast %c16_i32_88 : i32 to vector<1x256xi32>
      %241 = arith.cmpi slt, %239, %240 : vector<1x256xi32>
      %242 = arith.andi %237, %241 : vector<1x256xi1>
      %243 = arith.extui %242 : vector<1x256xi1> to vector<1x256xi32>
      %244 = arith.sitofp %243 : vector<1x256xi32> to vector<1x256xf32>
      %c0_89 = arith.constant 0 : index
      %c79 = arith.constant 79 : index
      %245 = vector.load %arg7[%c0_89, %c79] : memref<2x512xf32, #tpu.memory_space<vmem>>, vector<1x256xf32>
      %c1_90 = arith.constant 1 : index
      %c79_91 = arith.constant 79 : index
      %246 = vector.load %arg7[%c1_90, %c79_91] : memref<2x512xf32, #tpu.memory_space<vmem>>, vector<1x256xf32>
      %c2_92 = arith.constant 2 : index
      %247 = memref.load %arg3[%c2_92] : memref<98xf32, #tpu.memory_space<smem>>
      %248 = vector.broadcast %247 : f32 to vector<1x256xf32>
      %249 = arith.mulf %248, %245 : vector<1x256xf32>
      %c51 = arith.constant 51 : index
      %250 = memref.load %arg3[%c51] : memref<98xf32, #tpu.memory_space<smem>>
      %251 = vector.broadcast %250 : f32 to vector<1x256xf32>
      %252 = arith.mulf %251, %246 : vector<1x256xf32>
      %253 = arith.addf %249, %252 : vector<1x256xf32>
      %254 = arith.mulf %253, %244 : vector<1x256xf32>
      %255 = arith.addf %233, %254 : vector<1x256xf32>
      %c0_93 = arith.constant 0 : index
      %c95 = arith.constant 95 : index
      %256 = vector.load %arg7[%c0_93, %c95] : memref<2x512xf32, #tpu.memory_space<vmem>>, vector<1x256xf32>
      %c1_94 = arith.constant 1 : index
      %c95_95 = arith.constant 95 : index
      %257 = vector.load %arg7[%c1_94, %c95_95] : memref<2x512xf32, #tpu.memory_space<vmem>>, vector<1x256xf32>
      %c9 = arith.constant 9 : index
      %258 = memref.load %arg3[%c9] : memref<98xf32, #tpu.memory_space<smem>>
      %259 = vector.broadcast %258 : f32 to vector<1x256xf32>
      %260 = arith.mulf %259, %256 : vector<1x256xf32>
      %c58 = arith.constant 58 : index
      %261 = memref.load %arg3[%c58] : memref<98xf32, #tpu.memory_space<smem>>
      %262 = vector.broadcast %261 : f32 to vector<1x256xf32>
      %263 = arith.mulf %262, %257 : vector<1x256xf32>
      %264 = arith.addf %260, %263 : vector<1x256xf32>
      %265 = arith.mulf %264, %244 : vector<1x256xf32>
      %266 = arith.addf %255, %265 : vector<1x256xf32>
      %c0_96 = arith.constant 0 : index
      %c111 = arith.constant 111 : index
      %267 = vector.load %arg7[%c0_96, %c111] : memref<2x512xf32, #tpu.memory_space<vmem>>, vector<1x256xf32>
      %c1_97 = arith.constant 1 : index
      %c111_98 = arith.constant 111 : index
      %268 = vector.load %arg7[%c1_97, %c111_98] : memref<2x512xf32, #tpu.memory_space<vmem>>, vector<1x256xf32>
      %c16 = arith.constant 16 : index
      %269 = memref.load %arg3[%c16] : memref<98xf32, #tpu.memory_space<smem>>
      %270 = vector.broadcast %269 : f32 to vector<1x256xf32>
      %271 = arith.mulf %270, %267 : vector<1x256xf32>
      %c65 = arith.constant 65 : index
      %272 = memref.load %arg3[%c65] : memref<98xf32, #tpu.memory_space<smem>>
      %273 = vector.broadcast %272 : f32 to vector<1x256xf32>
      %274 = arith.mulf %273, %268 : vector<1x256xf32>
      %275 = arith.addf %271, %274 : vector<1x256xf32>
      %276 = arith.mulf %275, %244 : vector<1x256xf32>
      %277 = arith.addf %266, %276 : vector<1x256xf32>
      %c0_99 = arith.constant 0 : index
      %c127 = arith.constant 127 : index
      %278 = vector.load %arg7[%c0_99, %c127] : memref<2x512xf32, #tpu.memory_space<vmem>>, vector<1x256xf32>
      %c1_100 = arith.constant 1 : index
      %c127_101 = arith.constant 127 : index
      %279 = vector.load %arg7[%c1_100, %c127_101] : memref<2x512xf32, #tpu.memory_space<vmem>>, vector<1x256xf32>
      %c23 = arith.constant 23 : index
      %280 = memref.load %arg3[%c23] : memref<98xf32, #tpu.memory_space<smem>>
      %281 = vector.broadcast %280 : f32 to vector<1x256xf32>
      %282 = arith.mulf %281, %278 : vector<1x256xf32>
      %c72 = arith.constant 72 : index
      %283 = memref.load %arg3[%c72] : memref<98xf32, #tpu.memory_space<smem>>
      %284 = vector.broadcast %283 : f32 to vector<1x256xf32>
      %285 = arith.mulf %284, %279 : vector<1x256xf32>
      %286 = arith.addf %282, %285 : vector<1x256xf32>
      %287 = arith.mulf %286, %244 : vector<1x256xf32>
      %288 = arith.addf %277, %287 : vector<1x256xf32>
      %c0_102 = arith.constant 0 : index
      %c143 = arith.constant 143 : index
      %289 = vector.load %arg7[%c0_102, %c143] : memref<2x512xf32, #tpu.memory_space<vmem>>, vector<1x256xf32>
      %c1_103 = arith.constant 1 : index
      %c143_104 = arith.constant 143 : index
      %290 = vector.load %arg7[%c1_103, %c143_104] : memref<2x512xf32, #tpu.memory_space<vmem>>, vector<1x256xf32>
      %c30 = arith.constant 30 : index
      %291 = memref.load %arg3[%c30] : memref<98xf32, #tpu.memory_space<smem>>
      %292 = vector.broadcast %291 : f32 to vector<1x256xf32>
      %293 = arith.mulf %292, %289 : vector<1x256xf32>
      %c79_105 = arith.constant 79 : index
      %294 = memref.load %arg3[%c79_105] : memref<98xf32, #tpu.memory_space<smem>>
      %295 = vector.broadcast %294 : f32 to vector<1x256xf32>
      %296 = arith.mulf %295, %290 : vector<1x256xf32>
      %297 = arith.addf %293, %296 : vector<1x256xf32>
      %298 = arith.mulf %297, %244 : vector<1x256xf32>
      %299 = arith.addf %288, %298 : vector<1x256xf32>
      %c0_106 = arith.constant 0 : index
      %c159 = arith.constant 159 : index
      %300 = vector.load %arg7[%c0_106, %c159] : memref<2x512xf32, #tpu.memory_space<vmem>>, vector<1x256xf32>
      %c1_107 = arith.constant 1 : index
      %c159_108 = arith.constant 159 : index
      %301 = vector.load %arg7[%c1_107, %c159_108] : memref<2x512xf32, #tpu.memory_space<vmem>>, vector<1x256xf32>
      %c37 = arith.constant 37 : index
      %302 = memref.load %arg3[%c37] : memref<98xf32, #tpu.memory_space<smem>>
      %303 = vector.broadcast %302 : f32 to vector<1x256xf32>
      %304 = arith.mulf %303, %300 : vector<1x256xf32>
      %c86 = arith.constant 86 : index
      %305 = memref.load %arg3[%c86] : memref<98xf32, #tpu.memory_space<smem>>
      %306 = vector.broadcast %305 : f32 to vector<1x256xf32>
      %307 = arith.mulf %306, %301 : vector<1x256xf32>
      %308 = arith.addf %304, %307 : vector<1x256xf32>
      %309 = arith.mulf %308, %244 : vector<1x256xf32>
      %310 = arith.addf %299, %309 : vector<1x256xf32>
      %c0_109 = arith.constant 0 : index
      %c175 = arith.constant 175 : index
      %311 = vector.load %arg7[%c0_109, %c175] : memref<2x512xf32, #tpu.memory_space<vmem>>, vector<1x256xf32>
      %c1_110 = arith.constant 1 : index
      %c175_111 = arith.constant 175 : index
      %312 = vector.load %arg7[%c1_110, %c175_111] : memref<2x512xf32, #tpu.memory_space<vmem>>, vector<1x256xf32>
      %c44 = arith.constant 44 : index
      %313 = memref.load %arg3[%c44] : memref<98xf32, #tpu.memory_space<smem>>
      %314 = vector.broadcast %313 : f32 to vector<1x256xf32>
      %315 = arith.mulf %314, %311 : vector<1x256xf32>
      %c93_112 = arith.constant 93 : index
      %316 = memref.load %arg3[%c93_112] : memref<98xf32, #tpu.memory_space<smem>>
      %317 = vector.broadcast %316 : f32 to vector<1x256xf32>
      %318 = arith.mulf %317, %312 : vector<1x256xf32>
      %319 = arith.addf %315, %318 : vector<1x256xf32>
      %320 = arith.mulf %319, %244 : vector<1x256xf32>
      %321 = arith.addf %310, %320 : vector<1x256xf32>
      %c0_113 = arith.constant 0 : index
      %c80 = arith.constant 80 : index
      %322 = vector.load %arg7[%c0_113, %c80] : memref<2x512xf32, #tpu.memory_space<vmem>>, vector<1x256xf32>
      %c1_114 = arith.constant 1 : index
      %c80_115 = arith.constant 80 : index
      %323 = vector.load %arg7[%c1_114, %c80_115] : memref<2x512xf32, #tpu.memory_space<vmem>>, vector<1x256xf32>
      %c3_116 = arith.constant 3 : index
      %324 = memref.load %arg3[%c3_116] : memref<98xf32, #tpu.memory_space<smem>>
      %325 = vector.broadcast %324 : f32 to vector<1x256xf32>
      %326 = arith.mulf %325, %322 : vector<1x256xf32>
      %c52 = arith.constant 52 : index
      %327 = memref.load %arg3[%c52] : memref<98xf32, #tpu.memory_space<smem>>
      %328 = vector.broadcast %327 : f32 to vector<1x256xf32>
      %329 = arith.mulf %328, %323 : vector<1x256xf32>
      %330 = arith.addf %326, %329 : vector<1x256xf32>
      %331 = arith.addf %321, %330 : vector<1x256xf32>
      %c0_117 = arith.constant 0 : index
      %c96 = arith.constant 96 : index
      %332 = vector.load %arg7[%c0_117, %c96] : memref<2x512xf32, #tpu.memory_space<vmem>>, vector<1x256xf32>
      %c1_118 = arith.constant 1 : index
      %c96_119 = arith.constant 96 : index
      %333 = vector.load %arg7[%c1_118, %c96_119] : memref<2x512xf32, #tpu.memory_space<vmem>>, vector<1x256xf32>
      %c10 = arith.constant 10 : index
      %334 = memref.load %arg3[%c10] : memref<98xf32, #tpu.memory_space<smem>>
      %335 = vector.broadcast %334 : f32 to vector<1x256xf32>
      %336 = arith.mulf %335, %332 : vector<1x256xf32>
      %c59 = arith.constant 59 : index
      %337 = memref.load %arg3[%c59] : memref<98xf32, #tpu.memory_space<smem>>
      %338 = vector.broadcast %337 : f32 to vector<1x256xf32>
      %339 = arith.mulf %338, %333 : vector<1x256xf32>
      %340 = arith.addf %336, %339 : vector<1x256xf32>
      %341 = arith.addf %331, %340 : vector<1x256xf32>
      %c0_120 = arith.constant 0 : index
      %c112 = arith.constant 112 : index
      %342 = vector.load %arg7[%c0_120, %c112] : memref<2x512xf32, #tpu.memory_space<vmem>>, vector<1x256xf32>
      %c1_121 = arith.constant 1 : index
      %c112_122 = arith.constant 112 : index
      %343 = vector.load %arg7[%c1_121, %c112_122] : memref<2x512xf32, #tpu.memory_space<vmem>>, vector<1x256xf32>
      %c17 = arith.constant 17 : index
      %344 = memref.load %arg3[%c17] : memref<98xf32, #tpu.memory_space<smem>>
      %345 = vector.broadcast %344 : f32 to vector<1x256xf32>
      %346 = arith.mulf %345, %342 : vector<1x256xf32>
      %c66 = arith.constant 66 : index
      %347 = memref.load %arg3[%c66] : memref<98xf32, #tpu.memory_space<smem>>
      %348 = vector.broadcast %347 : f32 to vector<1x256xf32>
      %349 = arith.mulf %348, %343 : vector<1x256xf32>
      %350 = arith.addf %346, %349 : vector<1x256xf32>
      %351 = arith.addf %341, %350 : vector<1x256xf32>
      %c0_123 = arith.constant 0 : index
      %c128_124 = arith.constant 128 : index
      %352 = vector.load %arg7[%c0_123, %c128_124] : memref<2x512xf32, #tpu.memory_space<vmem>>, vector<1x256xf32>
      %c1_125 = arith.constant 1 : index
      %c128_126 = arith.constant 128 : index
      %353 = vector.load %arg7[%c1_125, %c128_126] : memref<2x512xf32, #tpu.memory_space<vmem>>, vector<1x256xf32>
      %c24 = arith.constant 24 : index
      %354 = memref.load %arg3[%c24] : memref<98xf32, #tpu.memory_space<smem>>
      %355 = vector.broadcast %354 : f32 to vector<1x256xf32>
      %356 = arith.mulf %355, %352 : vector<1x256xf32>
      %c73 = arith.constant 73 : index
      %357 = memref.load %arg3[%c73] : memref<98xf32, #tpu.memory_space<smem>>
      %358 = vector.broadcast %357 : f32 to vector<1x256xf32>
      %359 = arith.mulf %358, %353 : vector<1x256xf32>
      %360 = arith.addf %356, %359 : vector<1x256xf32>
      %361 = arith.addf %351, %360 : vector<1x256xf32>
      %c0_127 = arith.constant 0 : index
      %c144 = arith.constant 144 : index
      %362 = vector.load %arg7[%c0_127, %c144] : memref<2x512xf32, #tpu.memory_space<vmem>>, vector<1x256xf32>
      %c1_128 = arith.constant 1 : index
      %c144_129 = arith.constant 144 : index
      %363 = vector.load %arg7[%c1_128, %c144_129] : memref<2x512xf32, #tpu.memory_space<vmem>>, vector<1x256xf32>
      %c31 = arith.constant 31 : index
      %364 = memref.load %arg3[%c31] : memref<98xf32, #tpu.memory_space<smem>>
      %365 = vector.broadcast %364 : f32 to vector<1x256xf32>
      %366 = arith.mulf %365, %362 : vector<1x256xf32>
      %c80_130 = arith.constant 80 : index
      %367 = memref.load %arg3[%c80_130] : memref<98xf32, #tpu.memory_space<smem>>
      %368 = vector.broadcast %367 : f32 to vector<1x256xf32>
      %369 = arith.mulf %368, %363 : vector<1x256xf32>
      %370 = arith.addf %366, %369 : vector<1x256xf32>
      %371 = arith.addf %361, %370 : vector<1x256xf32>
      %c0_131 = arith.constant 0 : index
      %c160 = arith.constant 160 : index
      %372 = vector.load %arg7[%c0_131, %c160] : memref<2x512xf32, #tpu.memory_space<vmem>>, vector<1x256xf32>
      %c1_132 = arith.constant 1 : index
      %c160_133 = arith.constant 160 : index
      %373 = vector.load %arg7[%c1_132, %c160_133] : memref<2x512xf32, #tpu.memory_space<vmem>>, vector<1x256xf32>
      %c38 = arith.constant 38 : index
      %374 = memref.load %arg3[%c38] : memref<98xf32, #tpu.memory_space<smem>>
      %375 = vector.broadcast %374 : f32 to vector<1x256xf32>
      %376 = arith.mulf %375, %372 : vector<1x256xf32>
      %c87 = arith.constant 87 : index
      %377 = memref.load %arg3[%c87] : memref<98xf32, #tpu.memory_space<smem>>
      %378 = vector.broadcast %377 : f32 to vector<1x256xf32>
      %379 = arith.mulf %378, %373 : vector<1x256xf32>
      %380 = arith.addf %376, %379 : vector<1x256xf32>
      %381 = arith.addf %371, %380 : vector<1x256xf32>
      %c0_134 = arith.constant 0 : index
      %c176 = arith.constant 176 : index
      %382 = vector.load %arg7[%c0_134, %c176] : memref<2x512xf32, #tpu.memory_space<vmem>>, vector<1x256xf32>
      %c1_135 = arith.constant 1 : index
      %c176_136 = arith.constant 176 : index
      %383 = vector.load %arg7[%c1_135, %c176_136] : memref<2x512xf32, #tpu.memory_space<vmem>>, vector<1x256xf32>
      %c45 = arith.constant 45 : index
      %384 = memref.load %arg3[%c45] : memref<98xf32, #tpu.memory_space<smem>>
      %385 = vector.broadcast %384 : f32 to vector<1x256xf32>
      %386 = arith.mulf %385, %382 : vector<1x256xf32>
      %c94_137 = arith.constant 94 : index
      %387 = memref.load %arg3[%c94_137] : memref<98xf32, #tpu.memory_space<smem>>
      %388 = vector.broadcast %387 : f32 to vector<1x256xf32>
      %389 = arith.mulf %388, %383 : vector<1x256xf32>
      %390 = arith.addf %386, %389 : vector<1x256xf32>
      %391 = arith.addf %381, %390 : vector<1x256xf32>
      %c1_i32_138 = arith.constant 1 : i32
      %392 = vector.broadcast %c1_i32_138 : i32 to vector<1x256xi32>
      %393 = arith.addi %56, %392 : vector<1x256xi32>
      %c0_i32_139 = arith.constant 0 : i32
      %394 = vector.broadcast %c0_i32_139 : i32 to vector<1x256xi32>
      %395 = arith.cmpi sge, %393, %394 : vector<1x256xi32>
      %c1_i32_140 = arith.constant 1 : i32
      %396 = vector.broadcast %c1_i32_140 : i32 to vector<1x256xi32>
      %397 = arith.addi %56, %396 : vector<1x256xi32>
      %c16_i32_141 = arith.constant 16 : i32
      %398 = vector.broadcast %c16_i32_141 : i32 to vector<1x256xi32>
      %399 = arith.cmpi slt, %397, %398 : vector<1x256xi32>
      %400 = arith.andi %395, %399 : vector<1x256xi1>
      %401 = arith.extui %400 : vector<1x256xi1> to vector<1x256xi32>
      %402 = arith.sitofp %401 : vector<1x256xi32> to vector<1x256xf32>
      %c0_142 = arith.constant 0 : index
      %c81 = arith.constant 81 : index
      %403 = vector.load %arg7[%c0_142, %c81] : memref<2x512xf32, #tpu.memory_space<vmem>>, vector<1x256xf32>
      %c1_143 = arith.constant 1 : index
      %c81_144 = arith.constant 81 : index
      %404 = vector.load %arg7[%c1_143, %c81_144] : memref<2x512xf32, #tpu.memory_space<vmem>>, vector<1x256xf32>
      %c4 = arith.constant 4 : index
      %405 = memref.load %arg3[%c4] : memref<98xf32, #tpu.memory_space<smem>>
      %406 = vector.broadcast %405 : f32 to vector<1x256xf32>
      %407 = arith.mulf %406, %403 : vector<1x256xf32>
      %c53 = arith.constant 53 : index
      %408 = memref.load %arg3[%c53] : memref<98xf32, #tpu.memory_space<smem>>
      %409 = vector.broadcast %408 : f32 to vector<1x256xf32>
      %410 = arith.mulf %409, %404 : vector<1x256xf32>
      %411 = arith.addf %407, %410 : vector<1x256xf32>
      %412 = arith.mulf %411, %402 : vector<1x256xf32>
      %413 = arith.addf %391, %412 : vector<1x256xf32>
      %c0_145 = arith.constant 0 : index
      %c97 = arith.constant 97 : index
      %414 = vector.load %arg7[%c0_145, %c97] : memref<2x512xf32, #tpu.memory_space<vmem>>, vector<1x256xf32>
      %c1_146 = arith.constant 1 : index
      %c97_147 = arith.constant 97 : index
      %415 = vector.load %arg7[%c1_146, %c97_147] : memref<2x512xf32, #tpu.memory_space<vmem>>, vector<1x256xf32>
      %c11 = arith.constant 11 : index
      %416 = memref.load %arg3[%c11] : memref<98xf32, #tpu.memory_space<smem>>
      %417 = vector.broadcast %416 : f32 to vector<1x256xf32>
      %418 = arith.mulf %417, %414 : vector<1x256xf32>
      %c60 = arith.constant 60 : index
      %419 = memref.load %arg3[%c60] : memref<98xf32, #tpu.memory_space<smem>>
      %420 = vector.broadcast %419 : f32 to vector<1x256xf32>
      %421 = arith.mulf %420, %415 : vector<1x256xf32>
      %422 = arith.addf %418, %421 : vector<1x256xf32>
      %423 = arith.mulf %422, %402 : vector<1x256xf32>
      %424 = arith.addf %413, %423 : vector<1x256xf32>
      %c0_148 = arith.constant 0 : index
      %c113 = arith.constant 113 : index
      %425 = vector.load %arg7[%c0_148, %c113] : memref<2x512xf32, #tpu.memory_space<vmem>>, vector<1x256xf32>
      %c1_149 = arith.constant 1 : index
      %c113_150 = arith.constant 113 : index
      %426 = vector.load %arg7[%c1_149, %c113_150] : memref<2x512xf32, #tpu.memory_space<vmem>>, vector<1x256xf32>
      %c18 = arith.constant 18 : index
      %427 = memref.load %arg3[%c18] : memref<98xf32, #tpu.memory_space<smem>>
      %428 = vector.broadcast %427 : f32 to vector<1x256xf32>
      %429 = arith.mulf %428, %425 : vector<1x256xf32>
      %c67 = arith.constant 67 : index
      %430 = memref.load %arg3[%c67] : memref<98xf32, #tpu.memory_space<smem>>
      %431 = vector.broadcast %430 : f32 to vector<1x256xf32>
      %432 = arith.mulf %431, %426 : vector<1x256xf32>
      %433 = arith.addf %429, %432 : vector<1x256xf32>
      %434 = arith.mulf %433, %402 : vector<1x256xf32>
      %435 = arith.addf %424, %434 : vector<1x256xf32>
      %c0_151 = arith.constant 0 : index
      %c129 = arith.constant 129 : index
      %436 = vector.load %arg7[%c0_151, %c129] : memref<2x512xf32, #tpu.memory_space<vmem>>, vector<1x256xf32>
      %c1_152 = arith.constant 1 : index
      %c129_153 = arith.constant 129 : index
      %437 = vector.load %arg7[%c1_152, %c129_153] : memref<2x512xf32, #tpu.memory_space<vmem>>, vector<1x256xf32>
      %c25 = arith.constant 25 : index
      %438 = memref.load %arg3[%c25] : memref<98xf32, #tpu.memory_space<smem>>
      %439 = vector.broadcast %438 : f32 to vector<1x256xf32>
      %440 = arith.mulf %439, %436 : vector<1x256xf32>
      %c74 = arith.constant 74 : index
      %441 = memref.load %arg3[%c74] : memref<98xf32, #tpu.memory_space<smem>>
      %442 = vector.broadcast %441 : f32 to vector<1x256xf32>
      %443 = arith.mulf %442, %437 : vector<1x256xf32>
      %444 = arith.addf %440, %443 : vector<1x256xf32>
      %445 = arith.mulf %444, %402 : vector<1x256xf32>
      %446 = arith.addf %435, %445 : vector<1x256xf32>
      %c0_154 = arith.constant 0 : index
      %c145 = arith.constant 145 : index
      %447 = vector.load %arg7[%c0_154, %c145] : memref<2x512xf32, #tpu.memory_space<vmem>>, vector<1x256xf32>
      %c1_155 = arith.constant 1 : index
      %c145_156 = arith.constant 145 : index
      %448 = vector.load %arg7[%c1_155, %c145_156] : memref<2x512xf32, #tpu.memory_space<vmem>>, vector<1x256xf32>
      %c32 = arith.constant 32 : index
      %449 = memref.load %arg3[%c32] : memref<98xf32, #tpu.memory_space<smem>>
      %450 = vector.broadcast %449 : f32 to vector<1x256xf32>
      %451 = arith.mulf %450, %447 : vector<1x256xf32>
      %c81_157 = arith.constant 81 : index
      %452 = memref.load %arg3[%c81_157] : memref<98xf32, #tpu.memory_space<smem>>
      %453 = vector.broadcast %452 : f32 to vector<1x256xf32>
      %454 = arith.mulf %453, %448 : vector<1x256xf32>
      %455 = arith.addf %451, %454 : vector<1x256xf32>
      %456 = arith.mulf %455, %402 : vector<1x256xf32>
      %457 = arith.addf %446, %456 : vector<1x256xf32>
      %c0_158 = arith.constant 0 : index
      %c161 = arith.constant 161 : index
      %458 = vector.load %arg7[%c0_158, %c161] : memref<2x512xf32, #tpu.memory_space<vmem>>, vector<1x256xf32>
      %c1_159 = arith.constant 1 : index
      %c161_160 = arith.constant 161 : index
      %459 = vector.load %arg7[%c1_159, %c161_160] : memref<2x512xf32, #tpu.memory_space<vmem>>, vector<1x256xf32>
      %c39 = arith.constant 39 : index
      %460 = memref.load %arg3[%c39] : memref<98xf32, #tpu.memory_space<smem>>
      %461 = vector.broadcast %460 : f32 to vector<1x256xf32>
      %462 = arith.mulf %461, %458 : vector<1x256xf32>
      %c88 = arith.constant 88 : index
      %463 = memref.load %arg3[%c88] : memref<98xf32, #tpu.memory_space<smem>>
      %464 = vector.broadcast %463 : f32 to vector<1x256xf32>
      %465 = arith.mulf %464, %459 : vector<1x256xf32>
      %466 = arith.addf %462, %465 : vector<1x256xf32>
      %467 = arith.mulf %466, %402 : vector<1x256xf32>
      %468 = arith.addf %457, %467 : vector<1x256xf32>
      %c0_161 = arith.constant 0 : index
      %c177 = arith.constant 177 : index
      %469 = vector.load %arg7[%c0_161, %c177] : memref<2x512xf32, #tpu.memory_space<vmem>>, vector<1x256xf32>
      %c1_162 = arith.constant 1 : index
      %c177_163 = arith.constant 177 : index
      %470 = vector.load %arg7[%c1_162, %c177_163] : memref<2x512xf32, #tpu.memory_space<vmem>>, vector<1x256xf32>
      %c46 = arith.constant 46 : index
      %471 = memref.load %arg3[%c46] : memref<98xf32, #tpu.memory_space<smem>>
      %472 = vector.broadcast %471 : f32 to vector<1x256xf32>
      %473 = arith.mulf %472, %469 : vector<1x256xf32>
      %c95_164 = arith.constant 95 : index
      %474 = memref.load %arg3[%c95_164] : memref<98xf32, #tpu.memory_space<smem>>
      %475 = vector.broadcast %474 : f32 to vector<1x256xf32>
      %476 = arith.mulf %475, %470 : vector<1x256xf32>
      %477 = arith.addf %473, %476 : vector<1x256xf32>
      %478 = arith.mulf %477, %402 : vector<1x256xf32>
      %479 = arith.addf %468, %478 : vector<1x256xf32>
      %c2_i32 = arith.constant 2 : i32
      %480 = vector.broadcast %c2_i32 : i32 to vector<1x256xi32>
      %481 = arith.addi %56, %480 : vector<1x256xi32>
      %c0_i32_165 = arith.constant 0 : i32
      %482 = vector.broadcast %c0_i32_165 : i32 to vector<1x256xi32>
      %483 = arith.cmpi sge, %481, %482 : vector<1x256xi32>
      %c2_i32_166 = arith.constant 2 : i32
      %484 = vector.broadcast %c2_i32_166 : i32 to vector<1x256xi32>
      %485 = arith.addi %56, %484 : vector<1x256xi32>
      %c16_i32_167 = arith.constant 16 : i32
      %486 = vector.broadcast %c16_i32_167 : i32 to vector<1x256xi32>
      %487 = arith.cmpi slt, %485, %486 : vector<1x256xi32>
      %488 = arith.andi %483, %487 : vector<1x256xi1>
      %489 = arith.extui %488 : vector<1x256xi1> to vector<1x256xi32>
      %490 = arith.sitofp %489 : vector<1x256xi32> to vector<1x256xf32>
      %c0_168 = arith.constant 0 : index
      %c82 = arith.constant 82 : index
      %491 = vector.load %arg7[%c0_168, %c82] : memref<2x512xf32, #tpu.memory_space<vmem>>, vector<1x256xf32>
      %c1_169 = arith.constant 1 : index
      %c82_170 = arith.constant 82 : index
      %492 = vector.load %arg7[%c1_169, %c82_170] : memref<2x512xf32, #tpu.memory_space<vmem>>, vector<1x256xf32>
      %c5 = arith.constant 5 : index
      %493 = memref.load %arg3[%c5] : memref<98xf32, #tpu.memory_space<smem>>
      %494 = vector.broadcast %493 : f32 to vector<1x256xf32>
      %495 = arith.mulf %494, %491 : vector<1x256xf32>
      %c54 = arith.constant 54 : index
      %496 = memref.load %arg3[%c54] : memref<98xf32, #tpu.memory_space<smem>>
      %497 = vector.broadcast %496 : f32 to vector<1x256xf32>
      %498 = arith.mulf %497, %492 : vector<1x256xf32>
      %499 = arith.addf %495, %498 : vector<1x256xf32>
      %500 = arith.mulf %499, %490 : vector<1x256xf32>
      %501 = arith.addf %479, %500 : vector<1x256xf32>
      %c0_171 = arith.constant 0 : index
      %c98 = arith.constant 98 : index
      %502 = vector.load %arg7[%c0_171, %c98] : memref<2x512xf32, #tpu.memory_space<vmem>>, vector<1x256xf32>
      %c1_172 = arith.constant 1 : index
      %c98_173 = arith.constant 98 : index
      %503 = vector.load %arg7[%c1_172, %c98_173] : memref<2x512xf32, #tpu.memory_space<vmem>>, vector<1x256xf32>
      %c12 = arith.constant 12 : index
      %504 = memref.load %arg3[%c12] : memref<98xf32, #tpu.memory_space<smem>>
      %505 = vector.broadcast %504 : f32 to vector<1x256xf32>
      %506 = arith.mulf %505, %502 : vector<1x256xf32>
      %c61 = arith.constant 61 : index
      %507 = memref.load %arg3[%c61] : memref<98xf32, #tpu.memory_space<smem>>
      %508 = vector.broadcast %507 : f32 to vector<1x256xf32>
      %509 = arith.mulf %508, %503 : vector<1x256xf32>
      %510 = arith.addf %506, %509 : vector<1x256xf32>
      %511 = arith.mulf %510, %490 : vector<1x256xf32>
      %512 = arith.addf %501, %511 : vector<1x256xf32>
      %c0_174 = arith.constant 0 : index
      %c114 = arith.constant 114 : index
      %513 = vector.load %arg7[%c0_174, %c114] : memref<2x512xf32, #tpu.memory_space<vmem>>, vector<1x256xf32>
      %c1_175 = arith.constant 1 : index
      %c114_176 = arith.constant 114 : index
      %514 = vector.load %arg7[%c1_175, %c114_176] : memref<2x512xf32, #tpu.memory_space<vmem>>, vector<1x256xf32>
      %c19 = arith.constant 19 : index
      %515 = memref.load %arg3[%c19] : memref<98xf32, #tpu.memory_space<smem>>
      %516 = vector.broadcast %515 : f32 to vector<1x256xf32>
      %517 = arith.mulf %516, %513 : vector<1x256xf32>
      %c68 = arith.constant 68 : index
      %518 = memref.load %arg3[%c68] : memref<98xf32, #tpu.memory_space<smem>>
      %519 = vector.broadcast %518 : f32 to vector<1x256xf32>
      %520 = arith.mulf %519, %514 : vector<1x256xf32>
      %521 = arith.addf %517, %520 : vector<1x256xf32>
      %522 = arith.mulf %521, %490 : vector<1x256xf32>
      %523 = arith.addf %512, %522 : vector<1x256xf32>
      %c0_177 = arith.constant 0 : index
      %c130 = arith.constant 130 : index
      %524 = vector.load %arg7[%c0_177, %c130] : memref<2x512xf32, #tpu.memory_space<vmem>>, vector<1x256xf32>
      %c1_178 = arith.constant 1 : index
      %c130_179 = arith.constant 130 : index
      %525 = vector.load %arg7[%c1_178, %c130_179] : memref<2x512xf32, #tpu.memory_space<vmem>>, vector<1x256xf32>
      %c26 = arith.constant 26 : index
      %526 = memref.load %arg3[%c26] : memref<98xf32, #tpu.memory_space<smem>>
      %527 = vector.broadcast %526 : f32 to vector<1x256xf32>
      %528 = arith.mulf %527, %524 : vector<1x256xf32>
      %c75 = arith.constant 75 : index
      %529 = memref.load %arg3[%c75] : memref<98xf32, #tpu.memory_space<smem>>
      %530 = vector.broadcast %529 : f32 to vector<1x256xf32>
      %531 = arith.mulf %530, %525 : vector<1x256xf32>
      %532 = arith.addf %528, %531 : vector<1x256xf32>
      %533 = arith.mulf %532, %490 : vector<1x256xf32>
      %534 = arith.addf %523, %533 : vector<1x256xf32>
      %c0_180 = arith.constant 0 : index
      %c146 = arith.constant 146 : index
      %535 = vector.load %arg7[%c0_180, %c146] : memref<2x512xf32, #tpu.memory_space<vmem>>, vector<1x256xf32>
      %c1_181 = arith.constant 1 : index
      %c146_182 = arith.constant 146 : index
      %536 = vector.load %arg7[%c1_181, %c146_182] : memref<2x512xf32, #tpu.memory_space<vmem>>, vector<1x256xf32>
      %c33 = arith.constant 33 : index
      %537 = memref.load %arg3[%c33] : memref<98xf32, #tpu.memory_space<smem>>
      %538 = vector.broadcast %537 : f32 to vector<1x256xf32>
      %539 = arith.mulf %538, %535 : vector<1x256xf32>
      %c82_183 = arith.constant 82 : index
      %540 = memref.load %arg3[%c82_183] : memref<98xf32, #tpu.memory_space<smem>>
      %541 = vector.broadcast %540 : f32 to vector<1x256xf32>
      %542 = arith.mulf %541, %536 : vector<1x256xf32>
      %543 = arith.addf %539, %542 : vector<1x256xf32>
      %544 = arith.mulf %543, %490 : vector<1x256xf32>
      %545 = arith.addf %534, %544 : vector<1x256xf32>
      %c0_184 = arith.constant 0 : index
      %c162 = arith.constant 162 : index
      %546 = vector.load %arg7[%c0_184, %c162] : memref<2x512xf32, #tpu.memory_space<vmem>>, vector<1x256xf32>
      %c1_185 = arith.constant 1 : index
      %c162_186 = arith.constant 162 : index
      %547 = vector.load %arg7[%c1_185, %c162_186] : memref<2x512xf32, #tpu.memory_space<vmem>>, vector<1x256xf32>
      %c40 = arith.constant 40 : index
      %548 = memref.load %arg3[%c40] : memref<98xf32, #tpu.memory_space<smem>>
      %549 = vector.broadcast %548 : f32 to vector<1x256xf32>
      %550 = arith.mulf %549, %546 : vector<1x256xf32>
      %c89 = arith.constant 89 : index
      %551 = memref.load %arg3[%c89] : memref<98xf32, #tpu.memory_space<smem>>
      %552 = vector.broadcast %551 : f32 to vector<1x256xf32>
      %553 = arith.mulf %552, %547 : vector<1x256xf32>
      %554 = arith.addf %550, %553 : vector<1x256xf32>
      %555 = arith.mulf %554, %490 : vector<1x256xf32>
      %556 = arith.addf %545, %555 : vector<1x256xf32>
      %c0_187 = arith.constant 0 : index
      %c178 = arith.constant 178 : index
      %557 = vector.load %arg7[%c0_187, %c178] : memref<2x512xf32, #tpu.memory_space<vmem>>, vector<1x256xf32>
      %c1_188 = arith.constant 1 : index
      %c178_189 = arith.constant 178 : index
      %558 = vector.load %arg7[%c1_188, %c178_189] : memref<2x512xf32, #tpu.memory_space<vmem>>, vector<1x256xf32>
      %c47 = arith.constant 47 : index
      %559 = memref.load %arg3[%c47] : memref<98xf32, #tpu.memory_space<smem>>
      %560 = vector.broadcast %559 : f32 to vector<1x256xf32>
      %561 = arith.mulf %560, %557 : vector<1x256xf32>
      %c96_190 = arith.constant 96 : index
      %562 = memref.load %arg3[%c96_190] : memref<98xf32, #tpu.memory_space<smem>>
      %563 = vector.broadcast %562 : f32 to vector<1x256xf32>
      %564 = arith.mulf %563, %558 : vector<1x256xf32>
      %565 = arith.addf %561, %564 : vector<1x256xf32>
      %566 = arith.mulf %565, %490 : vector<1x256xf32>
      %567 = arith.addf %556, %566 : vector<1x256xf32>
      %c3_i32 = arith.constant 3 : i32
      %568 = vector.broadcast %c3_i32 : i32 to vector<1x256xi32>
      %569 = arith.addi %56, %568 : vector<1x256xi32>
      %c0_i32_191 = arith.constant 0 : i32
      %570 = vector.broadcast %c0_i32_191 : i32 to vector<1x256xi32>
      %571 = arith.cmpi sge, %569, %570 : vector<1x256xi32>
      %c3_i32_192 = arith.constant 3 : i32
      %572 = vector.broadcast %c3_i32_192 : i32 to vector<1x256xi32>
      %573 = arith.addi %56, %572 : vector<1x256xi32>
      %c16_i32_193 = arith.constant 16 : i32
      %574 = vector.broadcast %c16_i32_193 : i32 to vector<1x256xi32>
      %575 = arith.cmpi slt, %573, %574 : vector<1x256xi32>
      %576 = arith.andi %571, %575 : vector<1x256xi1>
      %577 = arith.extui %576 : vector<1x256xi1> to vector<1x256xi32>
      %578 = arith.sitofp %577 : vector<1x256xi32> to vector<1x256xf32>
      %c0_194 = arith.constant 0 : index
      %c83 = arith.constant 83 : index
      %579 = vector.load %arg7[%c0_194, %c83] : memref<2x512xf32, #tpu.memory_space<vmem>>, vector<1x256xf32>
      %c1_195 = arith.constant 1 : index
      %c83_196 = arith.constant 83 : index
      %580 = vector.load %arg7[%c1_195, %c83_196] : memref<2x512xf32, #tpu.memory_space<vmem>>, vector<1x256xf32>
      %c6 = arith.constant 6 : index
      %581 = memref.load %arg3[%c6] : memref<98xf32, #tpu.memory_space<smem>>
      %582 = vector.broadcast %581 : f32 to vector<1x256xf32>
      %583 = arith.mulf %582, %579 : vector<1x256xf32>
      %c55 = arith.constant 55 : index
      %584 = memref.load %arg3[%c55] : memref<98xf32, #tpu.memory_space<smem>>
      %585 = vector.broadcast %584 : f32 to vector<1x256xf32>
      %586 = arith.mulf %585, %580 : vector<1x256xf32>
      %587 = arith.addf %583, %586 : vector<1x256xf32>
      %588 = arith.mulf %587, %578 : vector<1x256xf32>
      %589 = arith.addf %567, %588 : vector<1x256xf32>
      %c0_197 = arith.constant 0 : index
      %c99 = arith.constant 99 : index
      %590 = vector.load %arg7[%c0_197, %c99] : memref<2x512xf32, #tpu.memory_space<vmem>>, vector<1x256xf32>
      %c1_198 = arith.constant 1 : index
      %c99_199 = arith.constant 99 : index
      %591 = vector.load %arg7[%c1_198, %c99_199] : memref<2x512xf32, #tpu.memory_space<vmem>>, vector<1x256xf32>
      %c13 = arith.constant 13 : index
      %592 = memref.load %arg3[%c13] : memref<98xf32, #tpu.memory_space<smem>>
      %593 = vector.broadcast %592 : f32 to vector<1x256xf32>
      %594 = arith.mulf %593, %590 : vector<1x256xf32>
      %c62 = arith.constant 62 : index
      %595 = memref.load %arg3[%c62] : memref<98xf32, #tpu.memory_space<smem>>
      %596 = vector.broadcast %595 : f32 to vector<1x256xf32>
      %597 = arith.mulf %596, %591 : vector<1x256xf32>
      %598 = arith.addf %594, %597 : vector<1x256xf32>
      %599 = arith.mulf %598, %578 : vector<1x256xf32>
      %600 = arith.addf %589, %599 : vector<1x256xf32>
      %c0_200 = arith.constant 0 : index
      %c115 = arith.constant 115 : index
      %601 = vector.load %arg7[%c0_200, %c115] : memref<2x512xf32, #tpu.memory_space<vmem>>, vector<1x256xf32>
      %c1_201 = arith.constant 1 : index
      %c115_202 = arith.constant 115 : index
      %602 = vector.load %arg7[%c1_201, %c115_202] : memref<2x512xf32, #tpu.memory_space<vmem>>, vector<1x256xf32>
      %c20 = arith.constant 20 : index
      %603 = memref.load %arg3[%c20] : memref<98xf32, #tpu.memory_space<smem>>
      %604 = vector.broadcast %603 : f32 to vector<1x256xf32>
      %605 = arith.mulf %604, %601 : vector<1x256xf32>
      %c69 = arith.constant 69 : index
      %606 = memref.load %arg3[%c69] : memref<98xf32, #tpu.memory_space<smem>>
      %607 = vector.broadcast %606 : f32 to vector<1x256xf32>
      %608 = arith.mulf %607, %602 : vector<1x256xf32>
      %609 = arith.addf %605, %608 : vector<1x256xf32>
      %610 = arith.mulf %609, %578 : vector<1x256xf32>
      %611 = arith.addf %600, %610 : vector<1x256xf32>
      %c0_203 = arith.constant 0 : index
      %c131 = arith.constant 131 : index
      %612 = vector.load %arg7[%c0_203, %c131] : memref<2x512xf32, #tpu.memory_space<vmem>>, vector<1x256xf32>
      %c1_204 = arith.constant 1 : index
      %c131_205 = arith.constant 131 : index
      %613 = vector.load %arg7[%c1_204, %c131_205] : memref<2x512xf32, #tpu.memory_space<vmem>>, vector<1x256xf32>
      %c27 = arith.constant 27 : index
      %614 = memref.load %arg3[%c27] : memref<98xf32, #tpu.memory_space<smem>>
      %615 = vector.broadcast %614 : f32 to vector<1x256xf32>
      %616 = arith.mulf %615, %612 : vector<1x256xf32>
      %c76 = arith.constant 76 : index
      %617 = memref.load %arg3[%c76] : memref<98xf32, #tpu.memory_space<smem>>
      %618 = vector.broadcast %617 : f32 to vector<1x256xf32>
      %619 = arith.mulf %618, %613 : vector<1x256xf32>
      %620 = arith.addf %616, %619 : vector<1x256xf32>
      %621 = arith.mulf %620, %578 : vector<1x256xf32>
      %622 = arith.addf %611, %621 : vector<1x256xf32>
      %c0_206 = arith.constant 0 : index
      %c147 = arith.constant 147 : index
      %623 = vector.load %arg7[%c0_206, %c147] : memref<2x512xf32, #tpu.memory_space<vmem>>, vector<1x256xf32>
      %c1_207 = arith.constant 1 : index
      %c147_208 = arith.constant 147 : index
      %624 = vector.load %arg7[%c1_207, %c147_208] : memref<2x512xf32, #tpu.memory_space<vmem>>, vector<1x256xf32>
      %c34 = arith.constant 34 : index
      %625 = memref.load %arg3[%c34] : memref<98xf32, #tpu.memory_space<smem>>
      %626 = vector.broadcast %625 : f32 to vector<1x256xf32>
      %627 = arith.mulf %626, %623 : vector<1x256xf32>
      %c83_209 = arith.constant 83 : index
      %628 = memref.load %arg3[%c83_209] : memref<98xf32, #tpu.memory_space<smem>>
      %629 = vector.broadcast %628 : f32 to vector<1x256xf32>
      %630 = arith.mulf %629, %624 : vector<1x256xf32>
      %631 = arith.addf %627, %630 : vector<1x256xf32>
      %632 = arith.mulf %631, %578 : vector<1x256xf32>
      %633 = arith.addf %622, %632 : vector<1x256xf32>
      %c0_210 = arith.constant 0 : index
      %c163 = arith.constant 163 : index
      %634 = vector.load %arg7[%c0_210, %c163] : memref<2x512xf32, #tpu.memory_space<vmem>>, vector<1x256xf32>
      %c1_211 = arith.constant 1 : index
      %c163_212 = arith.constant 163 : index
      %635 = vector.load %arg7[%c1_211, %c163_212] : memref<2x512xf32, #tpu.memory_space<vmem>>, vector<1x256xf32>
      %c41 = arith.constant 41 : index
      %636 = memref.load %arg3[%c41] : memref<98xf32, #tpu.memory_space<smem>>
      %637 = vector.broadcast %636 : f32 to vector<1x256xf32>
      %638 = arith.mulf %637, %634 : vector<1x256xf32>
      %c90 = arith.constant 90 : index
      %639 = memref.load %arg3[%c90] : memref<98xf32, #tpu.memory_space<smem>>
      %640 = vector.broadcast %639 : f32 to vector<1x256xf32>
      %641 = arith.mulf %640, %635 : vector<1x256xf32>
      %642 = arith.addf %638, %641 : vector<1x256xf32>
      %643 = arith.mulf %642, %578 : vector<1x256xf32>
      %644 = arith.addf %633, %643 : vector<1x256xf32>
      %c0_213 = arith.constant 0 : index
      %c179 = arith.constant 179 : index
      %645 = vector.load %arg7[%c0_213, %c179] : memref<2x512xf32, #tpu.memory_space<vmem>>, vector<1x256xf32>
      %c1_214 = arith.constant 1 : index
      %c179_215 = arith.constant 179 : index
      %646 = vector.load %arg7[%c1_214, %c179_215] : memref<2x512xf32, #tpu.memory_space<vmem>>, vector<1x256xf32>
      %c48 = arith.constant 48 : index
      %647 = memref.load %arg3[%c48] : memref<98xf32, #tpu.memory_space<smem>>
      %648 = vector.broadcast %647 : f32 to vector<1x256xf32>
      %649 = arith.mulf %648, %645 : vector<1x256xf32>
      %c97_216 = arith.constant 97 : index
      %650 = memref.load %arg3[%c97_216] : memref<98xf32, #tpu.memory_space<smem>>
      %651 = vector.broadcast %650 : f32 to vector<1x256xf32>
      %652 = arith.mulf %651, %646 : vector<1x256xf32>
      %653 = arith.addf %649, %652 : vector<1x256xf32>
      %654 = arith.mulf %653, %578 : vector<1x256xf32>
      %655 = arith.addf %644, %654 : vector<1x256xf32>
      %656 = arith.negf %655 : vector<1x256xf32>
      %657 = math.exp %656 : vector<1x256xf32>
      %cst_217 = arith.constant 1.000000e+00 : f32
      %658 = vector.broadcast %cst_217 : f32 to vector<1x256xf32>
      %659 = arith.addf %658, %657 : vector<1x256xf32>
      %660 = arith.divf %658, %659 : vector<1x256xf32>
      %661 = arith.mulf %660, %655 : vector<1x256xf32>
      %c0_218 = arith.constant 0 : index
      %c0_219 = arith.constant 0 : index
      %c0_220 = arith.constant 0 : index
      %662 = vector.load %arg4[%c0_218, %c0_219, %c0_220] : memref<1x1x256xf32, #tpu.memory_space<vmem>>, vector<1x1x256xf32>
      %663 = vector.shape_cast %662 : vector<1x1x256xf32> to vector<1x256xf32>
      %664 = vector.shape_cast %661 : vector<1x256xf32> to vector<1x1x256xf32>
      tpu.vector_store %arg4[%c0_218, %c0_219, %c0_220], %664 {strides = array<i32>} : memref<1x1x256xf32, #tpu.memory_space<vmem>>, vector<1x1x256xf32>,
    } else {
    }
    return
  }
  func.func @transform_0(%arg0: i32, %arg1: i32) -> (i32, i32, i32) {
    %c0_i32 = arith.constant 0 : i32
    %c0_i32_0 = arith.constant 0 : i32
    return %arg0, %arg1, %c0_i32 : i32, i32, i32
  }
  func.func @transform_1(%arg0: i32, %arg1: i32) -> i32 {
    %c0_i32 = arith.constant 0 : i32
    %c0_i32_0 = arith.constant 0 : i32
    return %c0_i32 : i32
  }
  func.func @transform_2(%arg0: i32, %arg1: i32) -> (i32, i32, i32) {
    %c0_i32 = arith.constant 0 : i32
    %c0_i32_0 = arith.constant 0 : i32
    %c0_i32_1 = arith.constant 0 : i32
    return %arg0, %c0_i32, %c0_i32_0 : i32, i32, i32
  }
}

</mosaic_0001>

<bundles_post_ra>
// kernel: tpu_custom_call.1
= control target key start
LH: loop header
LB: loop body
LE: loop exit
PB: predicated region body
PF: predicated region fallthrough
CT: control target
= control target key end

     0   :  { %s3084_s0 = inlined_call_operand.hbm [shape: f32[2,4,256], index: 0, kind: input, shape index: {}]   ;;  %s3085_s1 = inlined_call_operand.vmem [shape: f32[98], index: 1, kind: input, shape index: {}]   ;;  %s3086_s2 = inlined_call_operand.hbm [shape: f32[2,1,256], index: 2, kind: output, shape index: {}]  }
   0x1   :  { %3122 = sst [smem:[#allocation16_spill]] %s3084_s0 }
   0x2   :  { %3123 = sst [smem:[#allocation17_spill]] %s3085_s1 }
   0x3   :  { %7 = vsyncpa [#allocation6], 0 }
   0x4   :  { %9 = vsyncpa [#allocation6 + $0x1], 0 }
   0x5   :  { %10 = vsyncpa [#allocation8], 0 }
   0x6   :  { %11 = vsyncpa [#allocation7], 0 }
   0x7   :  { %13 = vsyncpa [#allocation7 + $0x1], 0  ;;  %s2288_s9 = smov 0   ;;  %s2290_s10 = smov 0  }
   0x8   :  { %s2292_s11 = smov 0   ;;  %s2294_s12 = smov 0  }
   0x9   :  { %s2296_s13 = smov 0   ;;  %s2298_s14 = smov 0  }
   0xa LB: > { %3124 = sst [smem:[#allocation14_spill]] %s2189_s13  ;;  %s1778_s15 = sadd.s32 4294967295, %s2193_s14   ;;  %s2193_s14 = sphi %s2298_s14, %s19_s14   ;;  %s2189_s13 = sphi %s2296_s13, %s3173_s13   ;;  %s2185_s12 = sphi %s2294_s12, %s3172_s12   ;;  %s2181_s11 = sphi %s2292_s11, %s3176_s11   ;;  %s2177_s10 = sphi %s2290_s10, %s3175_s10   ;;  %s2173_s9 = sphi %s2288_s9, %s3174_s9  }
   0xb   : > { %s1779_s16 = sadd.s32 4294967294, %s2193_s14   ;;  %p53_p0 = scmp.ne.s32.totalorder %s2177_s10, %s2173_s9 }
   0xc   : > { %p2322_p1 = scmp.eq.s32.totalorder %s1778_s15, 0  ;;  %p2326_p2 = scmp.eq.s32.totalorder %s1778_s15, 1 }
   0xd   : > { %p104_p3 = scmp.eq.s32.totalorder %s1779_s16, 1  ;;  %p1780_p5 = scmp.ge.s32.totalorder %s2193_s14, 1 }
   0xe   : > { %s3125_s17 = scalar_select %p2322_p1, 1, 0 }
   0xf   : > { %p2332_p4 = por %p2322_p1, %p53_p0  ;;  %p2337_p6 = por %p104_p3, %p53_p0 }
  0x10   : > { %p111_p7 = scmp.lt.s32.totalorder %s2193_s14, 3  ;;  %s3129_s1 = sld [smem:[#allocation17_spill]] }
  0x11   : > { %s3127_s19 = scalar_select %p2332_p4, 1, 0 }
  0x12   : > { %s3128_s20 = scalar_select %p2337_p6, 1, 0 }
  0x13   : > { %p2345_p8 = pnand %p1780_p5, %p111_p7  ;;  %s31_s26 = sadd.s32 1, %s2189_s13 }
  0x14   : > { %s40_s27 = sadd.s32 1, %s2181_s11  ;;  %p33_p12 = scmp.ge.s32.totalorder %s31_s26, 2 }
  0x15   : > { %p1918_p10 = pneg %p2345_p8 }
  0x16   : > { %s124_s23 = sshll.u32 %s3129_s1, 4  ;;  %s125_s23 = int_to_ptr.vmem [resolvable:$true] %s124_s23 }
  0x17   : > { %p2354_p11 = pnand %p1918_p10, %p2322_p1  ;;  %s2062_s28 = scalar_lea.vmem %s125_s23, 16 }
  0x18   : > { %p2063_p13 = scmp.ne.s32.totalorder %s125_s23, %s2062_s28  ;;  %p2070_p7 = scmp.lt.s32.totalorder %s125_s23, %s125_s23 }
  0x19   : > { %p2064_p0 = pneg %p2354_p11  ;;  %p2071_p6 = scmp.lt.s32.totalorder %s2062_s28, %s2062_s28 }
  0x1b   : > { %p2065_p3 = pnand %p2064_p0, %p2063_p13  ;;  %p2072_p9 = por %p2071_p6, %p2070_p7 }
  0x1d   : > { %p2066_p5 = pneg %p2065_p3 }
  0x1f   : > { %p2073_p4 = pnand %p2072_p9, %p2066_p5 }
  0x21   : > { %2076 = shalt.err (!%p2073_p4)
}
  0x22   : > { %s2195_s29 = smov [#allocation9]   ;;  %s3178_s26 = smov (%p33_p12, %s31_s26), 0 }
  0x23   : > { %1921 = dma.vmem_to_smem (!%p2354_p11), %s125_s23, 16, %s2195_s29, [#allocation8]  }
  0x24   : > { %3132 = sst [smem:[#allocation15_spill]] %s3178_s26  ;;  %p47_p10 = scmp.ne.s32.totalorder %s2181_s11, %s2177_s10 }
  0x25   : > { %p48_p6 = scmp.eq.s32.totalorder %s2193_s14, 0  ;;  %s35_s30 = ssub.s32 %s2189_s13, %s3178_s26 }
  0x26   : > { %p1931_p4 = scmp.lt.s32.totalorder %s2193_s14, 2  ;;  %p38_p9 = scmp.eq.s32.totalorder %s35_s30, 0 }
  0x27   : > { %p49_p13 = por %p48_p6, %p47_p10  ;;  %p2374_p0 = por %p2326_p2, %p47_p10 }
  0x28   : > { %s135_s4 = sand.u32 1, %s2181_s11   ;;  %s1908_s7 = sshll.u32 %s2189_s13, 7 }
  0x29   : > { %s3133_s3 = scalar_select %p2374_p0, 1, 0 }
  0x2a   : > { %s2380_s5 = scalar_select %p38_p9, %s2181_s11, %s40_s27  }
  0x2b   : > { %s1783_s6 = sshll.u32 %s135_s4, 3  ;;  %s3134_s0 = sld [smem:[#allocation16_spill]] }
  0x2c   : > { %s139_s21 = scalar_lea.vmem [#allocation5], %s1783_s6  ;;  %p2390_p2 = pnand %p1931_p4, %p49_p13 }
  0x2d   : > { %s149_s18 = sshll.u32 %s139_s21, 4  ;;  %s136_s23 = scalar_lea.sflag [#allocation6], %s135_s4  ;;  %s2388_s18 = int_to_ptr.vmem [resolvable:$true] %s149_s18 }
  0x2e   : > { %p2079_p12 = pneg %p2390_p2 }
  0x31   : > { %s2386_s16 = scalar_lea.hbm %s3134_s0, %s1908_s7  ;;  %s2082_s29 = scalar_lea.hbm %s3134_s0, 256 }
  0x32   : > { %s2077_s25 = scalar_lea.hbm %s2386_s16, 128  ;;  %p2083_p7 = scmp.lt.u32.totalorder %s2386_s16, %s3134_s0 }
  0x33   : > { %p2078_p11 = scmp.ne.s32.totalorder %s2386_s16, %s2077_s25  ;;  %p2084_p10 = scmp.lt.u32.totalorder %s2082_s29, %s2077_s25 }
  0x34   : > { %p2086_p4 = scmp.lt.u32.totalorder %s2077_s25, %s2386_s16 }
  0x35   : > { %p2080_p3 = pnand %p2079_p12, %p2078_p11  ;;  %p2085_p6 = por %p2084_p10, %p2083_p7 }
  0x37   : > { %p2081_p5 = pneg %p2080_p3  ;;  %p2087_p9 = por %p2086_p4, %p2085_p6 }
  0x39   : > { %p2088_p13 = pnand %p2087_p9, %p2081_p5 }
  0x3b   : > { %2091 = shalt.err (!%p2088_p13)
}
  0x3c   : > { %s2092_s4 = scalar_lea.vmem %s2388_s18, 128  ;;  %s2196_s7 = smov [#allocation5]  }
  0x3d   : > { %p2093_p11 = scmp.ne.s32.totalorder %s2388_s18, %s2092_s4  ;;  %s2097_s8 = sshll.u32 %s2196_s7, 4  ;;  %s2098_s8 = int_to_ptr.vmem [resolvable:$false] %s2097_s8 }
  0x3e   : > { %s2099_s15 = scalar_lea.vmem %s2098_s8, 256  ;;  %p2100_p1 = scmp.lt.s32.totalorder %s2388_s18, %s2098_s8 }
  0x3f   : > { %p2095_p3 = pnand %p2093_p11, %p2079_p12  ;;  %p2101_p7 = scmp.lt.s32.totalorder %s2099_s15, %s2092_s4 }
  0x41   : > { %p2096_p0 = pneg %p2095_p3  ;;  %p2102_p10 = por %p2101_p7, %p2100_p1 }
  0x43   : > { %p2103_p6 = pnand %p2102_p10, %p2096_p0 }
  0x45   : > { %2106 = shalt.err (!%p2103_p6)
}
  0x46   : > { %1925 = dma.hbm_to_vmem [thread:$0]  (!%p2390_p2), %s2386_s16, 128, %s2388_s18, %s136_s23  }
  0x47   : > { %158 = sbr.rel (%p2345_p8) target bundleno = 628 (0x274), region = 28  ;;  %s2422_s21 = sand.u32 (!%p2345_p8), 1, %s2177_s10  }
  0x48   : > { %s1787_s25 = sshll.u32 (!%p2345_p8), %s2422_s21, 3  ;;  %s161_s27 = scalar_lea.sflag (!%p2345_p8), [#allocation6], %s2422_s21 }
  0x49   : > { %s2426_s28 = scalar_lea.vmem (!%p2345_p8), [#allocation5], %s1787_s25  ;;  %p3136_p1 = scmp.ne.s32.totalorder (!%p2345_p8), %s3127_s19, 0 }
  0x4e   : > { %2160 = dma.done.wait (%p3136_p1), %s161_s27, 128  }
  0x4f   : > { %2162 = vsyncadd (%p3136_p1), %s161_s27, 4294967168  ;;  %p3137_p0 = scmp.ne.s32.totalorder %s3125_s17, 0 }
  0x51   : > { %2164 = dma.done.wait (%p3137_p0), [#allocation8], 16  }
  0x52   : > { %2166 = vsyncadd (%p3137_p0), [#allocation8], 4294967280 }
  0x53   : > { %173 = sfence }
  0x54   : > { %v218_v0 = vlaneseq  ;;  %v204_v1 = vld [vmem:[%s2426_s28] ss:$4 sm:$0x3]  ;;  %v1790_v2 = vld [vmem:[%s2426_s28 + $0x1] ss:$4 sm:$0x3] }
  0x55   : > { %v2197_v3 = vmov 0.0   ;;  %v207_v5 = vmax.f32 %v204_v1, %v1790_v2  ;;  %v2198_v6 = vmov 1966171168   ;;  %v208_v8 = vadd.f32 %v1790_v2, %v204_v1  ;;  %v1791_v10 = vld [vmem:[%s2426_s28 + $0x2] ss:$4 sm:$0x3] }
  0x56   : > { %196 = vst [vmem:[#allocation3] sm:$0xff] %v2197_v3  ;;  %197 = vst [vmem:[#allocation3 + $0x8] sm:$0xff] %v2197_v3  ;;  %v361_v4 = vand.u32 127, %v218_v0  ;;  %v234_v7 = vunpack.c.l.s4 %v2198_v6  ;;  %v2199_v9 = vmov -inf   ;;  %v219_v13 = vshrl.u32 %v218_v0, 7  ;;  %s3093_s17 = smov 125  }
  0x57   : > { %198 = vst [vmem:[#allocation4] sm:$0x3] %v2197_v3  ;;  %199 = vst [vmem:[#allocation4 + $0x6] sm:$0x3] %v2197_v3  ;;  %v211_v14 = vmax.f32 %v207_v5, %v1791_v10  ;;  %v212_v18 = vadd.f32 %v1791_v10, %v208_v8  ;;  %s3092_s19 = smov 93   ;;  %s2202_s24 = smov 13  }
  0x58   : > { %194 = vst [vmem:[#allocation2] sm:$0xff] %v2199_v9  ;;  %195 = vst [vmem:[#allocation2 + $0x8] sm:$0xff] %v2199_v9  ;;  %v362_v11 = vadd.s32 128, %v361_v4  ;;  %v2444_v12 = vand.u32 15, %v361_v4  ;;  %v235_v15 = vunpack.c.0.s8 %v234_v7  ;;  %v220_v27 = vsub.s32 0, %v219_v13  ;;  %s3104_s16 = smov 109  }
  0x59   : > { %v1792_v19 = vld [vmem:[%s2426_s28 + $0x3] ss:$4 sm:$0x3]  ;;  %v224_v29 = vsub.s32 1, %v219_v13  ;;  %vm2486_vm8 = vcmp.lt.s32.totalorder %v218_v0, 256  ;;  %s3100_s18 = smov 45  }
  0x5a   : > { %v2447_v16 = vand.u32 15, %v362_v11  ;;  %v387_v17 = vadd.s32 4294967293, %v2444_v12  ;;  %v580_v21 = vadd.s32 4294967294, %v2444_v12  ;;  %v215_v24 = vmax.f32 %v211_v14, %v1792_v19  ;;  %s3091_s22 = smov 29   ;;  %s3096_s23 = smov 94  }
  0x5b   : > { %v2455_v25 = vsub.s32 %v235_v15, %v219_v13  ;;  %v216_v26 = vadd.f32 %v1792_v19, %v212_v18  ;;  %v1459_v37 = vadd.s32 3, %v2444_v12  ;;  %v777_v40 = vadd.s32 4294967295, %v2444_v12  ;;  %s3095_s29 = smov 78   ;;  %s3098_s30 = smov 126  }
  0x5c   : > { %v388_v20 = vadd.s32 4294967293, %v2447_v16  ;;  %vm389_vm0 = vcmp.ge.s32.totalorder %v387_v17, 0  ;;  %v581_v22 = vadd.s32 4294967294, %v2447_v16  ;;  %vm582_vm2 = vcmp.ge.s32.totalorder %v580_v21, 0  ;;  %s3097_s6 = smov 110   ;;  %s3106_s4 = smov 30  }
  0x5d   : > { %v1793_v23 = vsel %vm389_vm0, 1.0, %v2197_v3  ;;  %v221_v31 = vrot.slane %v215_v24, %v220_v27  ;;  %v225_v32 = vrot.slane %v215_v24, %v224_v29  ;;  %v258_v34 = vrot.slane %v216_v26, %v220_v27  ;;  %s2211_s7 = smov 14   ;;  %s3105_s8 = smov 79  }
  0x5e   : > { %vm390_vm1 = vcmp.ge.s32.totalorder %v388_v20, 0  ;;  %vm583_vm3 = vcmp.ge.s32.totalorder %v581_v22, 0  ;;  %v1808_v35 = vsel %vm582_vm2, 1.0, %v2197_v3  ;;  %v262_v38 = vrot.slane %v216_v26, %v224_v29  ;;  %s3094_s15 = smov 46   ;;  %s3108_s25 = smov 111  }
  0x5f   : > { %v1794_v28 = vsel %vm390_vm1, 1.0, %v2197_v3  ;;  %v1809_v36 = vsel %vm583_vm3, 1.0, %v2197_v3  ;;  %v1460_v41 = vadd.s32 3, %v2447_v16  ;;  %vm1463_vm4 = vcmp.lt.s32.totalorder %v1459_v37, 16  ;;  %s3107_s27 = smov 95   ;;  %s2216_s28 = smov 15  }
  0x60   : > { %v411_v30 = vcombine.low %v1793_v23, %v1794_v28  ;;  %v603_v42 = vcombine.low %v1808_v35, %v1809_v36  ;;  %v778_v43 = vadd.s32 4294967295, %v2447_v16  ;;  %v1886_v44 = vsel %vm1463_vm4, 1.0, %v2197_v3  ;;  %s2632_s0 = sld [smem:[#allocation9 + $0x1d]]  ;;  %s2636_s1 = sld [smem:[#allocation9 + $0x4e]] }
  0x61   : > { %vm1464_vm5 = vcmp.lt.s32.totalorder %v1460_v41, 16  ;;  %v232_v46 = vcombine.low %v221_v31, %v225_v32  ;;  %v269_v50 = vcombine.low %v258_v34, %v262_v38  ;;  %vm779_vm6 = vcmp.ge.s32.totalorder %v777_v40, 0  ;;  %s2695_s26 = sld [smem:[#allocation9 + $0x57]]  ;;  %s2717_s13 = sld [smem:[#allocation9 + $0x43]] }
  0x62   : > { %v418_v33 = vrot.slane %v411_v30, %v2455_v25  ;;  %v1887_v45 = vsel %vm1464_vm5, 1.0, %v2197_v3  ;;  %v610_v48 = vrot.slane %v603_v42, %v2455_v25  ;;  %vm780_vm7 = vcmp.ge.s32.totalorder %v778_v43, 0  ;;  %p3169_p2 = scmp.ne.s32.totalorder %s3133_s3, 0 }
  0x63   : > { %v1482_v47 = vcombine.low %v1886_v44, %v1887_v45  ;;  %v239_v49 = vrot.slane %v232_v46, %v2455_v25  ;;  %v276_v53 = vrot.slane %v269_v50, %v2455_v25  ;;  %v1824_v57 = vsel %vm779_vm6, 1.0, %v2197_v3 }
  0x64   : > { %v2463_v39 = vrot.slane %v418_v33, %v2455_v25  ;;  %v617_v56 = vrot.slane %v610_v48, %v2455_v25  ;;  %v1825_v58 = vsel %vm780_vm7, 1.0, %v2197_v3  ;;  %v1067_v62 = vadd.s32 1, %v2444_v12 }
  0x65   : > { %v1489_v51 = vrot.slane %v1482_v47, %v2455_v25  ;;  %v246_v52 = vrot.slane %v239_v49, %v2455_v25  ;;  %v283_v59 = vrot.slane %v276_v53, %v2455_v25  ;;  %v800_v60 = vcombine.low %v1824_v57, %v1825_v58 }
  0x66   : > { %491 = vrot.lane.b32.xlu1 %v2463_v39, %s3093_s17  ;;  %443 = vrot.lane.b32.xlu0 %v2463_v39, %s3092_s19  ;;  %v1068_v63 = vadd.s32 1, %v2447_v16  ;;  %vm1071_vm9 = vcmp.lt.s32.totalorder %v1067_v62, 16  ;;  %v1262_v47 = vadd.s32 2, %v2444_v12  ;;  %v1263_v48 = vadd.s32 2, %v2447_v16  ;;  %s2221_s19 = smov 81   ;;  %s2222_s17 = smov 1  }
  0x67   : > { %v2483_v54 = vrot.slane %v1489_v51, %v2455_v25  ;;  %252 = vst.msk [vmem:[#allocation2] ss:$8 sm:$0x3] %vm2486_vm8, %v246_v52  ;;  %285 = vst.msk [vmem:[#allocation3] ss:$8 sm:$0x3] %vm2486_vm8, %v283_v59  ;;  %v807_v61 = vrot.slane %v800_v60, %v2455_v25 }
  0x68   : > { %vm1072_vm10 = vcmp.lt.s32.totalorder %v1068_v63, 16  ;;  %v1854_v22 = vsel %vm1071_vm9, 1.0, %v2197_v3  ;;  %vm1266_vm11 = vcmp.lt.s32.totalorder %v1262_v47, 16  ;;  %vm1267_vm12 = vcmp.lt.s32.totalorder %v1263_v48, 16 }
  0x69   : > { %v814_v11 = vrot.slane %v807_v61, %v2455_v25  ;;  %v1855_v23 = vsel %vm1072_vm10, 1.0, %v2197_v3  ;;  %v1870_v49 = vsel %vm1266_vm11, 1.0, %v2197_v3  ;;  %v1871_v50 = vsel %vm1267_vm12, 1.0, %v2197_v3 }
  0x6a   : > { %517 = vrot.lane.b32.xlu1 %v2463_v39, %s2202_s24  ;;  %467 = vrot.lane.b32.xlu0 %v2463_v39, %s3104_s16  ;;  %v1088_v33 = vcombine.low %v1854_v22, %v1855_v23  ;;  %s3109_s24 = smov 127   ;;  %v1285_v12 = vcombine.low %v1870_v49, %v1871_v50  ;;  %vm3114_vm13 = vcmask 760832   ;;  %vm3115_vm14 = vcmask 891904   ;;  %s2595_s16 = sld [smem:[#allocation9 + $0xf]] }
  0x6b   : > { %vm3116_vm15 = vcmask 1022976   ;;  %vm520_vm0 = vcmask 105472   ;;  %vm3112_vm1 = vcmask 236544   ;;  %vm3113_vm2 = vcmask 367616  }
  0x6c   : > { %v1095_v41 = vrot.slane %v1088_v33, %v2455_v25  ;;  %v1292_v16 = vrot.slane %v1285_v12, %v2455_v25  ;;  %vm3120_vm3 = vcmask 637952   ;;  %vm645_vm4 = vcmask 769024  }
  0x6d   : > { %vm693_vm5 = vcmask 1031168   ;;  %vm669_vm6 = vcmask 900096   ;;  %vm906_vm7 = vcmask 121856   ;;  %vm3117_vm9 = vcmask 244736  }
  0x6e   : > { %565 = vrot.lane.b32.xlu1 %v2463_v39, %s3100_s18  ;;  %541 = vrot.lane.b32.xlu0 %v2463_v39, %s3091_s22  ;;  %v290_v0 = vld [vmem:[#allocation2] sm:$0xff]  ;;  %v291_v1 = vld [vmem:[#allocation2 + $0x8] sm:$0xff]  ;;  %v324_v5 = vld [vmem:[#allocation3] sm:$0xff]  ;;  %s3099_s22 = smov 31   ;;  %v1102_v45 = vrot.slane %v1095_v41, %v2455_v25  ;;  %v1299_v51 = vrot.slane %v1292_v16, %v2455_v25  ;;  %s2234_s18 = smov 50   ;;  %vm717_vm10 = vcmask 113664  }
  0x6f   : > { %v292_v2 = vrot.slane %v290_v0, 4  ;;  %v298_v4 = vrot.slane %v291_v1, 4  ;;  %v325_v6 = vld [vmem:[#allocation3 + $0x8] sm:$0xff]  ;;  %v326_v9 = vrot.slane %v324_v5, 4  ;;  %vm749_vm11 = vcmask 384000  }
  0x70   : > { %v332_v10 = vrot.slane %v325_v6, 4  ;;  %vm3119_vm12 = vcmask 375808  }
  0x71   : > { %v293_v7 = vmax.f32 %v290_v0, %v292_v2  ;;  %v299_v8 = vmax.f32 %v291_v1, %v298_v4  ;;  %v327_v15 = vadd.f32 %v326_v9, %v324_v5 }
  0x72   : > { %642 = vrot.lane.b32.xlu1 %v617_v56, %s3096_s23  ;;  %618 = vrot.lane.b32.xlu0 %v617_v56, %s3095_s29  ;;  %v333_v17 = vadd.f32 %v332_v10, %v325_v6  ;;  %s2224_s29 = smov 17   ;;  %s3102_s23 = smov 77  }
  0x73   : > { %v294_v13 = vrot.slane %v293_v7, 2  ;;  %v300_v14 = vrot.slane %v299_v8, 2  ;;  %v328_v20 = vrot.slane %v327_v15, 2 }
  0x74   : > { %v334_v21 = vrot.slane %v333_v17, 2 }
  0x75   : > { %v295_v18 = vmax.f32 %v293_v7, %v294_v13  ;;  %v301_v19 = vmax.f32 %v299_v8, %v300_v14  ;;  %v329_v27 = vadd.f32 %v328_v20, %v327_v15 }
  0x76   : > { %690 = vrot.lane.b32.xlu1 %v617_v56, %s3098_s30  ;;  %666 = vrot.lane.b32.xlu0 %v617_v56, %s3097_s6  ;;  %v335_v28 = vadd.f32 %v334_v21, %v333_v17  ;;  %s2230_s6 = smov 114   ;;  %s2232_s30 = smov 18  }
  0x77   : > { %v296_v24 = vrot.slane %v295_v18, 1  ;;  %v302_v26 = vrot.slane %v301_v19, 1  ;;  %v330_v31 = vrot.slane %v329_v27, 1 }
  0x78   : > { %v336_v32 = vrot.slane %v335_v28, 1 }
  0x79   : > { %v297_v29 = vmax.f32 %v295_v18, %v296_v24  ;;  %v303_v30 = vmax.f32 %v301_v19, %v302_v26  ;;  %v331_v35 = vadd.f32 %v330_v31, %v329_v27 }
  0x7a   : > { %738 = vrot.lane.b32.xlu1 %v617_v56, %s3106_s4  ;;  %714 = vrot.lane.b32.xlu0 %v617_v56, %s2211_s7  ;;  %v337_v36 = vadd.f32 %v336_v32, %v335_v28  ;;  %s3101_s7 = smov 47   ;;  %s2611_s4 = sld [smem:[#allocation9 + $0x2]] }
  0x7b   : > { %v306_v34 = vcombine.low %v297_v29, %v303_v30  ;;  %v338_v38 = vmul.f32 0.25, %v331_v35 }
  0x7c   : > { %v339_v40 = vmul.f32 0.25, %v337_v36 }
  0x7d   : > { %v313_v37 = vrot.slane %v306_v34, %v2455_v25 }
  0x7e   : > { %815 = vrot.lane.b32.xlu1 %v814_v11, %s3105_s8  ;;  %762 = vrot.lane.b32.xlu0 %v617_v56, %s3094_s15  ;;  %v342_v43 = vcombine.low %v338_v38, %v339_v40  ;;  %s2223_s15 = smov 113   ;;  %s2597_s8 = sld [smem:[#allocation9 + $0x40]] }
  0x7f   : > { %v320_v42 = vrot.slane %v313_v37, %v2455_v25 }
  0x80   : > { %v349_v44 = vrot.slane %v342_v43, %v2455_v25 }
  0x81   : > { %323 = vst.msk [vmem:[#allocation4 + $0x2] ss:$2 sm:$0x3] %vm2486_vm8, %v320_v42 }
  0x82   : > { %859 = vrot.lane.b32.xlu1 %v814_v11, %s3108_s25  ;;  %837 = vrot.lane.b32.xlu0 %v814_v11, %s3107_s27  ;;  %v356_v46 = vrot.slane %v349_v44, %v2455_v25  ;;  %s2613_s27 = sld [smem:[#allocation9 + $0x33]]  ;;  %s2615_s25 = sld [smem:[#allocation9 + $0x10]] }
  0x84   : > { %359 = vst.msk [vmem:[#allocation4 + $0x3] ss:$2 sm:$0x3] %vm2486_vm8, %v356_v46 }
  0x86   : > { %903 = vrot.lane.b32.xlu1 %v814_v11, %s2216_s28  ;;  %881 = vrot.lane.b32.xlu0 %v814_v11, %s3109_s24  ;;  %s2220_s28 = smov 97   ;;  %s2630_s24 = sld [smem:[#allocation9 + $0x41]] }
  0x88   : > { %v458_v59 = vld [vmem:[#allocation4] ss:$2 sm:$0x7] }
  0x89   : > { %v482_v62 = vld [vmem:[#allocation4] ss:$2 sm:$0x7] }
  0x8a   : > { %949 = vrot.lane.b32.xlu1 %v814_v11, %s3101_s7  ;;  %927 = vrot.lane.b32.xlu0 %v814_v11, %s3099_s22  ;;  %s2233_s22 = smov 34   ;;  %s2237_s7 = smov 115   ;;  %v507_v13 = vld [vmem:[#allocation4 + $0x2] ss:$2 sm:$0x7] }
  0x8b   : > { %v435_v52 = vld [vmem:[#allocation4 + $0x1] ss:$2 sm:$0x7]  ;;  %v532_v30 = vld [vmem:[#allocation4 + $0x2] ss:$2 sm:$0x7] }
  0x8c   : > { %v459_v60 = vld [vmem:[#allocation4 + $0x1] ss:$2 sm:$0x7]  ;;  %v556_v38 = vld [vmem:[#allocation4 + $0x2] ss:$2 sm:$0x7] }
  0x8d   : > { %v483_v6 = vld [vmem:[#allocation4 + $0x1] ss:$2 sm:$0x7] }
  0x8e   : > { %1127 = vrot.lane.b32.xlu1 %v1102_v45, %s2220_s28  ;;  %1103 = vrot.lane.b32.xlu0 %v1102_v45, %s2221_s19  ;;  %s2226_s28 = smov 33   ;;  %s2227_s19 = smov 49   ;;  %v509_v20 = vld [vmem:[#allocation4 + $0x3] ss:$2 sm:$0x7] }
  0x8f   : > { %v533_v35 = vld [vmem:[#allocation4 + $0x3] ss:$2 sm:$0x7] }
  0x90   : > { %v557_v47 = vld [vmem:[#allocation4 + $0x3] ss:$2 sm:$0x7] }
  0x92   : > { %1175 = vrot.lane.b32.xlu1 %v1102_v45, %s2222_s17  ;;  %1151 = vrot.lane.b32.xlu0 %v1102_v45, %s2223_s15  ;;  %s2228_s17 = smov 82   ;;  %s2229_s15 = smov 98  }
  0x96   : > { %1199 = vrot.lane.b32.xlu1 %v1102_v45, %s2224_s29  ;;  %426 = vrot.lane.b32.xlu0 %v2463_v39, %s3102_s23  ;;  %s2231_s29 = smov 2   ;;  %s2239_s23 = smov 19   ;;  %v434_v39 = vld [vmem:[#allocation4] ss:$2 sm:$0x7] }
  0x9a   : > { %1223 = vrot.lane.b32.xlu1 %v1102_v45, %s2226_s28  ;;  %s2235_s28 = smov 83  }
  0x9e   : > { %1247 = vrot.lane.b32.xlu1 %v1102_v45, %s2227_s19  ;;  %s2236_s19 = smov 99  }
  0xa2   : > { %1300 = vrot.lane.b32.xlu1 %v1299_v51, %s2228_s17  ;;  %s1796_s17 = sld [smem:[#allocation9 + $0x7]] }
  0xa6   : > { %1324 = vrot.lane.b32.xlu1 %v1299_v51, %s2229_s15  ;;  %s1797_s15 = sld [smem:[#allocation9 + $0x38]] }
  0xa8   : > { %v437_v3 = vstv %s1796_s17  ;;  %s2554_s17 = sld [smem:[#allocation9 + $0x23]] }
  0xa9   : > { %v438_v53 = vmul.f32 %v437_v3, %v434_v39  ;;  %v592_v3 = vld [vmem:[#allocation4] ss:$2 sm:$0x7] }
  0xaa   : > { %1348 = vrot.lane.b32.xlu1 %v1299_v51, %s2230_s6  ;;  %s2238_s6 = smov 3  }
  0xac   : > { %v440_v25 = vstv %s1797_s15  ;;  %s2558_s15 = sld [smem:[#allocation9 + $0x54]] }
  0xad   : > { %v441_v56 = vmul.f32 %v440_v25, %v435_v52 }
  0xae   : > { %1372 = vrot.lane.b32.xlu1 %v1299_v51, %s2231_s29  ;;  %s1798_s29 = sld [smem:[#allocation9 + $0xe]]  ;;  %v535_v33 = vstv %s2554_s17  ;;  %s2585_s17 = sld [smem:[#allocation9 + $0x47]] }
  0xaf   : > { %v442_v0 = vadd.f32 %v441_v56, %v438_v53  ;;  %v536_v41 = vmul.f32 %v535_v33, %v532_v30 }
  0xb2   : > { %1396 = vrot.lane.b32.xlu1 %v1299_v51, %s2232_s30  ;;  %s1799_s30 = sld [smem:[#allocation9 + $0x3f]]  ;;  %v538_v34 = vstv %s2558_s15  ;;  %s2244_s15 = smov 80  }
  0xb3   : > { %v539_v42 = vmul.f32 %v538_v34, %v533_v35 }
  0xb4   : > { %v461_v57 = vstv %s1798_s29  ;;  %s2563_s29 = sld [smem:[#allocation9 + $0x5b]] }
  0xb5   : > { %v462_v1 = vmul.f32 %v461_v57, %v458_v59  ;;  %v540_v16 = vadd.f32 %v539_v42, %v536_v41  ;;  %v593_v57 = vld [vmem:[#allocation4 + $0x1] ss:$2 sm:$0x7]  ;;  %v633_v59 = vld [vmem:[#allocation4] ss:$2 sm:$0x7] }
  0xb6   : > { %1420 = vrot.lane.b32.xlu1 %v1299_v51, %s2233_s22  ;;  %s2545_s22 = sld [smem:[#allocation9 + $0x46]] }
  0xb8   : > { %v464_v58 = vstv %s1799_s30  ;;  %s2242_s30 = smov 112  }
  0xb9   : > { %v465_v2 = vmul.f32 %v464_v58, %v459_v60 }
  0xba   : > { %1444 = vrot.lane.b32.xlu1 %v1299_v51, %s2234_s18  ;;  %s2543_s18 = sld [smem:[#allocation9 + $0x15]]  ;;  %v562_v46 = vstv %s2563_s29  ;;  %s2609_s29 = sld [smem:[#allocation9 + $0x4f]] }
  0xbb   : > { %v466_v15 = vadd.f32 %v465_v2, %v462_v1  ;;  %v563_v12 = vmul.f32 %v562_v46, %v557_v47  ;;  %v792_v47 = vstv %s2611_s4  ;;  %s3146_s4 = smov 77  }
  0xbc   : > { %v488_v5 = vstv %s2545_s22  ;;  %s2575_s22 = sld [smem:[#allocation9 + $0x32]] }
  0xbd   : > { %v489_v9 = vmul.f32 %v488_v5, %v483_v6  ;;  %v634_v5 = vld [vmem:[#allocation4 + $0x1] ss:$2 sm:$0x7] }
  0xbe   : > { %1497 = vrot.lane.b32.xlu1 %v2483_v54, %s2235_s28  ;;  %s2240_s28 = smov 35  }
  0xc0   : > { %v485_v4 = vstv %s2543_s18  ;;  %s2570_s18 = sld [smem:[#allocation9 + $0x1]] }
  0xc2   : > { %1521 = vrot.lane.b32.xlu1 %v2483_v54, %s2236_s19  ;;  %s2550_s19 = sld [smem:[#allocation9 + $0x4d]]  ;;  %v598_v56 = vstv %s2575_s22 }
  0xc3   : > { %s2628_s22 = sld [smem:[#allocation9 + $0x5d]] }
  0xc6   : > { %1545 = vrot.lane.b32.xlu1 %v2483_v54, %s2237_s7  ;;  %s2548_s7 = sld [smem:[#allocation9 + $0x1c]]  ;;  %v595_v53 = vstv %s2570_s18 }
  0xc7   : > { %s2621_s18 = sld [smem:[#allocation9 + $0x2c]] }
  0xc8   : > { %v514_v19 = vstv %s2550_s19  ;;  %s2579_s19 = sld [smem:[#allocation9 + $0x39]] }
  0xc9   : > { %v515_v26 = vmul.f32 %v514_v19, %v509_v20 }
  0xca   : > { %1569 = vrot.lane.b32.xlu1 %v2483_v54, %s2238_s6  ;;  %s2561_s6 = sld [smem:[#allocation9 + $0x2a]] }
  0xcc   : > { %v511_v18 = vstv %s2548_s7  ;;  %s2577_s7 = sld [smem:[#allocation9 + $0x8]] }
  0xcd   : > { %v512_v24 = vmul.f32 %v511_v18, %v507_v13 }
  0xce   : > { %1593 = vrot.lane.b32.xlu1 %v2483_v54, %s2239_s23  ;;  %s3103_s23 = smov 51  }
  0xcf   : > { %v516_v37 = vadd.f32 %v515_v26, %v512_v24  ;;  %v687_v26 = vstv %s2585_s17  ;;  %s3140_s17 = smov 127  }
  0xd0   : > { %v559_v45 = vstv %s2561_s6  ;;  %s2603_s6 = sld [smem:[#allocation9 + $0x1e]] }
  0xd1   : > { %v560_v50 = vmul.f32 %v559_v45, %v556_v38  ;;  %v941_v45 = vld [vmem:[#allocation4 + $0x3] ss:$2 sm:$0x7] }
  0xd2   : > { %1617 = vrot.lane.b32.xlu1 %v2483_v54, %s2240_s28  ;;  %s2243_s28 = smov 96   ;;  %v636_v2 = vstv %s2577_s7  ;;  %s2651_s7 = sld [smem:[#allocation9 + $0x2b]] }
  0xd3   : > { %v564_v58 = vadd.f32 %v563_v12, %v560_v50  ;;  %v708_v12 = vstv %s2632_s0  ;;  %s3141_s0 = smov 111  }
  0xd6   : > { %1641 = vrot.lane.b32.xlu1 %v2483_v54, %s3103_s23  ;;  %v486_v54 = vmul.f32 %v485_v4, %v482_v62  ;;  %s2593_s23 = sld [smem:[#allocation9 + $0x55]]  ;;  %v596_v62 = vmul.f32 %v595_v53, %v592_v3  ;;  %v639_v4 = vstv %s2579_s19  ;;  %s2653_s19 = sld [smem:[#allocation9 + $0x3b]] }
  0xd8   : > { %v492_v61 = vpop.permute.xlu1 %491  ;;  %v444_v63 = vpop.permute.xlu0 %443  ;;  %v490_v23 = vadd.f32 %v489_v9, %v486_v54  ;;  %v657_v54 = vld [vmem:[#allocation4] ss:$2 sm:$0x7] }
  0xd9   : > { %v445_v7 = vrot.slane %v444_v63, 7  ;;  %v493_v17 = vrot.slane %v492_v61, 7 }
  0xdb   : > { %v447_v8 = vsel %vm3114_vm13, %v445_v7, %v444_v63  ;;  %v495_v31 = vsel %vm3116_vm15, %v493_v17, %v492_v61  ;;  %v599_v63 = vmul.f32 %v598_v56, %v593_v57  ;;  %v660_v7 = vstv %s2595_s16  ;;  %v894_v17 = vld [vmem:[#allocation4 + $0x2] ss:$2 sm:$0x7]  ;;  %s2647_s16 = sld [smem:[#allocation9 + $0xa]] }
  0xdc   : > { %v449_v10 = vmul.f32 %v447_v8, %v442_v0  ;;  %v518_v11 = vpop.permute.xlu1 %517  ;;  %v468_v14 = vpop.permute.xlu0 %467  ;;  %v497_v36 = vmul.f32 %v495_v31, %v490_v23  ;;  %v663_v8 = vstv %s2597_s8  ;;  %v895_v23 = vld [vmem:[#allocation4 + $0x3] ss:$2 sm:$0x7]  ;;  %s2247_s8 = smov 32   ;;  %v735_v46 = vstv %s2593_s23  ;;  %s2735_s23 = sld [smem:[#allocation9 + $0x20]] }
  0xdd   : > { %v469_v21 = vrot.slane %v468_v14, 7  ;;  %v519_v32 = vrot.slane %v518_v11, 7  ;;  %v600_v13 = vadd.f32 %v599_v63, %v596_v62  ;;  %v711_v62 = vstv %s2636_s1  ;;  %v706_v63 = vld [vmem:[#allocation4 + $0x3] ss:$2 sm:$0x7]  ;;  %s2703_s1 = sld [smem:[#allocation9 + $0x17]] }
  0xde   : > { %451 = vrot.lane.b32.xlu0 %v449_v10, %s2242_s30  ;;  %s2581_s30 = sld [smem:[#allocation9 + $0x16]]  ;;  %v637_v10 = vmul.f32 %v636_v2, %v633_v59  ;;  %vm1327_vm13 = vcmask 801792   ;;  %vm1500_vm15 = vcmask 678912  }
  0xdf   : > { %v471_v22 = vsel %vm3115_vm14, %v469_v21, %v468_v14  ;;  %v521_v44 = vsel %vm520_vm0, %v519_v32, %v518_v11  ;;  %v640_v11 = vmul.f32 %v639_v4, %v634_v5  ;;  %v897_v21 = vstv %s2603_s6  ;;  %s2656_s6 = sld [smem:[#allocation9 + $0x5c]]  ;;  %v682_v32 = vld [vmem:[#allocation4 + $0x1] ss:$2 sm:$0x7] }
  0xe0   : > { %v473_v27 = vmul.f32 %v471_v22, %v466_v15  ;;  %v2568_v28 = vpop.permute.xlu1 %565  ;;  %v542_v29 = vpop.permute.xlu0 %541  ;;  %v523_v49 = vmul.f32 %v521_v44, %v516_v37  ;;  %v658_v15 = vld [vmem:[#allocation4 + $0x1] ss:$2 sm:$0x7]  ;;  %v900_v22 = vstv %s2609_s29  ;;  %v898_v35 = vmul.f32 %v897_v21, %v894_v17  ;;  %v940_v37 = vld [vmem:[#allocation4 + $0x2] ss:$2 sm:$0x7] }
  0xe1   : > { %v543_v48 = vrot.slane %v542_v29, 7  ;;  %v567_v39 = vrot.slane %v2568_v28, 7  ;;  %v664_v30 = vmul.f32 %v663_v8, %v658_v15  ;;  %v641_v31 = vadd.f32 %v640_v11, %v637_v10  ;;  %s2673_s29 = sld [smem:[#allocation9 + $0x3a]] }
  0xe2   : > { %475 = vrot.lane.b32.xlu0 %v473_v27, %s2243_s28  ;;  %s2591_s28 = sld [smem:[#allocation9 + $0x24]]  ;;  %v681_v27 = vld [vmem:[#allocation4] ss:$2 sm:$0x7]  ;;  %v946_v44 = vstv %s2628_s22  ;;  %s2680_s22 = sld [smem:[#allocation9 + $0x26]]  ;;  %v979_v2 = vstv %s2647_s16  ;;  %v982_v8 = vstv %s2653_s19  ;;  %v712_v11 = vmul.f32 %v711_v62, %v706_v63 }
  0xe3   : > { %v545_v52 = vsel %vm3112_vm1, %v543_v48, %v542_v29  ;;  %v569_v1 = vsel %vm3113_vm2, %v567_v39, %v2568_v28  ;;  %v661_v29 = vmul.f32 %v660_v7, %v657_v54  ;;  %v795_v48 = vstv %s2613_s27  ;;  %v2700_v7 = vld [vmem:[#allocation4 + $0x1] ss:$2 sm:$0x7]  ;;  %v729_v54 = vld [vmem:[#allocation4 + $0x2] ss:$2 sm:$0x7] }
  0xe4   : > { %v2583_v40 = vpop.permute.xlu1 %642  ;;  %v2587_v43 = vpop.permute.xlu0 %618  ;;  %v547_v60 = vmul.f32 %v545_v52, %v540_v16  ;;  %v571_v9 = vmul.f32 %v569_v1, %v564_v58  ;;  %v684_v24 = vstv %s2581_s30  ;;  %s2667_s30 = sld [smem:[#allocation9 + $0x9]]  ;;  %v705_v52 = vld [vmem:[#allocation4 + $0x2] ss:$2 sm:$0x7]  ;;  %v947_v56 = vmul.f32 %v946_v44, %v941_v45  ;;  %s2248_s16 = smov 62  }
  0xe5   : > { %v620_v6 = vrot.slane %v2587_v43, 7  ;;  %v644_v19 = vrot.slane %v2583_v40, 7  ;;  %v665_v50 = vadd.f32 %v664_v30, %v661_v29  ;;  %v853_v1 = vstv %s2615_s25  ;;  %s3142_s19 = smov 95   ;;  %v1006_v30 = vld [vmem:[#allocation4 + $0x2] ss:$2 sm:$0x3] }
  0xe6   : > { %499 = vrot.lane.b32.xlu0 %v497_v36, %s2244_s15  ;;  %s2245_s15 = smov 64   ;;  %v901_v36 = vmul.f32 %v900_v22, %v895_v23  ;;  %v856_v21 = vstv %s2630_s24  ;;  %v759_v45 = vstv %s2656_s6  ;;  %vm701_vm0 = vcmask 646144   ;;  %v790_v62 = vld [vmem:[#allocation4 + $0x1] ss:$2 sm:$0x7]  ;;  %s2249_s6 = smov 63  }
  0xe7   : > { %v622_v20 = vsel %vm3120_vm3, %v620_v6, %v2587_v43  ;;  %v646_v41 = vsel %vm645_vm4, %v644_v19, %v2583_v40  ;;  %v943_v43 = vstv %s2621_s18  ;;  %v688_v40 = vmul.f32 %v687_v26, %v682_v32  ;;  %s2678_s18 = sld [smem:[#allocation9 + $0x49]]  ;;  %v2698_v6 = vld [vmem:[#allocation4] ss:$2 sm:$0x7]  ;;  %s3147_s27 = smov 47  }
  0xe8   : > { %v2599_v51 = vpop.permute.xlu1 %690  ;;  %v2601_v25 = vpop.permute.xlu0 %666  ;;  %v732_v28 = vstv %s2591_s28  ;;  %v624_v33 = vmul.f32 %v622_v20, %v600_v13  ;;  %v648_v16 = vmul.f32 %v646_v41, %v641_v31  ;;  %v902_v39 = vadd.f32 %v901_v36, %v898_v35  ;;  %v730_v20 = vld [vmem:[#allocation4 + $0x3] ss:$2 sm:$0x7]  ;;  %s3143_s28 = smov 30   ;;  %s2816_s25 = sld [smem:[#allocation9 + $0x4b]] }
  0xe9   : > { %v668_v42 = vrot.slane %v2601_v25, 7  ;;  %v944_v53 = vmul.f32 %v943_v43, %v940_v37  ;;  %v692_v58 = vrot.slane %v2599_v51, 7  ;;  %v980_v26 = vmul.f32 %v979_v2, %v2698_v6  ;;  %v1007_v31 = vld [vmem:[#allocation4 + $0x3] ss:$2 sm:$0x3]  ;;  %s2250_s24 = smov 124  }
  0xea   : > { %525 = vrot.lane.b32.xlu0 %v523_v49, %s2245_s15  ;;  %s2246_s15 = smov 48   ;;  %v685_v49 = vmul.f32 %v684_v24, %v681_v27  ;;  %v756_v24 = vstv %s2651_s7  ;;  %v983_v27 = vmul.f32 %v982_v8, %v2700_v7  ;;  %v736_v36 = vmul.f32 %v735_v46, %v730_v20  ;;  %s2726_s7 = sld [smem:[#allocation9 + $0x48]] }
  0xeb   : > { %v670_v59 = vsel %vm669_vm6, %v668_v42, %v2601_v25  ;;  %v709_v25 = vmul.f32 %v708_v12, %v705_v52  ;;  %v948_v15 = vadd.f32 %v947_v56, %v944_v53  ;;  %v694_v19 = vsel %vm693_vm5, %v692_v58, %v2599_v51  ;;  %v753_v42 = vld [vmem:[#allocation4 + $0x2] ss:$2 sm:$0x7]  ;;  %v2746_v53 = vld [vmem:[#allocation4 + $0x3] ss:$2 sm:$0x7] }
  0xec   : > { %v2617_v61 = vpop.permute.xlu1 %738  ;;  %v2619_v0 = vpop.permute.xlu0 %714  ;;  %v689_v4 = vadd.f32 %v688_v40, %v685_v49  ;;  %v733_v51 = vmul.f32 %v732_v28, %v729_v54  ;;  %v754_v49 = vld [vmem:[#allocation4 + $0x3] ss:$2 sm:$0x7]  ;;  %v984_v46 = vadd.f32 %v983_v27, %v980_v26  ;;  %v2744_v52 = vld [vmem:[#allocation4 + $0x2] ss:$2 sm:$0x7]  ;;  %v1040_v56 = vstv %s2680_s22 }
  0xed   : > { %v716_v22 = vrot.slane %v2619_v0, 7  ;;  %v713_v37 = vadd.f32 %v712_v11, %v709_v25  ;;  %v740_v28 = vrot.slane %v2617_v61, 7  ;;  %v1043_v58 = vstv %s2695_s26  ;;  %s3145_s26 = smov 109   ;;  %s2761_s22 = sld [smem:[#allocation9 + $0x2e]] }
  0xee   : > { %549 = vrot.lane.b32.xlu0 %v547_v60, %s2246_s15  ;;  %s2675_s15 = sld [smem:[#allocation9 + $0x18]]  ;;  %v696_v35 = vmul.f32 %v694_v19, %v689_v4  ;;  %v757_v2 = vmul.f32 %v756_v24, %v753_v42  ;;  %v760_v4 = vmul.f32 %v759_v45, %v754_v49  ;;  %v875_v11 = vstv %s2703_s1  ;;  %s3150_s1 = smov 126  }
  0xef   : > { %v718_v44 = vsel %vm717_vm10, %v716_v22, %v2619_v0  ;;  %v831_v0 = vstv %s2667_s30  ;;  %v742_v25 = vsel %vm3117_vm9, %v740_v28, %v2617_v61  ;;  %v1041_v61 = vmul.f32 %v1040_v56, %v2744_v52  ;;  %v1190_v28 = vld [vmem:[#allocation4 + $0x2] ss:$2 sm:$0x7]  ;;  %s3149_s30 = smov 31  }
  0xf0   : > { %v2638_v14 = vpop.permute.xlu1 %815  ;;  %v2640_v18 = vpop.permute.xlu0 %762  ;;  %v720_v63 = vmul.f32 %v718_v44, %v713_v37  ;;  %vm1106_vm10 = vcmask 662528   ;;  %v1148_v22 = vstv %s2717_s13  ;;  %v796_v27 = vmul.f32 %v795_v48, %v790_v62  ;;  %s2776_s13 = sld [smem:[#allocation9 + $0x25]]  ;;  %v1191_v44 = vld [vmem:[#allocation4 + $0x3] ss:$2 sm:$0x7] }
  0xf1   : > { %v764_v8 = vrot.slane %v2640_v18, 7  ;;  %v1193_v37 = vstv %s2735_s23  ;;  %vm653_vm1 = vcmask 908288   ;;  %v878_v45 = vstv %s2726_s7  ;;  %s2823_s7 = sld [smem:[#allocation9 + $0x3]]  ;;  %s2825_s23 = sld [smem:[#allocation9 + $0x34]] }
  0xf2   : > { %573 = vrot.lane.b32.xlu0 %v571_v9, %s2247_s8  ;;  %s2684_s8 = sld [smem:[#allocation9 + $0x4]]  ;;  %v672_v9 = vmul.f32 %v670_v59, %v665_v50  ;;  %v737_v59 = vadd.f32 %v736_v36, %v733_v51  ;;  %v761_v51 = vadd.f32 %v760_v4, %v757_v2  ;;  %vm1154_vm2 = vcmask 924672  }
  0xf3   : > { %v1194_v62 = vmul.f32 %v1193_v37, %v1190_v28  ;;  %v918_v37 = vld [vmem:[#allocation4 + $0x2] ss:$2 sm:$0x7]  ;;  %vm1130_vm14 = vcmask 793600   ;;  %vm1303_vm9 = vcmask 670720   ;;  %vm552_vm3 = vcmask 392192  }
  0xf4   : > { %v2658_v34 = vpop.permute.xlu1 %859  ;;  %v2660_v38 = vpop.permute.xlu0 %837  ;;  %v1009_v32 = vstv %s2675_s15  ;;  %s3144_s15 = smov 79   ;;  %v744_v24 = vmul.f32 %v742_v25, %v737_v59  ;;  %v1238_v25 = vld [vmem:[#allocation4 + $0x2] ss:$2 sm:$0x7] }
  0xf5   : > { %v1010_v50 = vmul.f32 %v1009_v32, %v1006_v30  ;;  %v817_v32 = vrot.slane %v2638_v14, 7  ;;  %v839_v59 = vrot.slane %v2660_v38, 7 }
  0xf6   : > { %626 = vrot.lane.b32.xlu0 %v624_v33, %s3140_s17  ;;  %s2693_s17 = sld [smem:[#allocation9 + $0x35]]  ;;  %v1012_v33 = vstv %s2678_s18  ;;  %s2740_s18 = sld [smem:[#allocation9 + $0x51]] }
  0xf7   : > { %v1013_v12 = vmul.f32 %v1012_v33, %v1007_v31  ;;  %v766_v33 = vsel %vm3119_vm12, %v764_v8, %v2640_v18  ;;  %v1239_v8 = vld [vmem:[#allocation4 + $0x3] ss:$2 sm:$0x7]  ;;  %vm528_vm12 = vcmask 523264  }
  0xf8   : > { %v904_v3 = vpop.permute.xlu1 %903  ;;  %v2682_v57 = vpop.permute.xlu0 %881  ;;  %v1080_v40 = vstv %s2684_s8  ;;  %s2763_s8 = sld [smem:[#allocation9 + $0x5f]] }
  0xf9   : > { %v905_v60 = vrot.slane %v904_v3, 7  ;;  %v1081_v54 = vmul.f32 %v1080_v40, %v2698_v6 }
  0xfa   : > { %650 = vrot.lane.b32.xlu0 %v648_v16, %s3141_s0  ;;  %s2715_s0 = sld [smem:[#allocation9 + $0x12]] }
  0xfb   : > { %v907_v5 = vsel %vm906_vm7, %v905_v60, %v904_v3  ;;  %v789_v60 = vld [vmem:[#allocation4] ss:$2 sm:$0x7]  ;;  %vm677_vm7 = vcmask 777216  }
  0xfc   : > { %v909_v10 = vmul.f32 %v907_v5, %v902_v39  ;;  %v950_v13 = vpop.permute.xlu1 %949  ;;  %v2705_v17 = vpop.permute.xlu0 %927  ;;  %v1083_v16 = vstv %s2693_s17  ;;  %v834_v39 = vstv %s2673_s29  ;;  %v793_v26 = vmul.f32 %v792_v47, %v789_v60  ;;  %s2784_s17 = sld [smem:[#allocation9 + $0xc]]  ;;  %v872_v60 = vld [vmem:[#allocation4] ss:$2 sm:$0x7]  ;;  %s2811_s29 = sld [smem:[#allocation9 + $0x1a]] }
  0xfd   : > { %v951_v23 = vrot.slane %v950_v13, 7  ;;  %v1196_v42 = vstv %s2740_s18  ;;  %s2835_s18 = sld [smem:[#allocation9 + $0x11]] }
  0xfe   : > { %911 = vrot.lane.b32.xlu1 %v909_v10, %s2248_s16  ;;  %674 = vrot.lane.b32.xlu0 %v672_v9, %s3142_s19  ;;  %v1084_v9 = vmul.f32 %v1083_v16, %v2700_v7  ;;  %v1142_v10 = vld [vmem:[#allocation4] ss:$2 sm:$0x7]  ;;  %s2786_s16 = sld [smem:[#allocation9 + $0x3d]]  ;;  %v797_v40 = vadd.f32 %v796_v27, %v793_v26  ;;  %s2797_s19 = sld [smem:[#allocation9 + $0x56]]  ;;  %v1244_v4 = vstv %s2763_s8 }
  0xff   : > { %v952_v29 = vsel %vm749_vm11, %v951_v23, %v950_v13  ;;  %v1014_v13 = vadd.f32 %v1013_v12, %v1010_v50  ;;  %v1143_v23 = vld [vmem:[#allocation4 + $0x1] ss:$2 sm:$0x7]  ;;  %v768_v12 = vmul.f32 %v766_v33, %v761_v51  ;;  %s2252_s8 = smov 60  }
 0x100   : > { %v954_v41 = vmul.f32 %v952_v29, %v948_v15  ;;  %v2728_v43 = vpop.permute.xlu1 %1127  ;;  %v1104_v3 = vpop.permute.xlu0 %1103  ;;  %v1044_v15 = vmul.f32 %v1043_v58, %v2746_v53  ;;  %v1145_v20 = vstv %s2715_s0  ;;  %v828_v29 = vld [vmem:[#allocation4] ss:$2 sm:$0x7]  ;;  %v1085_v36 = vadd.f32 %v1084_v9, %v1081_v54  ;;  %v851_v50 = vld [vmem:[#allocation4 + $0x1] ss:$2 sm:$0x7] }
 0x101   : > { %v1105_v19 = vrot.slane %v1104_v3, 7  ;;  %v1146_v48 = vmul.f32 %v1145_v20, %v1142_v10  ;;  %v832_v16 = vmul.f32 %v831_v0, %v828_v29  ;;  %s3148_s0 = smov 45   ;;  %v873_v54 = vld [vmem:[#allocation4 + $0x1] ss:$2 sm:$0x7] }
 0x102   : > { %956 = vrot.lane.b32.xlu1 %v954_v41, %s3143_s28  ;;  %698 = vrot.lane.b32.xlu0 %v696_v35, %s3144_s15  ;;  %v829_v35 = vld [vmem:[#allocation4 + $0x1] ss:$2 sm:$0x7]  ;;  %v1045_v47 = vadd.f32 %v1044_v15, %v1041_v61  ;;  %v1149_v41 = vmul.f32 %v1148_v22, %v1143_v23  ;;  %v857_v61 = vmul.f32 %v856_v21, %v851_v50  ;;  %v861_v22 = vrot.slane %v2658_v34, 7  ;;  %s2251_s28 = smov 92   ;;  %s3151_s15 = smov 110  }
 0x103   : > { %v1107_v18 = vsel %vm1106_vm10, %v1105_v19, %v1104_v3  ;;  %v835_v56 = vmul.f32 %v834_v39, %v829_v35  ;;  %v818_v3 = vsel %vm701_vm0, %v817_v32, %v2638_v14  ;;  %v1241_v39 = vstv %s2761_s22  ;;  %v1316_v51 = vld [vmem:[#allocation4 + $0x1] ss:$2 sm:$0x7]  ;;  %s2846_s22 = sld [smem:[#allocation9 + $0x59]] }
 0x104   : > { %v2750_v5 = vpop.permute.xlu1 %1175  ;;  %v1152_v30 = vpop.permute.xlu0 %1151  ;;  %v1109_v2 = vmul.f32 %v1107_v18, %v1085_v36  ;;  %v1150_v0 = vadd.f32 %v1149_v41, %v1146_v48  ;;  %vm1202_vm10 = vcmask 138240   ;;  %v876_v19 = vmul.f32 %v875_v11, %v872_v60  ;;  %v1315_v11 = vld [vmem:[#allocation4] ss:$2 sm:$0x7] }
 0x105   : > { %v1153_v49 = vrot.slane %v1152_v30, 7  ;;  %v836_v15 = vadd.f32 %v835_v56, %v832_v16  ;;  %v1242_v23 = vmul.f32 %v1241_v39, %v1238_v25  ;;  %v879_v26 = vmul.f32 %v878_v45, %v873_v54  ;;  %v1363_v56 = vld [vmem:[#allocation4 + $0x2] ss:$2 sm:$0x7] }
 0x106   : > { %986 = vrot.lane.b32.xlu1 %v984_v46, %s3145_s26  ;;  %722 = vrot.lane.b32.xlu0 %v720_v63, %s2249_s6  ;;  %v850_v46 = vld [vmem:[#allocation4] ss:$2 sm:$0x7]  ;;  %v1197_v63 = vmul.f32 %v1196_v42, %v1191_v44  ;;  %v1321_v32 = vstv %s2786_s16  ;;  %v921_v36 = vstv %s2776_s13  ;;  %v862_v48 = vsel %vm653_vm1, %v861_v22, %v2658_v34  ;;  %v919_v42 = vld [vmem:[#allocation4 + $0x3] ss:$2 sm:$0x7] }
 0x107   : > { %v854_v14 = vmul.f32 %v853_v1, %v850_v46  ;;  %v1155_v9 = vsel %vm1154_vm2, %v1153_v49, %v1152_v30  ;;  %v840_v1 = vsel %vm677_vm7, %v839_v59, %v2660_v38  ;;  %v1318_v38 = vstv %s2784_s17  ;;  %s2837_s26 = sld [smem:[#allocation9 + $0x42]]  ;;  %s2844_s6 = sld [smem:[#allocation9 + $0x28]] }
 0x108   : > { %v2771_v31 = vpop.permute.xlu1 %1199  ;;  %v1157_v21 = vmul.f32 %v1155_v9, %v1150_v0  ;;  %v1198_v27 = vadd.f32 %v1197_v63, %v1194_v62  ;;  %v842_v35 = vmul.f32 %v840_v1, %v836_v15  ;;  %vm1250_vm2 = vcmask 400384   ;;  %s3152_s13 = smov 94   ;;  %s2860_s17 = sld [smem:[#allocation9 + $0xb]] }
 0x109   : > { %v1201_v10 = vrot.slane %v2771_v31, 7  ;;  %v858_v33 = vadd.f32 %v857_v61, %v854_v14  ;;  %v883_v41 = vrot.slane %v2682_v57, 7  ;;  %v1319_v45 = vmul.f32 %v1318_v38, %v1315_v11  ;;  %s2862_s16 = sld [smem:[#allocation9 + $0x3c]] }
 0x10a   : > { %1016 = vrot.lane.b32.xlu1 %v1014_v13, %s3146_s4  ;;  %746 = vrot.lane.b32.xlu0 %v744_v24, %s3147_s27  ;;  %v820_v13 = vmul.f32 %v818_v3, %v797_v40  ;;  %v1245_v24 = vmul.f32 %v1244_v4, %v1239_v8  ;;  %v1322_v18 = vmul.f32 %v1321_v32, %v1316_v51  ;;  %v1366_v16 = vstv %s2811_s29  ;;  %v1364_v3 = vld [vmem:[#allocation4 + $0x3] ss:$2 sm:$0x7]  ;;  %s2852_s4 = sld [smem:[#allocation9 + $0x1f]]  ;;  %s2854_s27 = sld [smem:[#allocation9 + $0x50]] }
 0x10b   : > { %v1203_v29 = vsel %vm1202_vm10, %v1201_v10, %v2771_v31  ;;  %v924_v31 = vstv %s2797_s19  ;;  %vm629_vm10 = vcmask 1039360   ;;  %v880_v49 = vadd.f32 %v879_v26, %v876_v19  ;;  %s3153_s19 = smov 78   ;;  %s2871_s29 = sld [smem:[#allocation9 + $0x5e]] }
 0x10c   : > { %v2792_v58 = vpop.permute.xlu1 %1223  ;;  %v1246_v28 = vadd.f32 %v1245_v24, %v1242_v23  ;;  %v1205_v44 = vmul.f32 %v1203_v29, %v1198_v27  ;;  %v864_v34 = vmul.f32 %v862_v48, %v858_v33  ;;  %v922_v46 = vmul.f32 %v921_v36, %v918_v37  ;;  %v1411_v23 = vld [vmem:[#allocation4 + $0x2] ss:$2 sm:$0x7]  ;;  %v1412_v24 = vld [vmem:[#allocation4 + $0x3] ss:$2 sm:$0x7] }
 0x10d   : > { %v925_v50 = vmul.f32 %v924_v31, %v919_v42  ;;  %v884_v59 = vsel %vm629_vm10, %v883_v41, %v2682_v57  ;;  %v929_v60 = vrot.slane %v2705_v17, 7  ;;  %v1369_v63 = vstv %s2816_s25  ;;  %s2875_s25 = sld [smem:[#allocation9 + $0x6]]  ;;  %v1118_v48 = vld [vmem:[#allocation4] ss:$2 sm:$0x7] }
 0x10e   : > { %1047 = vrot.lane.b32.xlu1 %v1045_v47, %s3148_s0  ;;  %770 = vrot.lane.b32.xlu0 %v768_v12, %s3149_s30  ;;  %v1323_v0 = vadd.f32 %v1322_v18, %v1319_v45  ;;  %v965_v4 = vstv %s2823_s7  ;;  %v968_v25 = vstv %s2825_s23  ;;  %v886_v57 = vmul.f32 %v884_v59, %v880_v49  ;;  %s2253_s0 = smov 28   ;;  %s2869_s30 = sld [smem:[#allocation9 + $0x2d]]  ;;  %v1119_v41 = vld [vmem:[#allocation4 + $0x1] ss:$2 sm:$0x7] }
 0x10f   : > { %v926_v8 = vadd.f32 %v925_v50, %v922_v46  ;;  %v1367_v54 = vmul.f32 %v1366_v16, %v1363_v56  ;;  %v1370_v9 = vmul.f32 %v1369_v63, %v1364_v3  ;;  %v966_v61 = vmul.f32 %v965_v4, %v2698_v6  ;;  %s3154_s7 = smov 46   ;;  %s2254_s23 = smov 107   ;;  %v1472_v16 = vld [vmem:[#allocation4 + $0x1] ss:$2 sm:$0x7] }
 0x110   : > { %v1248_v20 = vpop.permute.xlu1 %1247  ;;  %v969_v15 = vmul.f32 %v968_v25, %v2700_v7  ;;  %v993_v19 = vstv %s2835_s18  ;;  %v1417_v27 = vstv %s2846_s22  ;;  %v1025_v38 = vstv %s2852_s4  ;;  %s2255_s18 = smov 75   ;;  %s2902_s22 = sld [smem:[#allocation9 + $0x14]] }
 0x111   : > { %v1249_v30 = vrot.slane %v1248_v20, 7  ;;  %v1371_v1 = vadd.f32 %v1370_v9, %v1367_v54  ;;  %v994_v51 = vmul.f32 %v993_v19, %v2698_v6  ;;  %v1028_v32 = vstv %s2854_s27  ;;  %s2911_s4 = sld [smem:[#allocation9 + $0x36]]  ;;  %s3156_s27 = smov 93   ;;  %v1214_v9 = vld [vmem:[#allocation4 + $0x2] ss:$2 sm:$0x7] }
 0x112   : > { %1111 = vrot.lane.b32.xlu1 %v1109_v2, %s2250_s24  ;;  %822 = vrot.lane.b32.xlu0 %v820_v13, %s3150_s1  ;;  %s2877_s24 = sld [smem:[#allocation9 + $0x37]]  ;;  %s2879_s1 = sld [smem:[#allocation9 + $0x19]]  ;;  %v970_v11 = vadd.f32 %v969_v15, %v966_v61  ;;  %v1418_v37 = vmul.f32 %v1417_v27, %v1412_v24  ;;  %v1029_v31 = vmul.f32 %v1028_v32, %v2746_v53  ;;  %v1124_v45 = vstv %s2862_s16  ;;  %v1536_v19 = vld [vmem:[#allocation4] ss:$2 sm:$0x7] }
 0x113   : > { %v1251_v40 = vsel %vm1250_vm2, %v1249_v30, %v1248_v20  ;;  %vm773_vm2 = vcmask 252928   ;;  %v996_v20 = vstv %s2837_s26  ;;  %s2894_s26 = sld [smem:[#allocation9 + $0x27]]  ;;  %v1474_v50 = vstv %s2875_s25  ;;  %s2256_s16 = smov 61  }
 0x114   : > { %v2828_v47 = vpop.permute.xlu1 %1300  ;;  %v1253_v2 = vmul.f32 %v1251_v40, %v1246_v28  ;;  %v930_v10 = vsel %vm773_vm2, %v929_v60, %v2705_v17  ;;  %v997_v29 = vmul.f32 %v996_v20, %v2700_v7  ;;  %v1026_v7 = vmul.f32 %v1025_v38, %v2744_v52  ;;  %v1471_v40 = vld [vmem:[#allocation4] ss:$2 sm:$0x7]  ;;  %s2936_s25 = sld [smem:[#allocation9 + $0x21]] }
 0x115   : > { %v932_v17 = vmul.f32 %v930_v10, %v926_v8  ;;  %v1054_v42 = vstv %s2869_s30  ;;  %v1057_v28 = vstv %s2871_s29  ;;  %v1125_v63 = vmul.f32 %v1124_v45, %v1119_v41  ;;  %s2928_s30 = sld [smem:[#allocation9 + $0x22]]  ;;  %s2934_s29 = sld [smem:[#allocation9 + $0x53]]  ;;  %v1340_v45 = vld [vmem:[#allocation4 + $0x1] ss:$2 sm:$0x7] }
 0x116   : > { %1159 = vrot.lane.b32.xlu1 %v1157_v21, %s2251_s28  ;;  %844 = vrot.lane.b32.xlu0 %v842_v35, %s3151_s15  ;;  %v1414_v21 = vstv %s2844_s6  ;;  %s2884_s28 = sld [smem:[#allocation9 + $0x4a]]  ;;  %s3155_s15 = smov 125   ;;  %v998_v6 = vadd.f32 %v997_v29, %v994_v51  ;;  %v1030_v3 = vadd.f32 %v1029_v31, %v1026_v7  ;;  %v1055_v59 = vmul.f32 %v1054_v42, %v2744_v52  ;;  %v1274_v29 = vld [vmem:[#allocation4] ss:$2 sm:$0x7] }
 0x117   : > { %v1415_v36 = vmul.f32 %v1414_v21, %v1411_v23  ;;  %s2896_s6 = sld [smem:[#allocation9 + $0x58]]  ;;  %v1058_v60 = vmul.f32 %v1057_v28, %v2746_v53  ;;  %v1129_v54 = vrot.slane %v2728_v43, 7  ;;  %v1215_v53 = vld [vmem:[#allocation4 + $0x3] ss:$2 sm:$0x7]  ;;  %v1280_v32 = vstv %s2911_s4  ;;  %s2262_s4 = smov 90  }
 0x118   : > { %v1325_v12 = vpop.permute.xlu1 %1324  ;;  %v1169_v56 = vstv %s2879_s1  ;;  %v1537_v23 = vld [vmem:[#allocation4 + $0x1] ss:$2 sm:$0x7]  ;;  %s2941_s1 = sld [smem:[#allocation9 + $0x52]]  ;;  %v1225_v31 = vrot.slane %v2792_v58, 7 }
 0x119   : > { %v1326_v62 = vrot.slane %v1325_v12, 7  ;;  %v1419_v49 = vadd.f32 %v1418_v37, %v1415_v36  ;;  %v1217_v15 = vstv %s2894_s26  ;;  %v1131_v24 = vsel %vm1130_vm14, %v1129_v54, %v2728_v43  ;;  %v1339_v42 = vld [vmem:[#allocation4] ss:$2 sm:$0x7]  ;;  %s2962_s26 = sld [smem:[#allocation9 + $0x61]] }
 0x11a   : > { %1207 = vrot.lane.b32.xlu1 %v1205_v44, %s2252_s8  ;;  %866 = vrot.lane.b32.xlu0 %v864_v34, %s3152_s13  ;;  %v1121_v44 = vstv %s2860_s17  ;;  %v1166_v34 = vld [vmem:[#allocation4 + $0x2] ss:$2 sm:$0x7]  ;;  %s2906_s8 = sld [smem:[#allocation9 + $0x45]]  ;;  %s2921_s17 = sld [smem:[#allocation9 + $0x13]]  ;;  %v1218_v51 = vmul.f32 %v1217_v15, %v1214_v9  ;;  %vm1226_vm14 = vcmask 269312  }
 0x11b   : > { %v1328_v39 = vsel %vm1327_vm13, %v1326_v62, %v1325_v12  ;;  %vm1375_vm13 = vcmask 15360   ;;  %v1477_v12 = vstv %s2877_s24  ;;  %s2909_s13 = sld [smem:[#allocation9 + $0x5]]  ;;  %v1122_v62 = vmul.f32 %v1121_v44, %v1118_v48  ;;  %s3157_s24 = smov 29  }
 0x11c   : > { %v2856_v14 = vpop.permute.xlu1 %1348  ;;  %v1330_v13 = vmul.f32 %v1328_v39, %v1323_v0  ;;  %v1167_v0 = vld [vmem:[#allocation4 + $0x3] ss:$2 sm:$0x7]  ;;  %v1478_v8 = vmul.f32 %v1477_v12, %v1472_v16  ;;  %v1170_v52 = vmul.f32 %v1169_v56, %v1166_v34  ;;  %v1587_v12 = vstv %s2928_s30  ;;  %s2264_s30 = smov 91  }
 0x11d   : > { %v1126_v61 = vadd.f32 %v1125_v63, %v1122_v62  ;;  %v1220_v20 = vstv %s2896_s6  ;;  %v1585_v16 = vld [vmem:[#allocation4 + $0x3] ss:$2 sm:$0x7]  ;;  %v1227_v56 = vsel %vm1226_vm14, %v1225_v31, %v2792_v58  ;;  %s2260_s6 = smov 76   ;;  %vm1399_vm14 = vcmask 146432  }
 0x11e   : > { %888 = vrot.lane.b32.xlu0 %v886_v57, %s3153_s19  ;;  %1255 = vrot.lane.b32.xlu1 %v1253_v2, %s2253_s0  ;;  %v1172_v2 = vstv %s2884_s28  ;;  %v1475_v57 = vmul.f32 %v1474_v50, %v1471_v40  ;;  %s2257_s19 = smov 43   ;;  %s2924_s0 = sld [smem:[#allocation9 + $0x44]] }
 0x11f   : > { %v1173_v10 = vmul.f32 %v1172_v2, %v1167_v0  ;;  %v1133_v36 = vmul.f32 %v1131_v24, %v1126_v61  ;;  %s2259_s28 = smov 122   ;;  %v1387_v2 = vld [vmem:[#allocation4 + $0x2] ss:$2 sm:$0x7] }
 0x120   : > { %v1373_v22 = vpop.permute.xlu1 %1372  ;;  %v1542_v27 = vstv %s2906_s8  ;;  %s2968_s8 = sld [smem:[#allocation9 + $0x3e]] }
 0x121   : > { %v1374_v26 = vrot.slane %v1373_v22, 7  ;;  %v1277_v38 = vstv %s2909_s13  ;;  %s2261_s13 = smov 44  }
 0x122   : > { %934 = vrot.lane.b32.xlu0 %v932_v17, %s3154_s7  ;;  %1332 = vrot.lane.b32.xlu1 %v1330_v13, %s2254_s23  ;;  %v1059_v13 = vadd.f32 %v1058_v60, %v1055_v59  ;;  %v1278_v28 = vmul.f32 %v1277_v38, %v1274_v29  ;;  %s2949_s7 = sld [smem:[#allocation9 + $0x2f]]  ;;  %s2258_s23 = smov 108   ;;  %v1590_v60 = vstv %s2934_s29  ;;  %v1638_v29 = vstv %s2962_s26 }
 0x123   : > { %v1376_v30 = vsel %vm1375_vm13, %v1374_v26, %v1373_v22  ;;  %vm1423_vm13 = vcmask 277504   ;;  %v1479_v22 = vadd.f32 %v1478_v8, %v1475_v57  ;;  %v1177_v26 = vrot.slane %v2750_v5, 7  ;;  %v1388_v57 = vld [vmem:[#allocation4 + $0x3] ss:$2 sm:$0x7]  ;;  %s2265_s29 = smov 58  }
 0x124   : > { %v1378_v33 = vmul.f32 %v1376_v30, %v1371_v1  ;;  %v2889_v35 = vpop.permute.xlu1 %1396  ;;  %v1539_v1 = vstv %s2902_s22  ;;  %v1221_v30 = vmul.f32 %v1220_v20, %v1215_v53  ;;  %v1345_v40 = vstv %s2924_s0  ;;  %s2964_s22 = sld [smem:[#allocation9 + $0xd]]  ;;  %s2995_s0 = sld [smem:[#allocation9 + $0x5a]] }
 0x125   : > { %v1540_v41 = vmul.f32 %v1539_v1, %v1536_v19  ;;  %v1346_v0 = vmul.f32 %v1345_v40, %v1340_v45  ;;  %v1435_v19 = vld [vmem:[#allocation4 + $0x2] ss:$2 sm:$0x7]  ;;  %v1436_v1 = vld [vmem:[#allocation4 + $0x3] ss:$2 sm:$0x7] }
 0x126   : > { %972 = vrot.lane.b32.xlu0 %v970_v11, %s3155_s15  ;;  %1380 = vrot.lane.b32.xlu1 %v1378_v33, %s2255_s18  ;;  %v1174_v11 = vadd.f32 %v1173_v10, %v1170_v52  ;;  %v1275_v33 = vld [vmem:[#allocation4 + $0x1] ss:$2 sm:$0x7]  ;;  %s2953_s15 = sld [smem:[#allocation9 + $0x60]]  ;;  %v1591_v10 = vmul.f32 %v1590_v60, %v1585_v16  ;;  %s3167_s26 = smov 51  }
 0x127   : > { %v1281_v44 = vmul.f32 %v1280_v32, %v1275_v33  ;;  %s2956_s18 = sld [smem:[#allocation9 + $0x30]] }
 0x128   : > { %v1421_v18 = vpop.permute.xlu1 %1420 }
 0x129   : > { %v1422_v46 = vrot.slane %v1421_v18, 7  ;;  %v1282_v62 = vadd.f32 %v1281_v44, %v1278_v28 }
 0x12a   : > { %1000 = vrot.lane.b32.xlu0 %v998_v6, %s3156_s27  ;;  %v1543_v6 = vmul.f32 %v1542_v27, %v1537_v23  ;;  %s2978_s27 = sld [smem:[#allocation9 + $0x1b]] }
 0x12b   : > { %v1424_v39 = vsel %vm1423_vm13, %v1422_v46, %v1421_v18  ;;  %vm1178_vm13 = vcmask 7168   ;;  %v1222_v18 = vadd.f32 %v1221_v30, %v1218_v51  ;;  %v1633_v30 = vld [vmem:[#allocation4 + $0x3] ss:$2 sm:$0x7] }
 0x12c   : > { %v1426_v4 = vmul.f32 %v1424_v39, %v1419_v49  ;;  %v2918_v25 = vpop.permute.xlu1 %1444  ;;  %v1179_v7 = vsel %vm1178_vm13, %v1177_v26, %v2750_v5  ;;  %v1342_v49 = vstv %s2921_s17  ;;  %v1584_v5 = vld [vmem:[#allocation4 + $0x2] ss:$2 sm:$0x7]  ;;  %v1544_v50 = vadd.f32 %v1543_v6, %v1540_v41  ;;  %s2980_s17 = sld [smem:[#allocation9 + $0x4c]] }
 0x12d   : > { %v1181_v34 = vmul.f32 %v1179_v7, %v1174_v11  ;;  %v1343_v63 = vmul.f32 %v1342_v49, %v1339_v42  ;;  %v1390_v39 = vstv %s2936_s25  ;;  %v1229_v8 = vmul.f32 %v1227_v56, %v1222_v18  ;;  %v1512_v6 = vld [vmem:[#allocation4] ss:$2 sm:$0x7]  ;;  %v1513_v7 = vld [vmem:[#allocation4 + $0x1] ss:$2 sm:$0x7] }
 0x12e   : > { %1032 = vrot.lane.b32.xlu0 %v1030_v3, %s2256_s16  ;;  %1428 = vrot.lane.b32.xlu1 %v1426_v4, %s2257_s19  ;;  %v1302_v3 = vrot.slane %v2828_v47, 7  ;;  %v1393_v4 = vstv %s2941_s1  ;;  %v1588_v52 = vmul.f32 %v1587_v12, %v1584_v5  ;;  %vm1351_vm13 = vcmask 932864   ;;  %s2263_s16 = smov 123   ;;  %s2993_s19 = sld [smem:[#allocation9 + $0x29]] }
 0x12f   : > { %v1391_v61 = vmul.f32 %v1390_v39, %v1387_v2  ;;  %v1394_v15 = vmul.f32 %v1393_v4, %v1388_v57  ;;  %v1347_v20 = vadd.f32 %v1346_v0, %v1343_v63  ;;  %v1635_v26 = vstv %s2956_s18  ;;  %s2266_s25 = smov 59   ;;  %v427_v39 = vpop.permute.xlu0 %426  ;;  %v1608_v4 = vld [vmem:[#allocation4 + $0x2] ss:$2 sm:$0x7]  ;;  %s2268_s1 = smov 26  }
 0x130   : > { %v1498_v17 = vpop.permute.xlu1 %1497  ;;  %v1304_v53 = vsel %vm1303_vm9, %v1302_v3, %v2828_v47  ;;  %vm1596_vm9 = vcmask 154624   ;;  %v1592_v24 = vadd.f32 %v1591_v10, %v1588_v52  ;;  %v1398_v11 = vrot.slane %v2889_v35, 7  ;;  %v1561_v3 = vld [vmem:[#allocation4 + $0x3] ss:$2 sm:$0x7]  ;;  %s1795_s18 = sld [smem:[#allocation9 + $0x31]] }
 0x131   : > { %v1499_v21 = vrot.slane %v1498_v17, 7  ;;  %v1306_v23 = vmul.f32 %v1304_v53, %v1282_v62  ;;  %v1395_v38 = vadd.f32 %v1394_v15, %v1391_v61  ;;  %v1639_v28 = vmul.f32 %v1638_v29, %v1633_v30  ;;  %v1609_v52 = vld [vmem:[#allocation4 + $0x3] ss:$2 sm:$0x7] }
 0x132   : > { %1061 = vrot.lane.b32.xlu0 %v1059_v13, %s3157_s24  ;;  %v1350_v13 = vrot.slane %v2856_v14, 7  ;;  %v1400_v44 = vsel %vm1399_vm14, %v1398_v11, %v2889_v35  ;;  %v1446_v45 = vrot.slane %v2918_v25, 7  ;;  %v1566_v56 = vstv %s2980_s17  ;;  %s2267_s24 = smov 27   ;;  %v399_v11 = vld [vmem:[#allocation4] ss:$2 sm:$0x7] }
 0x133   : > { %v1501_v43 = vsel %vm1500_vm15, %v1499_v21, %v1498_v17  ;;  %vm1548_vm15 = vcmask 941056   ;;  %v1438_v17 = vstv %s2949_s7  ;;  %v1632_v21 = vld [vmem:[#allocation4 + $0x2] ss:$2 sm:$0x7]  ;;  %v1402_v5 = vmul.f32 %v1400_v44, %v1395_v38  ;;  %s2269_s7 = smov 106  }
 0x134   : > { %v1503_v37 = vmul.f32 %v1501_v43, %v1479_v22  ;;  %v2944_v48 = vpop.permute.xlu1 %1521  ;;  %v1441_v22 = vstv %s2953_s15  ;;  %v1352_v27 = vsel %vm1351_vm13, %v1350_v13, %v2856_v14  ;;  %v1439_v32 = vmul.f32 %v1438_v17, %v1435_v19  ;;  %s402_s15 = sld [smem:[#allocation9]] }
 0x135   : > { %v1442_v33 = vmul.f32 %v1441_v22, %v1436_v1  ;;  %v1515_v43 = vstv %s2964_s22  ;;  %v1354_v41 = vmul.f32 %v1352_v27, %v1347_v20  ;;  %v1636_v42 = vmul.f32 %v1635_v26, %v1632_v21  ;;  %s1909_s22 = sshll.u32 %s2185_s12, 5  ;;  %s1671_s12 = scalar_lea.sflag [#allocation7], %s2422_s21 }
 0x136   : > { %1135 = vrot.lane.b32.xlu0 %v1133_v36, %s2258_s23  ;;  %1505 = vrot.lane.b32.xlu1 %v1503_v37, %s2259_s28  ;;  %v1518_v36 = vstv %s2968_s8  ;;  %v1516_v49 = vmul.f32 %v1515_v43, %v1512_v6  ;;  %vm3118_vm13 = vcmask 416768   ;;  %v1523_v16 = vrot.slane %v2944_v48, 7  ;;  %s2270_s23 = smov 74   ;;  %s2271_s28 = smov 42  }
 0x137   : > { %v1443_v18 = vadd.f32 %v1442_v33, %v1439_v32  ;;  %v1519_v40 = vmul.f32 %v1518_v36, %v1513_v7  ;;  %v1567_v0 = vmul.f32 %v1566_v56, %v1561_v3  ;;  %vm1572_vm14 = vcmask 23552   ;;  %s3032_s17 = scalar_lea.hbm %s3086_s2, %s1909_s22 }
 0x138   : > { %v1546_v46 = vpop.permute.xlu1 %1545  ;;  %v406_v27 = vstv %s1795_s18  ;;  %v428_v32 = vrot.slane %v427_v39, 7 }
 0x139   : > { %v1547_v59 = vrot.slane %v1546_v46, 7  ;;  %v1520_v60 = vadd.f32 %v1519_v40, %v1516_v49 }
 0x13a   : > { %1183 = vrot.lane.b32.xlu0 %v1181_v34, %s2260_s6  ;;  %v1563_v34 = vstv %s2978_s27  ;;  %s1789_s6 = sshll.u32 %s2422_s21, 1 }
 0x13b   : > { %v1549_v58 = vsel %vm1548_vm15, %v1547_v59, %v1546_v46  ;;  %vm1447_vm15 = vcmask 408576   ;;  %v1560_v46 = vld [vmem:[#allocation4 + $0x2] ss:$2 sm:$0x7]  ;;  %s189_s8 = scalar_lea.vmem [#allocation10], %s1789_s6 }
 0x13c   : > { %v1551_v54 = vmul.f32 %v1549_v58, %v1544_v50  ;;  %v2971_v9 = vpop.permute.xlu1 %1569  ;;  %v1640_v50 = vadd.f32 %v1639_v28, %v1636_v42  ;;  %v1448_v12 = vsel %vm1447_vm15, %v1446_v45, %v2918_v25  ;;  %v1564_v2 = vmul.f32 %v1563_v34, %v1560_v46 }
 0x13d   : > { %v1450_v63 = vmul.f32 %v1448_v12, %v1443_v18  ;;  %v1571_v58 = vrot.slane %v2971_v9, 7  ;;  %vm1620_vm15 = vcmask 285696  }
 0x13e   : > { %1231 = vrot.lane.b32.xlu0 %v1229_v8, %s2261_s13  ;;  %1553 = vrot.lane.b32.xlu1 %v1551_v54, %s2262_s4  ;;  %v1611_v8 = vstv %s2993_s19  ;;  %v1614_v54 = vstv %s2995_s0  ;;  %v1568_v53 = vadd.f32 %v1567_v0, %v1564_v2  ;;  %s1685_s13 = sshll.u32 %s189_s8, 4  ;;  %s2272_s19 = smov [#allocation10]   ;;  %s3034_s13 = int_to_ptr.vmem [resolvable:$true] %s1685_s13 }
 0x13f   : > { %v1612_v13 = vmul.f32 %v1611_v8, %v1608_v4  ;;  %v1615_v61 = vmul.f32 %v1614_v54, %v1609_v52  ;;  %v1573_v19 = vsel %vm1572_vm14, %v1571_v58, %v2971_v9  ;;  %v403_v9 = vstv %s402_s15  ;;  %s2111_s0 = sshll.u32 %s2272_s19, 4  ;;  %s2112_s0 = int_to_ptr.vmem [resolvable:$false] %s2111_s0 }
 0x140   : > { %v1594_v47 = vpop.permute.xlu1 %1593  ;;  %v404_v30 = vmul.f32 %v403_v9, %v399_v11  ;;  %vm454_vm14 = vcmask 916480   ;;  %p2114_p4 = scmp.lt.s32.totalorder %s3034_s13, %s2112_s0 }
 0x141   : > { %v1595_v51 = vrot.slane %v1594_v47, 7  ;;  %v1616_v17 = vadd.f32 %v1615_v61, %v1612_v13 }
 0x142   : > { %1308 = vrot.lane.b32.xlu0 %v1306_v23, %s2263_s16  ;;  %s2107_s16 = scalar_lea.vmem %s3034_s13, 32 }
 0x143   : > { %v1597_v37 = vsel %vm1596_vm9, %v1595_v51, %v1594_v47  ;;  %vm1524_vm9 = vcmask 809984   ;;  %v401_v51 = vld [vmem:[#allocation4 + $0x1] ss:$2 sm:$0x7]  ;;  %p2108_p8 = scmp.ne.s32.totalorder %s3034_s13, %s2107_s16 }
 0x144   : > { %v1599_v31 = vmul.f32 %v1597_v37, %v1592_v24  ;;  %v1618_v14 = vpop.permute.xlu1 %1617  ;;  %v1525_v25 = vsel %vm1524_vm9, %v1523_v16, %v2944_v48  ;;  %v1575_v48 = vmul.f32 %v1573_v19, %v1568_v53  ;;  %v407_v38 = vmul.f32 %v406_v27, %v401_v51 }
 0x145   : > { %v1527_v10 = vmul.f32 %v1525_v25, %v1520_v60  ;;  %v1619_v20 = vrot.slane %v1618_v14, 7  ;;  %vm3121_vm9 = vcmask 629760   ;;  %p2109_p12 = pnand %p2108_p8, %p3169_p2 }
 0x146   : > { %1356 = vrot.lane.b32.xlu0 %v1354_v41, %s2264_s30  ;;  %1601 = vrot.lane.b32.xlu1 %v1599_v31, %s2265_s29  ;;  %v408_v36 = vadd.f32 %v407_v38, %v404_v30  ;;  %v430_v37 = vsel %vm3121_vm9, %v428_v32, %v427_v39  ;;  %vm576_vm9 = vcmask 261120   ;;  %s2113_s30 = scalar_lea.vmem %s2112_s0, 64 }
 0x147   : > { %v1621_v1 = vsel %vm1620_vm15, %v1619_v20, %v1618_v14  ;;  %vm478_vm15 = vcmask 785408   ;;  %p2110_p5 = pneg %p2109_p12  ;;  %p2115_p9 = scmp.lt.s32.totalorder %s2113_s30, %s2107_s16 }
 0x148   : > { %v1642_v35 = vpop.permute.xlu1 %1641  ;;  %v1623_v23 = vmul.f32 %v1621_v1, %v1616_v17  ;;  %v432_v14 = vmul.f32 %v430_v37, %v408_v36 }
 0x149   : > { %v1643_v59 = vrot.slane %v1642_v35, 7  ;;  %p2116_p13 = por %p2115_p9, %p2114_p4 }
 0x14a   : > { %1404 = vrot.lane.b32.xlu0 %v1402_v5, %s2266_s25 }
 0x14b   : > { %v1645_v62 = vsel %vm3118_vm13, %v1643_v59, %v1642_v35  ;;  %vm502_vm13 = vcmask 654336   ;;  %p2117_p11 = pnand %p2116_p13, %p2110_p5 }
 0x14c   : > { %v1647_v57 = vmul.f32 %v1645_v62, %v1640_v50 }
 0x14e   : > { %1452 = vrot.lane.b32.xlu0 %v1450_v63, %s2267_s24  ;;  %1649 = vrot.lane.b32.xlu1 %v1647_v57, %s2268_s1 }
 0x150   : > { %v452_v15 = vpop.permute.xlu0 %451 }
 0x151   : > { %v453_v43 = vrot.slane %v452_v15, 1 }
 0x152   : > { %1529 = vrot.lane.b32.xlu0 %v1527_v10, %s2269_s7 }
 0x153   : > { %v455_v7 = vsel %vm454_vm14, %v452_v15, %v453_v43  ;;  %vm1138_vm14 = vcmask 883712  }
 0x154   : > { %v476_v22 = vpop.permute.xlu0 %475  ;;  %v457_v44 = vadd.f32 %v455_v7, %v432_v14 }
 0x155   : > { %v477_v41 = vrot.slane %v476_v22, 1 }
 0x156   : > { %1577 = vrot.lane.b32.xlu0 %v1575_v48, %s2270_s23 }
 0x157   : > { %v479_v42 = vsel %vm478_vm15, %v476_v22, %v477_v41  ;;  %vm1162_vm15 = vcmask 752640  }
 0x158   : > { %v500_v47 = vpop.permute.xlu0 %499  ;;  %v481_v40 = vadd.f32 %v479_v42, %v457_v44 }
 0x159   : > { %v501_v31 = vrot.slane %v500_v47, 1 }
 0x15a   : > { %1625 = vrot.lane.b32.xlu0 %v1623_v23, %s2271_s28 }
 0x15b   : > { %v503_v18 = vsel %vm502_vm13, %v500_v47, %v501_v31  ;;  %vm1114_vm13 = vcmask 1014784  }
 0x15c   : > { %v526_v24 = vpop.permute.xlu0 %525  ;;  %v505_v46 = vadd.f32 %v503_v18, %v481_v40 }
 0x15d   : > { %v527_v28 = vrot.slane %v526_v24, 7 }
 0x15f   : > { %v529_v5 = vsel %vm528_vm12, %v527_v28, %v526_v24  ;;  %vm3162_vm12 = vcmask 891904  }
 0x160   : > { %v550_v26 = vpop.permute.xlu0 %549  ;;  %v531_v16 = vadd.f32 %v529_v5, %v505_v46 }
 0x161   : > { %v551_v49 = vrot.slane %v550_v26, 7 }
 0x163   : > { %v553_v50 = vsel %vm552_vm3, %v551_v49, %v550_v26  ;;  %vm725_vm3 = vcmask 515072  }
 0x164   : > { %v574_v21 = vpop.permute.xlu0 %573  ;;  %v555_v59 = vadd.f32 %v553_v50, %v531_v16 }
 0x165   : > { %v575_v34 = vrot.slane %v574_v21, 7 }
 0x167   : > { %v577_v56 = vsel %vm576_vm9, %v575_v34, %v574_v21  ;;  %vm3166_vm9 = vcmask 236544  }
 0x168   : > { %v627_v29 = vpop.permute.xlu0 %626  ;;  %v579_v2 = vadd.f32 %v577_v56, %v555_v59 }
 0x169   : > { %v628_v12 = vrot.slane %v627_v29, 1 }
 0x16b   : > { %v630_v62 = vsel %vm629_vm10, %v627_v29, %v628_v12  ;;  %vm3164_vm10 = vcmask 629760  }
 0x16c   : > { %v651_v33 = vpop.permute.xlu0 %650  ;;  %v632_v4 = vadd.f32 %v630_v62, %v579_v2 }
 0x16d   : > { %v652_v3 = vrot.slane %v651_v33, 1 }
 0x16f   : > { %v654_v0 = vsel %vm653_vm1, %v651_v33, %v652_v3  ;;  %vm914_vm1 = vcmask 506880  }
 0x170   : > { %v675_v6 = vpop.permute.xlu0 %674  ;;  %v912_v57 = vpop.permute.xlu1 %911  ;;  %v656_v54 = vadd.f32 %v654_v0, %v632_v4 }
 0x171   : > { %v676_v63 = vrot.slane %v675_v6, 1  ;;  %v913_v33 = vrot.slane %v912_v57, 7 }
 0x173   : > { %v678_v58 = vsel %vm677_vm7, %v675_v6, %v676_v63  ;;  %v915_v31 = vsel %vm914_vm1, %v913_v33, %v912_v57  ;;  %vm1035_vm7 = vcmask 498688   ;;  %vm1210_vm1 = vcmask 490496  }
 0x174   : > { %v699_v45 = vpop.permute.xlu0 %698  ;;  %v680_v53 = vadd.f32 %v678_v58, %v656_v54  ;;  %v957_v19 = vpop.permute.xlu1 %956 }
 0x175   : > { %v700_v39 = vrot.slane %v699_v45, 1  ;;  %v958_v14 = vrot.slane %v957_v19, 7 }
 0x177   : > { %v702_v52 = vsel %vm701_vm0, %v699_v45, %v700_v39  ;;  %vm3163_vm0 = vcmask 760832  }
 0x178   : > { %v723_v35 = vpop.permute.xlu0 %722  ;;  %v704_v20 = vadd.f32 %v702_v52, %v680_v53  ;;  %v987_v21 = vpop.permute.xlu1 %986 }
 0x179   : > { %v724_v8 = vrot.slane %v723_v35, 7  ;;  %v988_v5 = vrot.slane %v987_v21, 1 }
 0x17b   : > { %v726_v61 = vsel %vm725_vm3, %v724_v8, %v723_v35  ;;  %v989_v16 = vsel %vm3162_vm12, %v987_v21, %v988_v5  ;;  %vm1186_vm3 = vcmask 621568   ;;  %vm1359_vm12 = vcmask 744448  }
 0x17c   : > { %v747_v60 = vpop.permute.xlu0 %746  ;;  %v728_v22 = vadd.f32 %v726_v61, %v704_v20  ;;  %v1017_v36 = vpop.permute.xlu1 %1016 }
 0x17d   : > { %v748_v10 = vrot.slane %v747_v60, 7  ;;  %v1018_v56 = vrot.slane %v1017_v36, 7 }
 0x17f   : > { %v750_v48 = vsel %vm749_vm11, %v748_v10, %v747_v60  ;;  %vm3158_vm11 = vcmask 637952   ;;  %v1019_v0 = vsel %vm3164_vm10, %v1018_v56, %v1017_v36  ;;  %vm1431_vm10 = vcmask 351232  }
 0x180   : > { %v771_v25 = vpop.permute.xlu0 %770  ;;  %v752_v24 = vadd.f32 %v750_v48, %v728_v22  ;;  %v1048_v45 = vpop.permute.xlu1 %1047 }
 0x181   : > { %v772_v15 = vrot.slane %v771_v25, 7  ;;  %v1049_v39 = vrot.slane %v1048_v45, 7 }
 0x183   : > { %v774_v23 = vsel %vm773_vm2, %v772_v15, %v771_v25  ;;  %vm3165_vm2 = vcmask 367616  }
 0x184   : > { %v823_v13 = vpop.permute.xlu0 %822  ;;  %v776_v9 = vadd.f32 %v774_v23, %v752_v24  ;;  %v1112_v59 = vpop.permute.xlu1 %1111  ;;  %v1050_v52 = vsel %vm3165_vm2, %v1049_v39, %v1048_v45  ;;  %vm1455_vm2 = vcmask 220160  }
 0x185   : > { %v824_v17 = vrot.slane %v823_v13, 1  ;;  %v1113_v10 = vrot.slane %v1112_v59, 1 }
 0x187   : > { %v825_v26 = vsel %vm693_vm5, %v823_v13, %v824_v17  ;;  %vm3159_vm5 = vcmask 375808   ;;  %v1115_v20 = vsel %vm1114_vm13, %v1112_v59, %v1113_v10  ;;  %vm1508_vm13 = vcmask 998400  }
 0x188   : > { %v845_v1 = vpop.permute.xlu0 %844  ;;  %v827_v29 = vadd.f32 %v825_v26, %v776_v9  ;;  %v1160_v58 = vpop.permute.xlu1 %1159 }
 0x189   : > { %v846_v47 = vrot.slane %v845_v1, 1  ;;  %v1161_v48 = vrot.slane %v1160_v58, 1 }
 0x18b   : > { %v847_v11 = vsel %vm669_vm6, %v845_v1, %v846_v47  ;;  %vm3161_vm6 = vcmask 1022976   ;;  %v1163_v26 = vsel %vm1162_vm15, %v1160_v58, %v1161_v48  ;;  %vm1580_vm15 = vcmask 605184  }
 0x18c   : > { %v867_v27 = vpop.permute.xlu0 %866  ;;  %v849_v38 = vadd.f32 %v847_v11, %v827_v29  ;;  %v1208_v22 = vpop.permute.xlu1 %1207 }
 0x18d   : > { %v868_v51 = vrot.slane %v867_v27, 1  ;;  %v1209_v21 = vrot.slane %v1208_v22, 7 }
 0x18f   : > { %v869_v30 = vsel %vm645_vm4, %v867_v27, %v868_v51  ;;  %vm3160_vm4 = vcmask 244736  }
 0x190   : > { %v889_v32 = vpop.permute.xlu0 %888  ;;  %v871_v37 = vadd.f32 %v869_v30, %v849_v38  ;;  %v959_v40 = vsel %vm3160_vm4, %v958_v14, %v957_v19  ;;  %v1256_v27 = vpop.permute.xlu1 %1255  ;;  %v1211_v38 = vsel %vm1210_vm1, %v1209_v21, %v1208_v22  ;;  %vm1311_vm4 = vcmask 1006592  }
 0x191   : > { %v890_v43 = vrot.slane %v889_v32, 1  ;;  %vm1628_vm1 = vcmask 343040  }
 0x193   : > { %v891_v41 = vsel %vm3158_vm11, %v889_v32, %v890_v43  ;;  %vm1234_vm11 = vcmask 359424   ;;  %v1257_v32 = vrot.slane %v1256_v27, 7 }
 0x194   : > { %v893_v6 = vadd.f32 %v891_v41, %v871_v37  ;;  %v935_v7 = vpop.permute.xlu0 %934  ;;  %v1333_v43 = vpop.permute.xlu1 %1332 }
 0x195   : > { %v936_v42 = vrot.slane %v935_v7, 7 }
 0x196   : > { %v917_v28 = vadd.f32 %v915_v31, %v893_v6  ;;  %v1334_v31 = vrot.slane %v1333_v43, 1 }
 0x197   : > { %v937_v44 = vsel %vm3159_vm5, %v936_v42, %v935_v7  ;;  %vm1258_vm5 = vcmask 228352  }
 0x198   : > { %v939_v18 = vadd.f32 %v937_v44, %v917_v28  ;;  %v973_v49 = vpop.permute.xlu0 %972  ;;  %v1259_v7 = vsel %vm1258_vm5, %v1257_v32, %v1256_v27  ;;  %v1381_v42 = vpop.permute.xlu1 %1380  ;;  %vm3168_vm5 = vcmask 416768  }
 0x199   : > { %v974_v34 = vrot.slane %v973_v49, 1 }
 0x19a   : > { %v961_v46 = vadd.f32 %v959_v40, %v939_v18  ;;  %v1382_v40 = vrot.slane %v1381_v42, 7 }
 0x19b   : > { %v975_v35 = vsel %vm3161_vm6, %v973_v49, %v974_v34  ;;  %vm1335_vm6 = vcmask 875520  }
 0x19c   : > { %v977_v50 = vadd.f32 %v975_v35, %v961_v46  ;;  %v1001_v12 = vpop.permute.xlu0 %1000  ;;  %v1336_v49 = vsel %vm1335_vm6, %v1333_v43, %v1334_v31 }
 0x19d   : > { %v1002_v3 = vrot.slane %v1001_v12, 1 }
 0x19e   : > { %v991_v60 = vadd.f32 %v989_v16, %v977_v50 }
 0x19f   : > { %v1003_v62 = vsel %vm3163_vm0, %v1001_v12, %v1002_v3  ;;  %vm1383_vm0 = vcmask 613376  }
 0x1a0   : > { %v1005_v63 = vadd.f32 %v1003_v62, %v991_v60  ;;  %v1033_v2 = vpop.permute.xlu0 %1032  ;;  %v1429_v34 = vpop.permute.xlu1 %1428  ;;  %v1384_v16 = vsel %vm1383_vm0, %v1382_v40, %v1381_v42 }
 0x1a1   : > { %v1034_v4 = vrot.slane %v1033_v2, 7  ;;  %v1430_v56 = vrot.slane %v1429_v34, 7 }
 0x1a2   : > { %v1021_v57 = vadd.f32 %v1019_v0, %v1005_v63 }
 0x1a3   : > { %v1036_v25 = vsel %vm1035_vm7, %v1034_v4, %v1033_v2  ;;  %vm1407_vm7 = vcmask 482304   ;;  %v1432_v0 = vsel %vm1431_vm10, %v1430_v56, %v1429_v34 }
 0x1a4   : > { %v1038_v8 = vadd.f32 %v1036_v25, %v1021_v57  ;;  %v1062_v54 = vpop.permute.xlu0 %1061 }
 0x1a5   : > { %v1063_v53 = vrot.slane %v1062_v54, 7 }
 0x1a6   : > { %v1052_v13 = vadd.f32 %v1050_v52, %v1038_v8 }
 0x1a7   : > { %v1064_v61 = vsel %vm3166_vm9, %v1063_v53, %v1062_v54  ;;  %vm1532_vm9 = vcmask 867328  }
 0x1a8   : > { %v1066_v15 = vadd.f32 %v1064_v61, %v1052_v13  ;;  %v1136_v19 = vpop.permute.xlu0 %1135  ;;  %v1506_v59 = vpop.permute.xlu1 %1505 }
 0x1a9   : > { %v1137_v17 = vrot.slane %v1136_v19, 1  ;;  %v1507_v39 = vrot.slane %v1506_v59, 1 }
 0x1aa   : > { %v1117_v1 = vadd.f32 %v1115_v20, %v1066_v15 }
 0x1ab   : > { %v1139_v23 = vsel %vm1138_vm14, %v1136_v19, %v1137_v17  ;;  %v1509_v52 = vsel %vm1508_vm13, %v1506_v59, %v1507_v39  ;;  %vm1556_vm14 = vcmask 736256  }
 0x1ac   : > { %v1141_v47 = vadd.f32 %v1139_v23, %v1117_v1  ;;  %v1184_v24 = vpop.permute.xlu0 %1183 }
 0x1ad   : > { %v1185_v9 = vrot.slane %v1184_v24, 7 }
 0x1ae   : > { %v1165_v11 = vadd.f32 %v1163_v26, %v1141_v47 }
 0x1af   : > { %v1187_v51 = vsel %vm1186_vm3, %v1185_v9, %v1184_v24  ;;  %vm1604_vm3 = vcmask 474112  }
 0x1b0   : > { %v1189_v29 = vadd.f32 %v1187_v51, %v1165_v11  ;;  %v1232_v30 = vpop.permute.xlu0 %1231  ;;  %v1554_v57 = vpop.permute.xlu1 %1553 }
 0x1b1   : > { %v1233_v33 = vrot.slane %v1232_v30, 7  ;;  %v1555_v10 = vrot.slane %v1554_v57, 1 }
 0x1b2   : > { %v1213_v36 = vadd.f32 %v1211_v38, %v1189_v29 }
 0x1b3   : > { %v1235_v37 = vsel %vm1234_vm11, %v1233_v33, %v1232_v30  ;;  %v1557_v48 = vsel %vm1556_vm14, %v1554_v57, %v1555_v10  ;;  %vm1652_vm11 = vcmask 211968  }
 0x1b4   : > { %v1237_v41 = vadd.f32 %v1235_v37, %v1213_v36  ;;  %v1309_v6 = vpop.permute.xlu0 %1308 }
 0x1b5   : > { %v1310_v14 = vrot.slane %v1309_v6, 1 }
 0x1b6   : > { %v1261_v28 = vadd.f32 %v1259_v7, %v1237_v41 }
 0x1b7   : > { %v1312_v44 = vsel %vm1311_vm4, %v1309_v6, %v1310_v14 }
 0x1b8   : > { %v1314_v45 = vadd.f32 %v1312_v44, %v1261_v28  ;;  %v1357_v18 = vpop.permute.xlu0 %1356  ;;  %v1602_v13 = vpop.permute.xlu1 %1601 }
 0x1b9   : > { %v1358_v5 = vrot.slane %v1357_v18, 1  ;;  %v1603_v17 = vrot.slane %v1602_v13, 7 }
 0x1ba   : > { %v1338_v46 = vadd.f32 %v1336_v49, %v1314_v45 }
 0x1bb   : > { %v1360_v35 = vsel %vm1359_vm12, %v1357_v18, %v1358_v5  ;;  %v1605_v21 = vsel %vm1604_vm3, %v1603_v17, %v1602_v13 }
 0x1bc   : > { %v1362_v50 = vadd.f32 %v1360_v35, %v1338_v46  ;;  %v1405_v12 = vpop.permute.xlu0 %1404 }
 0x1bd   : > { %v1406_v3 = vrot.slane %v1405_v12, 7 }
 0x1be   : > { %v1386_v60 = vadd.f32 %v1384_v16, %v1362_v50 }
 0x1bf   : > { %v1408_v62 = vsel %vm1407_vm7, %v1406_v3, %v1405_v12 }
 0x1c0   : > { %v1410_v63 = vadd.f32 %v1408_v62, %v1386_v60  ;;  %v1453_v2 = vpop.permute.xlu0 %1452  ;;  %v1650_v23 = vpop.permute.xlu1 %1649 }
 0x1c1   : > { %v1454_v4 = vrot.slane %v1453_v2, 7  ;;  %v1651_v9 = vrot.slane %v1650_v23, 7 }
 0x1c2   : > { %v1434_v25 = vadd.f32 %v1432_v0, %v1410_v63 }
 0x1c3   : > { %v1456_v58 = vsel %vm1455_vm2, %v1454_v4, %v1453_v2  ;;  %v1653_v30 = vsel %vm1652_vm11, %v1651_v9, %v1650_v23 }
 0x1c4   : > { %v1458_v8 = vadd.f32 %v1456_v58, %v1434_v25  ;;  %v1530_v54 = vpop.permute.xlu0 %1529 }
 0x1c5   : > { %v1531_v53 = vrot.slane %v1530_v54, 1 }
 0x1c6   : > { %v1511_v61 = vadd.f32 %v1509_v52, %v1458_v8 }
 0x1c7   : > { %v1533_v15 = vsel %vm1532_vm9, %v1530_v54, %v1531_v53 }
 0x1c8   : > { %v1535_v19 = vadd.f32 %v1533_v15, %v1511_v61  ;;  %v1578_v20 = vpop.permute.xlu0 %1577 }
 0x1c9   : > { %v1579_v22 = vrot.slane %v1578_v20, 7 }
 0x1ca   : > { %v1559_v1 = vadd.f32 %v1557_v48, %v1535_v19 }
 0x1cb   : > { %v1581_v47 = vsel %vm1580_vm15, %v1579_v22, %v1578_v20 }
 0x1cc   : > { %v1583_v24 = vadd.f32 %v1581_v47, %v1559_v1  ;;  %v1626_v26 = vpop.permute.xlu0 %1625 }
 0x1cd   : > { %v1627_v27 = vrot.slane %v1626_v26, 7 }
 0x1ce   : > { %v1607_v11 = vadd.f32 %v1605_v21, %v1583_v24 }
 0x1cf   : > { %v1629_v51 = vsel %vm1628_vm1, %v1627_v27, %v1626_v26 }
 0x1d0   : > { %v1631_v29 = vadd.f32 %v1629_v51, %v1607_v11 }
 0x1d2   : > { %v1655_v38 = vadd.f32 %v1653_v30, %v1631_v29 }
 0x1d4   : > { %v1902_v32 = vmul.f32 -1.442695, %v1655_v38 }
 0x1d6   : > { %2058 = vpow2.f32 %v1902_v32 }
 0x1e0   : > { %v2059_v33 = vpop.eup %2058 }
 0x1e1   : > { %v1659_v43 = vadd.f32 1.0, %v2059_v33 }
 0x1e3   : > { %2060 = vrcp.f32 %v1659_v43 }
 0x1ed   : > { %v2061_v36 = vpop.eup %2060 }
 0x1ee   : > { %v1662_v37 = vmul.f32 %v2061_v36, %v1655_v38 }
 0x1f0   : > { %1664 = vrot.lane.b32.xlu0 %v1662_v37, %s3167_s26 }
 0x262   : > { %v1665_v41 = vpop.permute.xlu0 %1664 }
 0x263   : > { %v1666_v6 = vrot.slane %v1665_v41, 1 }
 0x265   : > { %v1667_v7 = vsel %vm3168_vm5, %v1665_v41, %v1666_v6 }
 0x266   : > { %1669 = vst.msk [vmem:[%s189_s8] sm:$0x3] %vm2486_vm8, %v1667_v7 }
 0x267   : > { %2120 = shalt.err (!%p2117_p11)
}
 0x268   : > { %s2121_s21 = scalar_lea.hbm %s3032_s17, 32  ;;  %s2125_s24 = scalar_lea.hbm %s3086_s2, 64 }
 0x269   : > { %p2122_p3 = scmp.ne.s32.totalorder %s3032_s17, %s2121_s21  ;;  %p2126_p6 = scmp.lt.u32.totalorder %s3032_s17, %s3086_s2 }
 0x26a   : > { %p2127_p1 = scmp.lt.u32.totalorder %s2125_s24, %s2121_s21  ;;  %p2129_p8 = scmp.lt.u32.totalorder %s2121_s21, %s3032_s17 }
 0x26b   : > { %p2123_p7 = pnand %p2122_p3, %p3169_p2 }
 0x26c   : > { %p2128_p0 = por %p2127_p1, %p2126_p6 }
 0x26d   : > { %p2124_p10 = pneg %p2123_p7 }
 0x26e   : > { %p2130_p12 = por %p2129_p8, %p2128_p0 }
 0x270   : > { %p2131_p5 = pnand %p2130_p12, %p2124_p10 }
 0x272   : > { %2134 = shalt.err (!%p2131_p5)
}
 0x273   : > { %1916 = dma.vmem_to_hbm [thread:$0]  (%p3169_p2), %s3034_s13, 32, %s3032_s17, %s1671_s12  }
 0x274 PF: > { %s1697_s23 = sand.u32 1, %s2173_s9   ;;  %p3170_p4 = scmp.ne.s32.totalorder %s3128_s20, 0 }
 0x275   : > { %p3171_p9 = scmp.ge.s32.totalorder %s2193_s14, 2  ;;  %s1698_s28 = scalar_lea.sflag [#allocation7], %s1697_s23 }
 0x277   : > { %p1927_p13 = pnand %p3171_p9, %p3170_p4 }
 0x279   : > { %2168 = dma.done.wait (!%p1927_p13), %s1698_s28, 32  }
 0x27a   : > { %2170 = vsyncadd (!%p1927_p13), %s1698_s28, 4294967264  ;;  %s19_s14 = sadd.s32 1, %s2193_s14   ;;  %s3172_s12 = sld [smem:[#allocation14_spill]] }
 0x27b   : > { %p16_p11 = scmp.ge.s32.totalorder %s19_s14, 4   ;;  %s3173_s13 = sld [smem:[#allocation15_spill]] }
 0x27c   : > { %s3174_s9 = smov %s2177_s10  ;;  %s3175_s10 = smov %s2181_s11 }
 0x27d   : > { %s3176_s11 = smov %s2380_s5  ;;  %18 = sbr.rel (!%p16_p11) target bundleno = 10 (0xa), region = 94 }
 0x284   :  { %1703 = vsyncpa [#allocation6], 1 }
 0x285   :  { %1705 = vsyncpa [#allocation6 + $0x1], 1 }
 0x286   :  { %1706 = vsyncpa [#allocation7], 1 }
 0x287   :  { %1708 = vsyncpa [#allocation7 + $0x1], 1 }
 0x288   :  { %1709 = vsyncpa [#allocation8], 1 }
 0x289   :  { %1711 = vsyncpa [#allocation8 + $0x1], 1 }

</bundles_post_ra>
